<compile_context>
chip_gen: v7x
topology: tpu7x:2x2x1
jax: 0.10.0
libtpu: 0.0.40
codegen_flags: <defaults>
</compile_context>

<pallas_src>
import numpy as np

import jax
import jax.numpy as jnp
from jax.experimental import pallas as pl
from jax.experimental.pallas import tpu as pltpu

LEAKY_SLOPE = 0.01  # torch.nn.LeakyReLU default negative_slope


# ---------------------- fused multi-head attention pooling -------------------

def _attn_pool(hidden, lw_pow, mask_b, mask_f, scat, w2, b2, nh, fout):
    """Fused multi-head WeightedAttentionPooling.

    hidden : [R, H*(G+Mh)] pre-activation first-layer outputs of both MLPs of all
             heads, columns ordered [gate_h0 | .. | gate_h(H-1) | msg_h0 | ..].
    lw_pow : [R, H]   pow_h * log(pool_weights) per row / head.
    mask_b : [R, S]   bool membership one-hot (each row in exactly ONE segment).
    mask_f : [R, S]   f32 membership one-hot (gather-back matmuls).
    scat   : [S, R]   f32 scatter one-hot (segment-sum matmuls).
    w2     : [H*(G+Mh), OW] fused block-diagonal second layers
             (msg blocks in cols [0, H*fout), gate columns at [H*fout, H*fout+H)).
    b2     : [1, OW]  fused second-layer bias row.

    Returns [S, fout]: mean over heads of segment_softmax-weighted scatter_add.
    """
    hidden = jnp.where(hidden > 0, hidden, LEAKY_SLOPE * hidden)            # LeakyReLU

    # one fused second-layer matmul for gates of all heads + messages of all heads
    out2 = jnp.dot(hidden, w2, preferred_element_type=jnp.float32) + b2     # [R, OW]
    hf = nh * fout
    msg_all = out2[:, :hf]                                                  # [R, H*F]
    gate_all = out2[:, hf:hf + nh]                                          # [R, H]

    # per-segment max per head (softmax stabilisation, matches torch reference).
    neg_inf = jnp.float32(-jnp.inf)
    gmax_cols = []
    for h in range(nh):
        seg_max_h = jnp.max(jnp.where(mask_b, gate_all[:, h:h + 1], neg_inf),
                            axis=0, keepdims=True)                          # [1, S]
        gmax_cols.append(jnp.sum(jnp.where(mask_b, seg_max_h, 0.0),
                                 axis=1, keepdims=True))                    # [R, 1]
    gmax = jnp.concatenate(gmax_cols, axis=1)                               # [R, H]

    # all heads at once: one exp; segment-sum and gather-back as MXU matmuls
    g_all = jnp.exp(lw_pow + gate_all - gmax)                               # [R, H]
    denom = jnp.dot(scat, g_all, preferred_element_type=jnp.float32)        # [S, H]
    denom_b = jnp.dot(mask_f, denom, preferred_element_type=jnp.float32)    # [R, H]
    g_all = g_all * (1.0 / nh) / (denom_b + 1e-10)

    # head-weighted messages (only part that needs per-head handling)
    weighted = g_all[:, 0:1] * msg_all[:, :fout]
    for h in range(1, nh):
        weighted = weighted + g_all[:, h:h + 1] * msg_all[:, h * fout:(h + 1) * fout]

    # scatter_add over segments (natural [S,R] @ [R,F] MXU orientation)
    return jnp.dot(scat, weighted, preferred_element_type=jnp.float32)      # [S, fout]


# ------------------------------ fused kernel --------------------------------

def _make_kernel(cfg):
    E, F, N, M, C = cfg["E"], cfg["F"], cfg["N"], cfg["M"], cfg["C"]
    n_graph = cfg["n_graph"]
    groups = cfg["groups"]
    emb_off, pow_off = cfg["emb_off"], cfg["pow_off"]

    def kernel(x_ref, idxc_ref, idxr_ref, w_ref, out_ref):
        x_aug = x_ref[...]                                   # [N, E+1] = [elem_fea | wts]
        wts = x_aug[:, E:E + 1]                              # [N, 1] fractional weights

        # ---- embedding: unit row in the slab routes wts into the last column ----
        fea = (jnp.dot(x_aug, w_ref[emb_off:emb_off + E + 1, :F],
                       preferred_element_type=jnp.float32)
               + w_ref[emb_off + E + 1:emb_off + E + 2, :F])                 # [N, F]

        # ---- one-hot gather / membership / scatter masks (built once) ----
        idxc = idxc_ref[...]
        idxr = idxr_ref[...]
        self_col = idxc[:M, 0:1]
        nbr_col = idxc[:M, 1:2]
        cry_col = idxc[:N, 2:3]
        self_row = idxr[0:1, :M]
        cry_row = idxr[1:2, :N]

        pair_iota = jax.lax.broadcasted_iota(jnp.int32, (M, N), 1)
        self_mask = pair_iota == self_col                                    # [M, N]
        self_oh = self_mask.astype(jnp.float32)
        nbr_oh = (pair_iota == nbr_col).astype(jnp.float32)
        self_scat = (jax.lax.broadcasted_iota(jnp.int32, (N, M), 0)
                     == self_row).astype(jnp.float32)                        # [N, M]

        cry_mask = (jax.lax.broadcasted_iota(jnp.int32, (N, C), 1)
                    == cry_col)                                              # [N, C]
        cry_oh = cry_mask.astype(jnp.float32)
        cry_scat = (jax.lax.broadcasted_iota(jnp.int32, (C, N), 0)
                    == cry_row).astype(jnp.float32)                          # [C, N]

        # log(weights) hoisted; clamp guards w == 0 (ref computes w**pow directly)
        lw_elem = jnp.log(jnp.maximum(wts, 1e-30))                           # [N, 1]
        lw_nbr = jnp.dot(nbr_oh, lw_elem, preferred_element_type=jnp.float32)  # [M, 1]

        # ---- message-passing layers (python loop -> unrolled at trace time) ----
        for gi in range(n_graph):
            gc = groups[gi]
            nh, hdim, ow = gc["nh"], gc["hdim"], gc["out_w"]
            w1o, w2o, pc = gc["w1_off"], gc["w2_off"], gc["pow_col"]

            x_self = jnp.dot(self_oh, fea, preferred_element_type=jnp.float32)  # [M, F]
            x_nbr = jnp.dot(nbr_oh, fea, preferred_element_type=jnp.float32)    # [M, F]
            # split first layer: no [M, 2F] lane concat (W1 = [self rows|nbr rows|bias])
            hidden = (jnp.dot(x_self, w_ref[w1o:w1o + F, :hdim],
                              preferred_element_type=jnp.float32)
                      + jnp.dot(x_nbr, w_ref[w1o + F:w1o + 2 * F, :hdim],
                                preferred_element_type=jnp.float32)
                      + w_ref[w1o + 2 * F:w1o + 2 * F + 1, :hdim])               # [M, hdim]

            powr = w_ref[pow_off:pow_off + 1, pc:pc + nh]                        # [1, H]
            lw_pow = lw_nbr * powr                                               # [M, H]

            pooled = _attn_pool(hidden, lw_pow, self_mask, self_oh, self_scat,
                                w_ref[w2o:w2o + hdim, :ow],
                                w_ref[w2o + hdim:w2o + hdim + 1, :ow],
                                nh, F)                                           # [N, F]
            fea = pooled + fea                                                   # residual

        # ---- crystal pooling heads ----
        gc = groups[n_graph]
        nh, hdim, ow = gc["nh"], gc["hdim"], gc["out_w"]
        w1o, w2o, pc = gc["w1_off"], gc["w2_off"], gc["pow_col"]
        hidden = (jnp.dot(fea, w_ref[w1o:w1o + F, :hdim],
                          preferred_element_type=jnp.float32)
                  + w_ref[w1o + F:w1o + F + 1, :hdim])                           # [N, hdim]
        powr = w_ref[pow_off:pow_off + 1, pc:pc + nh]
        lw_pow = lw_elem * powr                                                  # [N, H]
        out_ref[...] = _attn_pool(hidden, lw_pow, cry_mask, cry_oh, cry_scat,
                                  w_ref[w2o:w2o + hdim, :ow],
                                  w_ref[w2o + hdim:w2o + hdim + 1, :ow],
                                  nh, F)                                         # [C, F]

    return kernel


# --------------------------- host-side param packing -------------------------

def _pack_params(params, f):
    """Pack ALL weights into one [R, slab_w] f32 slab (8-row-aligned blocks)."""
    groups = list(params["graphs"]) + [params["cry_pool"]]

    widths = [f]
    for heads in groups:
        nh = len(heads)
        g = heads[0]["gw1"].shape[1]
        mh = heads[0]["mw1"].shape[1]
        widths += [nh * (g + mh), nh * f + nh]
    widths.append(sum(len(heads) for heads in groups))
    slab_w = ((max(widths) + 127) // 128) * 128

    pieces, layout, row = [], {}, 0

    def add(name, mat):
        nonlocal row
        r, c = mat.shape
        assert c <= slab_w
        padded = np.zeros((((r + 7) // 8) * 8, slab_w), np.float32)
        padded[:r, :c] = mat
        pieces.append(padded)
        layout[name] = row
        row += padded.shape[0]

    # embedding slab: rows = [emb_w | 0], unit row (routes wts), bias row
    emb_w = np.asarray(params["emb_w"], np.float32)
    emb_b = np.asarray(params["emb_b"], np.float32)
    e = emb_w.shape[0]
    emb = np.zeros((e + 2, f), np.float32)
    emb[:e, :f - 1] = emb_w
    emb[e, f - 1] = 1.0
    emb[e + 1, :f - 1] = emb_b
    add("emb", emb)

    pows = []
    for gi, heads in enumerate(groups):
        nh = len(heads)
        din = heads[0]["gw1"].shape[0]
        g = heads[0]["gw1"].shape[1]
        mh = heads[0]["mw1"].shape[1]

        # W1: [din + 1, nh*(g+mh)]  cols = [gate_h0 | .. | gate | msg_h0 | ..], bias last row
        w1 = np.zeros((din + 1, nh * (g + mh)), np.float32)
        for i, h in enumerate(heads):
            w1[:din, i * g:(i + 1) * g] = np.asarray(h["gw1"], np.float32)
            w1[din, i * g:(i + 1) * g] = np.asarray(h["gb1"], np.float32)
            w1[:din, nh * g + i * mh:nh * g + (i + 1) * mh] = np.asarray(h["mw1"], np.float32)
            w1[din, nh * g + i * mh:nh * g + (i + 1) * mh] = np.asarray(h["mb1"], np.float32)
        add(f"w1_{gi}", w1)

        # fused block-diagonal second layer: msg blocks first (lane-aligned), gates last
        hdim = nh * (g + mh)
        w2 = np.zeros((hdim + 1, nh * f + nh), np.float32)
        for i, h in enumerate(heads):
            w2[i * g:(i + 1) * g, nh * f + i] = np.asarray(h["gw2"], np.float32)[:, 0]
            w2[hdim, nh * f + i] = float(np.asarray(h["gb2"])[0])
            w2[nh * g + i * mh:nh * g + (i + 1) * mh, i * f:(i + 1) * f] = \
                np.asarray(h["mw2"], np.float32)
            w2[hdim, i * f:(i + 1) * f] = np.asarray(h["mb2"], np.float32)
        add(f"w2_{gi}", w2)

        pows.append(np.asarray([float(np.asarray(h["pow"])[0]) for h in heads], np.float32))

    add("pow", np.concatenate(pows).reshape(1, -1))
    slab = np.concatenate(pieces, axis=0)
    return jnp.asarray(slab), layout, slab_w


# ------------------------------ forward pass --------------------------------

def descriptor_network_forward(params, elem_weights, elem_fea,
                               self_idx, nbr_idx, cry_elem_idx, n_cry):
    n, e = elem_fea.shape
    m = int(self_idx.shape[0])
    f = params["emb_w"].shape[1] + 1
    c = int(n_cry)

    slab, layout, slab_w = _pack_params(params, f)

    groups_cfg, pow_col = [], 0
    for gi, heads in enumerate(list(params["graphs"]) + [params["cry_pool"]]):
        nh = len(heads)
        g = heads[0]["gw1"].shape[1]
        mh = heads[0]["mw1"].shape[1]
        groups_cfg.append(dict(
            nh=nh, hdim=nh * (g + mh),
            out_w=min(slab_w, ((nh * f + nh + 127) // 128) * 128),
            w1_off=layout[f"w1_{gi}"], w2_off=layout[f"w2_{gi}"], pow_col=pow_col))
        pow_col += nh

    cfg = dict(E=e, F=f, N=n, M=m, C=c, n_graph=len(params["graphs"]),
               emb_off=layout["emb"], pow_off=layout["pow"], groups=groups_cfg)

    # fractional weights appended as an extra input column (consumed by the emb slab)
    x_aug = jnp.concatenate([elem_fea.astype(jnp.float32),
                             elem_weights.astype(jnp.float32)], axis=1)      # [N, E+1]

    # all five index vectors packed into two small int32 arrays
    rpad = ((max(m, n) + 7) // 8) * 8
    si = self_idx.astype(jnp.int32)
    ni = nbr_idx.astype(jnp.int32)
    ci = cry_elem_idx.astype(jnp.int32)
    idx_col = jnp.zeros((rpad, 8), jnp.int32)
    idx_col = idx_col.at[:m, 0].set(si).at[:m, 1].set(ni).at[:n, 2].set(ci)
    idx_row = jnp.zeros((8, rpad), jnp.int32)
    idx_row = idx_row.at[0, :m].set(si).at[1, :n].set(ci)

    vmem = pl.BlockSpec(memory_space=pltpu.MemorySpace.VMEM)
    return pl.pallas_call(
        _make_kernel(cfg),
        out_shape=jax.ShapeDtypeStruct((c, f), jnp.float32),
        in_specs=[vmem] * 4,
        out_specs=vmem,
    )(x_aug, idx_col, idx_row, slab)


# ------------------------- parameter initialization ------------------------

def _init_linear(key, din, dout, scale=0.1):
    kw, kb = jax.random.split(key)
    w = scale * jax.random.normal(kw, (din, dout), jnp.float32)
    b = scale * jax.random.normal(kb, (dout,), jnp.float32)
    return w, b


def _init_head(key, din, gate_hidden, msg_hidden, dout):
    keys = jax.random.split(key, 5)
    gw1, gb1 = _init_linear(keys[0], din, gate_hidden)
    gw2, gb2 = _init_linear(keys[1], gate_hidden, 1)
    mw1, mb1 = _init_linear(keys[2], din, msg_hidden)
    mw2, mb2 = _init_linear(keys[3], msg_hidden, dout)
    pw = jax.random.normal(keys[4], (1,), jnp.float32)           # torch.randn(1)
    return dict(gw1=gw1, gb1=gb1, gw2=gw2, gb2=gb2,
                mw1=mw1, mb1=mb1, mw2=mw2, mb2=mb2, pow=pw)


def init_descriptor_network(key, elem_emb_len, elem_fea_len=32, n_graph=2,
                            elem_heads=2, elem_gate=64, elem_msg=64,
                            cry_heads=2, cry_gate=64, cry_msg=64):
    keys = jax.random.split(key, 1 + n_graph * elem_heads + cry_heads)
    emb_w, emb_b = _init_linear(keys[0], elem_emb_len, elem_fea_len - 1)
    it = iter(keys[1:])
    graphs = [
        [_init_head(next(it), 2 * elem_fea_len, elem_gate, elem_msg, elem_fea_len)
         for _ in range(elem_heads)]
        for _ in range(n_graph)
    ]
    cry_pool = [_init_head(next(it), elem_fea_len, cry_gate, cry_msg, elem_fea_len)
                for _ in range(cry_heads)]
    return dict(emb_w=emb_w, emb_b=emb_b, graphs=graphs, cry_pool=cry_pool)


# ----------------------- pure-JAX reference (for check) ---------------------

def _ref_simple_net(x, w1, b1, w2, b2):
    h = x @ w1 + b1
    h = jnp.where(h > 0, h, LEAKY_SLOPE * h)
    return h @ w2 + b2


def _ref_attn_head(x, index, weights, p, n_segments):
    gate = _ref_simple_net(x, p["gw1"], p["gb1"], p["gw2"], p["gb2"])
    smax = jax.ops.segment_max(gate, index, num_segments=n_segments)[index]
    g = (weights ** p["pow"]) * jnp.exp(gate - smax)
    denom = jax.ops.segment_sum(g, index, num_segments=n_segments)[index]
    g = g / (denom + 1e-10)
    msg = _ref_simple_net(x, p["mw1"], p["mb1"], p["mw2"], p["mb2"])
    return jax.ops.segment_sum(g * msg, index, num_segments=n_segments)


def _ref_forward(params, elem_weights, elem_fea, self_idx, nbr_idx, cry_elem_idx, n_cry):
    fea = jnp.concatenate(
        [elem_fea @ params["emb_w"] + params["emb_b"], elem_weights], axis=1)
    n_elems = fea.shape[0]
    for graph_heads in params["graphs"]:
        nbr_w = elem_weights[nbr_idx]
        pair_fea = jnp.concatenate([fea[self_idx], fea[nbr_idx]], axis=1)
        heads = [_ref_attn_head(pair_fea, self_idx, nbr_w, hp, n_elems)
                 for hp in graph_heads]
        fea = jnp.mean(jnp.stack(heads), axis=0) + fea
    heads = [_ref_attn_head(fea, cry_elem_idx, elem_weights, hp, n_cry)
             for hp in params["cry_pool"]]
    return jnp.mean(jnp.stack(heads), axis=0)


# ----------------------------------- main ------------------------------------

if __name__ == "__main__":
    key = jax.random.PRNGKey(0)
    ELEM_EMB_LEN = 32
    ELEM_FEA_LEN = 32

    # Small synthetic batch of 3 "crystals" with 3, 4, 3 elements; pairs = dense
    # element-element graph within each crystal (as in Roost data construction).
    elems_per_cry = [3, 4, 3]
    n_cry = len(elems_per_cry)
    cry_elem_idx_list, self_idx_list, nbr_idx_list = [], [], []
    offset = 0
    for cry, n in enumerate(elems_per_cry):
        cry_elem_idx_list += [cry] * n
        for i in range(n):
            for j in range(n):
                self_idx_list.append(offset + i)
                nbr_idx_list.append(offset + j)
        offset += n
    n_elems = offset

    cry_elem_idx = jnp.array(cry_elem_idx_list, dtype=jnp.int32)   # [10]
    self_idx = jnp.array(self_idx_list, dtype=jnp.int32)           # [34]
    nbr_idx = jnp.array(nbr_idx_list, dtype=jnp.int32)             # [34]

    k1, k2, k3 = jax.random.split(key, 3)
    elem_fea = jax.random.normal(k1, (n_elems, ELEM_EMB_LEN), jnp.float32)
    elem_weights = jax.random.uniform(k2, (n_elems, 1), jnp.float32, 0.05, 1.0)

    params = init_descriptor_network(k3, ELEM_EMB_LEN, ELEM_FEA_LEN)

    out = descriptor_network_forward(params, elem_weights, elem_fea,
                                     self_idx, nbr_idx, cry_elem_idx, n_cry)
    out = jax.block_until_ready(out)

    ref = _ref_forward(params, elem_weights, elem_fea,
                       self_idx, nbr_idx, cry_elem_idx, n_cry)
    ref = jax.block_until_ready(ref)

    assert out.shape == (n_cry, ELEM_FEA_LEN), out.shape
    assert bool(jnp.allclose(out, ref, atol=5e-4, rtol=5e-4)), (
        float(jnp.max(jnp.abs(out - ref))))

    print("KERNEL_OK")
</pallas_src>

<mosaic_0001>
module attributes {stable_mosaic.version = 11 : i64} {
  func.func @kernel(%arg0: memref<10x33xf32, #tpu.memory_space<vmem>>, %arg1: memref<40x8xi32, #tpu.memory_space<vmem>>, %arg2: memref<8x40xi32, #tpu.memory_space<vmem>>, %arg3: memref<1024x256xf32, #tpu.memory_space<vmem>>, %arg4: memref<3x32xf32, #tpu.memory_space<vmem>>) attributes {dimension_semantics = [], scalar_prefetch = 0 : i64, scratch_operands = 0 : i64, tpu.core_type = #tpu.core_type<tc>} {
    %c0 = arith.constant 0 : index
    %c0_0 = arith.constant 0 : index
    %0 = vector.load %arg0[%c0, %c0_0] : memref<10x33xf32, #tpu.memory_space<vmem>>, vector<10x33xf32>
    %1 = vector.extract_strided_slice %0 {offsets = [0, 32], sizes = [10, 1], strides = [1, 1]} : vector<10x33xf32> to vector<10x1xf32>
    %c0_1 = arith.constant 0 : index
    %c0_2 = arith.constant 0 : index
    %2 = vector.load %arg3[%c0_1, %c0_2] : memref<1024x256xf32, #tpu.memory_space<vmem>>, vector<33x32xf32>
    %cst = arith.constant dense<0.000000e+00> : vector<10x32xf32>
    %3 = tpu.matmul %0, %2, %cst {dimension_numbers = #tpu.dot_dimension_numbers<[1], [0], [0], [1], [0, 0, 1, 1], [], []>} : vector<10x33xf32>, vector<33x32xf32>, vector<10x32xf32> -> vector<10x32xf32>
    %c33 = arith.constant 33 : index
    %c0_3 = arith.constant 0 : index
    %4 = vector.load %arg3[%c33, %c0_3] : memref<1024x256xf32, #tpu.memory_space<vmem>>, vector<1x32xf32>
    %5 = vector.broadcast %4 : vector<1x32xf32> to vector<10x32xf32>
    %6 = arith.addf %3, %5 : vector<10x32xf32>
    %c0_4 = arith.constant 0 : index
    %c0_5 = arith.constant 0 : index
    %7 = vector.load %arg1[%c0_4, %c0_5] : memref<40x8xi32, #tpu.memory_space<vmem>>, vector<40x8xi32>
    %c0_6 = arith.constant 0 : index
    %c0_7 = arith.constant 0 : index
    %8 = vector.load %arg2[%c0_6, %c0_7] : memref<8x40xi32, #tpu.memory_space<vmem>>, vector<8x40xi32>
    %9 = vector.extract_strided_slice %7 {offsets = [0, 0], sizes = [34, 1], strides = [1, 1]} : vector<40x8xi32> to vector<34x1xi32>
    %10 = vector.extract_strided_slice %7 {offsets = [0, 1], sizes = [34, 1], strides = [1, 1]} : vector<40x8xi32> to vector<34x1xi32>
    %11 = vector.extract_strided_slice %7 {offsets = [0, 2], sizes = [10, 1], strides = [1, 1]} : vector<40x8xi32> to vector<10x1xi32>
    %12 = vector.extract_strided_slice %8 {offsets = [0, 0], sizes = [1, 34], strides = [1, 1]} : vector<8x40xi32> to vector<1x34xi32>
    %13 = vector.extract_strided_slice %8 {offsets = [1, 0], sizes = [1, 10], strides = [1, 1]} : vector<8x40xi32> to vector<1x10xi32>
    %14 = tpu.iota {dimensions = array<i32: 1>} : vector<34x10xi32>
    %15 = vector.broadcast %9 : vector<34x1xi32> to vector<34x10xi32>
    %16 = arith.cmpi eq, %14, %15 : vector<34x10xi32>
    %17 = arith.extui %16 : vector<34x10xi1> to vector<34x10xi32>
    %18 = arith.sitofp %17 : vector<34x10xi32> to vector<34x10xf32>
    %19 = vector.broadcast %10 : vector<34x1xi32> to vector<34x10xi32>
    %20 = arith.cmpi eq, %14, %19 : vector<34x10xi32>
    %21 = arith.extui %20 : vector<34x10xi1> to vector<34x10xi32>
    %22 = arith.sitofp %21 : vector<34x10xi32> to vector<34x10xf32>
    %23 = tpu.iota {dimensions = array<i32: 0>} : vector<10x34xi32>
    %24 = vector.broadcast %12 : vector<1x34xi32> to vector<10x34xi32>
    %25 = arith.cmpi eq, %23, %24 : vector<10x34xi32>
    %26 = arith.extui %25 : vector<10x34xi1> to vector<10x34xi32>
    %27 = arith.sitofp %26 : vector<10x34xi32> to vector<10x34xf32>
    %28 = tpu.iota {dimensions = array<i32: 1>} : vector<10x3xi32>
    %29 = vector.broadcast %11 : vector<10x1xi32> to vector<10x3xi32>
    %30 = arith.cmpi eq, %28, %29 : vector<10x3xi32>
    %31 = arith.extui %30 : vector<10x3xi1> to vector<10x3xi32>
    %32 = arith.sitofp %31 : vector<10x3xi32> to vector<10x3xf32>
    %33 = tpu.iota {dimensions = array<i32: 0>} : vector<3x10xi32>
    %34 = vector.broadcast %13 : vector<1x10xi32> to vector<3x10xi32>
    %35 = arith.cmpi eq, %33, %34 : vector<3x10xi32>
    %36 = arith.extui %35 : vector<3x10xi1> to vector<3x10xi32>
    %37 = arith.sitofp %36 : vector<3x10xi32> to vector<3x10xf32>
    %cst_8 = arith.constant 1.000000e-30 : f32
    %38 = vector.broadcast %cst_8 : f32 to vector<10x1xf32>
    %39 = arith.maximumf %1, %38 : vector<10x1xf32>
    %40 = math.log %39 : vector<10x1xf32>
    %cst_9 = arith.constant dense<0.000000e+00> : vector<34x1xf32>
    %41 = tpu.matmul %22, %40, %cst_9 {dimension_numbers = #tpu.dot_dimension_numbers<[1], [0], [0], [1], [0, 0, 1, 1], [], []>} : vector<34x10xf32>, vector<10x1xf32>, vector<34x1xf32> -> vector<34x1xf32>
    %cst_10 = arith.constant dense<0.000000e+00> : vector<34x32xf32>
    %42 = tpu.matmul %18, %6, %cst_10 {dimension_numbers = #tpu.dot_dimension_numbers<[1], [0], [0], [1], [0, 0, 1, 1], [], []>} : vector<34x10xf32>, vector<10x32xf32>, vector<34x32xf32> -> vector<34x32xf32>
    %cst_11 = arith.constant dense<0.000000e+00> : vector<34x32xf32>
    %43 = tpu.matmul %22, %6, %cst_11 {dimension_numbers = #tpu.dot_dimension_numbers<[1], [0], [0], [1], [0, 0, 1, 1], [], []>} : vector<34x10xf32>, vector<10x32xf32>, vector<34x32xf32> -> vector<34x32xf32>
    %c40 = arith.constant 40 : index
    %c0_12 = arith.constant 0 : index
    %44 = vector.load %arg3[%c40, %c0_12] : memref<1024x256xf32, #tpu.memory_space<vmem>>, vector<32x256xf32>
    %cst_13 = arith.constant dense<0.000000e+00> : vector<34x256xf32>
    %45 = tpu.matmul %42, %44, %cst_13 {dimension_numbers = #tpu.dot_dimension_numbers<[1], [0], [0], [1], [0, 0, 1, 1], [], []>} : vector<34x32xf32>, vector<32x256xf32>, vector<34x256xf32> -> vector<34x256xf32>
    %c72 = arith.constant 72 : index
    %c0_14 = arith.constant 0 : index
    %46 = vector.load %arg3[%c72, %c0_14] : memref<1024x256xf32, #tpu.memory_space<vmem>>, vector<32x256xf32>
    %cst_15 = arith.constant dense<0.000000e+00> : vector<34x256xf32>
    %47 = tpu.matmul %43, %46, %cst_15 {dimension_numbers = #tpu.dot_dimension_numbers<[1], [0], [0], [1], [0, 0, 1, 1], [], []>} : vector<34x32xf32>, vector<32x256xf32>, vector<34x256xf32> -> vector<34x256xf32>
    %48 = arith.addf %45, %47 : vector<34x256xf32>
    %c104 = arith.constant 104 : index
    %c0_16 = arith.constant 0 : index
    %49 = vector.load %arg3[%c104, %c0_16] : memref<1024x256xf32, #tpu.memory_space<vmem>>, vector<1x256xf32>
    %50 = vector.broadcast %49 : vector<1x256xf32> to vector<34x256xf32>
    %51 = arith.addf %48, %50 : vector<34x256xf32>
    %c1016 = arith.constant 1016 : index
    %c0_17 = arith.constant 0 : index
    %52 = vector.load %arg3[%c1016, %c0_17] : memref<1024x256xf32, #tpu.memory_space<vmem>>, vector<1x2xf32>
    %53 = vector.broadcast %41 : vector<34x1xf32> to vector<34x2xf32>
    %54 = vector.broadcast %52 : vector<1x2xf32> to vector<34x2xf32>
    %55 = arith.mulf %53, %54 : vector<34x2xf32>
    %c112 = arith.constant 112 : index
    %c0_18 = arith.constant 0 : index
    %56 = vector.load %arg3[%c112, %c0_18] : memref<1024x256xf32, #tpu.memory_space<vmem>>, vector<256x128xf32>
    %c368 = arith.constant 368 : index
    %c0_19 = arith.constant 0 : index
    %57 = vector.load %arg3[%c368, %c0_19] : memref<1024x256xf32, #tpu.memory_space<vmem>>, vector<1x128xf32>
    %cst_20 = arith.constant 0.000000e+00 : f32
    %58 = vector.broadcast %cst_20 : f32 to vector<34x256xf32>
    %59 = arith.cmpf ogt, %51, %58 : vector<34x256xf32>
    %cst_21 = arith.constant 0.00999999977 : f32
    %60 = vector.broadcast %cst_21 : f32 to vector<34x256xf32>
    %61 = arith.mulf %60, %51 : vector<34x256xf32>
    %62 = arith.select %59, %51, %61 : vector<34x256xi1>, vector<34x256xf32>
    %cst_22 = arith.constant dense<0.000000e+00> : vector<34x128xf32>
    %63 = tpu.matmul %62, %56, %cst_22 {dimension_numbers = #tpu.dot_dimension_numbers<[1], [0], [0], [1], [0, 0, 1, 1], [], []>} : vector<34x256xf32>, vector<256x128xf32>, vector<34x128xf32> -> vector<34x128xf32>
    %64 = vector.broadcast %57 : vector<1x128xf32> to vector<34x128xf32>
    %65 = arith.addf %63, %64 : vector<34x128xf32>
    %66 = vector.extract_strided_slice %65 {offsets = [0, 0], sizes = [34, 64], strides = [1, 1]} : vector<34x128xf32> to vector<34x64xf32>
    %67 = vector.extract_strided_slice %65 {offsets = [0, 64], sizes = [34, 2], strides = [1, 1]} : vector<34x128xf32> to vector<34x2xf32>
    %68 = vector.extract_strided_slice %67 {offsets = [0, 0], sizes = [34, 1], strides = [1, 1]} : vector<34x2xf32> to vector<34x1xf32>
    %cst_23 = arith.constant 0xFF800000 : f32
    %69 = vector.shape_cast %68 : vector<34x1xf32> to vector<34x1xf32>
    %70 = vector.broadcast %69 : vector<34x1xf32> to vector<34x10xf32>
    %71 = vector.broadcast %cst_23 : f32 to vector<34x10xf32>
    %72 = arith.select %16, %70, %71 : vector<34x10xi1>, vector<34x10xf32>
    %cst_24 = arith.constant dense<0xFF800000> : vector<10xf32>
    %73 = vector.multi_reduction <maximumf>, %72, %cst_24 [0] : vector<34x10xf32> to vector<10xf32>
    %74 = vector.shape_cast %73 : vector<10xf32> to vector<1x10xf32>
    %cst_25 = arith.constant 0.000000e+00 : f32
    %75 = vector.shape_cast %74 : vector<1x10xf32> to vector<1x10xf32>
    %76 = vector.broadcast %75 : vector<1x10xf32> to vector<34x10xf32>
    %77 = vector.broadcast %cst_25 : f32 to vector<34x10xf32>
    %78 = arith.select %16, %76, %77 : vector<34x10xi1>, vector<34x10xf32>
    %cst_26 = arith.constant dense<0.000000e+00> : vector<34xf32>
    %79 = vector.multi_reduction <add>, %78, %cst_26 [1] : vector<34x10xf32> to vector<34xf32>
    %80 = vector.shape_cast %79 : vector<34xf32> to vector<34x1xf32>
    %81 = vector.extract_strided_slice %67 {offsets = [0, 1], sizes = [34, 1], strides = [1, 1]} : vector<34x2xf32> to vector<34x1xf32>
    %cst_27 = arith.constant 0xFF800000 : f32
    %82 = vector.shape_cast %81 : vector<34x1xf32> to vector<34x1xf32>
    %83 = vector.broadcast %82 : vector<34x1xf32> to vector<34x10xf32>
    %84 = vector.broadcast %cst_27 : f32 to vector<34x10xf32>
    %85 = arith.select %16, %83, %84 : vector<34x10xi1>, vector<34x10xf32>
    %cst_28 = arith.constant dense<0xFF800000> : vector<10xf32>
    %86 = vector.multi_reduction <maximumf>, %85, %cst_28 [0] : vector<34x10xf32> to vector<10xf32>
    %87 = vector.shape_cast %86 : vector<10xf32> to vector<1x10xf32>
    %cst_29 = arith.constant 0.000000e+00 : f32
    %88 = vector.shape_cast %87 : vector<1x10xf32> to vector<1x10xf32>
    %89 = vector.broadcast %88 : vector<1x10xf32> to vector<34x10xf32>
    %90 = vector.broadcast %cst_29 : f32 to vector<34x10xf32>
    %91 = arith.select %16, %89, %90 : vector<34x10xi1>, vector<34x10xf32>
    %cst_30 = arith.constant dense<0.000000e+00> : vector<34xf32>
    %92 = vector.multi_reduction <add>, %91, %cst_30 [1] : vector<34x10xf32> to vector<34xf32>
    %93 = vector.shape_cast %92 : vector<34xf32> to vector<34x1xf32>
    %94 = tpu.concatenate %80, %93 in 1 : vector<34x1xf32>, vector<34x1xf32> -> vector<34x2xf32>
    %95 = arith.addf %55, %67 : vector<34x2xf32>
    %96 = arith.subf %95, %94 : vector<34x2xf32>
    %97 = math.exp %96 : vector<34x2xf32>
    %cst_31 = arith.constant dense<0.000000e+00> : vector<10x2xf32>
    %98 = tpu.matmul %27, %97, %cst_31 {dimension_numbers = #tpu.dot_dimension_numbers<[1], [0], [0], [1], [0, 0, 1, 1], [], []>} : vector<10x34xf32>, vector<34x2xf32>, vector<10x2xf32> -> vector<10x2xf32>
    %cst_32 = arith.constant dense<0.000000e+00> : vector<34x2xf32>
    %99 = tpu.matmul %18, %98, %cst_32 {dimension_numbers = #tpu.dot_dimension_numbers<[1], [0], [0], [1], [0, 0, 1, 1], [], []>} : vector<34x10xf32>, vector<10x2xf32>, vector<34x2xf32> -> vector<34x2xf32>
    %cst_33 = arith.constant 5.000000e-01 : f32
    %100 = vector.broadcast %cst_33 : f32 to vector<34x2xf32>
    %101 = arith.mulf %97, %100 : vector<34x2xf32>
    %cst_34 = arith.constant 1.000000e-10 : f32
    %102 = vector.broadcast %cst_34 : f32 to vector<34x2xf32>
    %103 = arith.addf %99, %102 : vector<34x2xf32>
    %104 = arith.divf %101, %103 : vector<34x2xf32>
    %105 = vector.extract_strided_slice %104 {offsets = [0, 0], sizes = [34, 1], strides = [1, 1]} : vector<34x2xf32> to vector<34x1xf32>
    %106 = vector.extract_strided_slice %66 {offsets = [0, 0], sizes = [34, 32], strides = [1, 1]} : vector<34x64xf32> to vector<34x32xf32>
    %107 = vector.broadcast %105 : vector<34x1xf32> to vector<34x32xf32>
    %108 = arith.mulf %107, %106 : vector<34x32xf32>
    %109 = vector.extract_strided_slice %104 {offsets = [0, 1], sizes = [34, 1], strides = [1, 1]} : vector<34x2xf32> to vector<34x1xf32>
    %110 = vector.extract_strided_slice %66 {offsets = [0, 32], sizes = [34, 32], strides = [1, 1]} : vector<34x64xf32> to vector<34x32xf32>
    %111 = vector.broadcast %109 : vector<34x1xf32> to vector<34x32xf32>
    %112 = arith.mulf %111, %110 : vector<34x32xf32>
    %113 = arith.addf %108, %112 : vector<34x32xf32>
    %cst_35 = arith.constant dense<0.000000e+00> : vector<10x32xf32>
    %114 = tpu.matmul %27, %113, %cst_35 {dimension_numbers = #tpu.dot_dimension_numbers<[1], [0], [0], [1], [0, 0, 1, 1], [], []>} : vector<10x34xf32>, vector<34x32xf32>, vector<10x32xf32> -> vector<10x32xf32>
    %115 = arith.addf %114, %6 : vector<10x32xf32>
    %cst_36 = arith.constant dense<0.000000e+00> : vector<34x32xf32>
    %116 = tpu.matmul %18, %115, %cst_36 {dimension_numbers = #tpu.dot_dimension_numbers<[1], [0], [0], [1], [0, 0, 1, 1], [], []>} : vector<34x10xf32>, vector<10x32xf32>, vector<34x32xf32> -> vector<34x32xf32>
    %cst_37 = arith.constant dense<0.000000e+00> : vector<34x32xf32>
    %117 = tpu.matmul %22, %115, %cst_37 {dimension_numbers = #tpu.dot_dimension_numbers<[1], [0], [0], [1], [0, 0, 1, 1], [], []>} : vector<34x10xf32>, vector<10x32xf32>, vector<34x32xf32> -> vector<34x32xf32>
    %c376 = arith.constant 376 : index
    %c0_38 = arith.constant 0 : index
    %118 = vector.load %arg3[%c376, %c0_38] : memref<1024x256xf32, #tpu.memory_space<vmem>>, vector<32x256xf32>
    %cst_39 = arith.constant dense<0.000000e+00> : vector<34x256xf32>
    %119 = tpu.matmul %116, %118, %cst_39 {dimension_numbers = #tpu.dot_dimension_numbers<[1], [0], [0], [1], [0, 0, 1, 1], [], []>} : vector<34x32xf32>, vector<32x256xf32>, vector<34x256xf32> -> vector<34x256xf32>
    %c408 = arith.constant 408 : index
    %c0_40 = arith.constant 0 : index
    %120 = vector.load %arg3[%c408, %c0_40] : memref<1024x256xf32, #tpu.memory_space<vmem>>, vector<32x256xf32>
    %cst_41 = arith.constant dense<0.000000e+00> : vector<34x256xf32>
    %121 = tpu.matmul %117, %120, %cst_41 {dimension_numbers = #tpu.dot_dimension_numbers<[1], [0], [0], [1], [0, 0, 1, 1], [], []>} : vector<34x32xf32>, vector<32x256xf32>, vector<34x256xf32> -> vector<34x256xf32>
    %122 = arith.addf %119, %121 : vector<34x256xf32>
    %c440 = arith.constant 440 : index
    %c0_42 = arith.constant 0 : index
    %123 = vector.load %arg3[%c440, %c0_42] : memref<1024x256xf32, #tpu.memory_space<vmem>>, vector<1x256xf32>
    %124 = vector.broadcast %123 : vector<1x256xf32> to vector<34x256xf32>
    %125 = arith.addf %122, %124 : vector<34x256xf32>
    %c1016_43 = arith.constant 1016 : index
    %c2 = arith.constant 2 : index
    %126 = vector.load %arg3[%c1016_43, %c2] : memref<1024x256xf32, #tpu.memory_space<vmem>>, vector<1x2xf32>
    %127 = vector.broadcast %41 : vector<34x1xf32> to vector<34x2xf32>
    %128 = vector.broadcast %126 : vector<1x2xf32> to vector<34x2xf32>
    %129 = arith.mulf %127, %128 : vector<34x2xf32>
    %c448 = arith.constant 448 : index
    %c0_44 = arith.constant 0 : index
    %130 = vector.load %arg3[%c448, %c0_44] : memref<1024x256xf32, #tpu.memory_space<vmem>>, vector<256x128xf32>
    %c704 = arith.constant 704 : index
    %c0_45 = arith.constant 0 : index
    %131 = vector.load %arg3[%c704, %c0_45] : memref<1024x256xf32, #tpu.memory_space<vmem>>, vector<1x128xf32>
    %cst_46 = arith.constant 0.000000e+00 : f32
    %132 = vector.broadcast %cst_46 : f32 to vector<34x256xf32>
    %133 = arith.cmpf ogt, %125, %132 : vector<34x256xf32>
    %cst_47 = arith.constant 0.00999999977 : f32
    %134 = vector.broadcast %cst_47 : f32 to vector<34x256xf32>
    %135 = arith.mulf %134, %125 : vector<34x256xf32>
    %136 = arith.select %133, %125, %135 : vector<34x256xi1>, vector<34x256xf32>
    %cst_48 = arith.constant dense<0.000000e+00> : vector<34x128xf32>
    %137 = tpu.matmul %136, %130, %cst_48 {dimension_numbers = #tpu.dot_dimension_numbers<[1], [0], [0], [1], [0, 0, 1, 1], [], []>} : vector<34x256xf32>, vector<256x128xf32>, vector<34x128xf32> -> vector<34x128xf32>
    %138 = vector.broadcast %131 : vector<1x128xf32> to vector<34x128xf32>
    %139 = arith.addf %137, %138 : vector<34x128xf32>
    %140 = vector.extract_strided_slice %139 {offsets = [0, 0], sizes = [34, 64], strides = [1, 1]} : vector<34x128xf32> to vector<34x64xf32>
    %141 = vector.extract_strided_slice %139 {offsets = [0, 64], sizes = [34, 2], strides = [1, 1]} : vector<34x128xf32> to vector<34x2xf32>
    %142 = vector.extract_strided_slice %141 {offsets = [0, 0], sizes = [34, 1], strides = [1, 1]} : vector<34x2xf32> to vector<34x1xf32>
    %cst_49 = arith.constant 0xFF800000 : f32
    %143 = vector.shape_cast %142 : vector<34x1xf32> to vector<34x1xf32>
    %144 = vector.broadcast %143 : vector<34x1xf32> to vector<34x10xf32>
    %145 = vector.broadcast %cst_49 : f32 to vector<34x10xf32>
    %146 = arith.select %16, %144, %145 : vector<34x10xi1>, vector<34x10xf32>
    %cst_50 = arith.constant dense<0xFF800000> : vector<10xf32>
    %147 = vector.multi_reduction <maximumf>, %146, %cst_50 [0] : vector<34x10xf32> to vector<10xf32>
    %148 = vector.shape_cast %147 : vector<10xf32> to vector<1x10xf32>
    %cst_51 = arith.constant 0.000000e+00 : f32
    %149 = vector.shape_cast %148 : vector<1x10xf32> to vector<1x10xf32>
    %150 = vector.broadcast %149 : vector<1x10xf32> to vector<34x10xf32>
    %151 = vector.broadcast %cst_51 : f32 to vector<34x10xf32>
    %152 = arith.select %16, %150, %151 : vector<34x10xi1>, vector<34x10xf32>
    %cst_52 = arith.constant dense<0.000000e+00> : vector<34xf32>
    %153 = vector.multi_reduction <add>, %152, %cst_52 [1] : vector<34x10xf32> to vector<34xf32>
    %154 = vector.shape_cast %153 : vector<34xf32> to vector<34x1xf32>
    %155 = vector.extract_strided_slice %141 {offsets = [0, 1], sizes = [34, 1], strides = [1, 1]} : vector<34x2xf32> to vector<34x1xf32>
    %cst_53 = arith.constant 0xFF800000 : f32
    %156 = vector.shape_cast %155 : vector<34x1xf32> to vector<34x1xf32>
    %157 = vector.broadcast %156 : vector<34x1xf32> to vector<34x10xf32>
    %158 = vector.broadcast %cst_53 : f32 to vector<34x10xf32>
    %159 = arith.select %16, %157, %158 : vector<34x10xi1>, vector<34x10xf32>
    %cst_54 = arith.constant dense<0xFF800000> : vector<10xf32>
    %160 = vector.multi_reduction <maximumf>, %159, %cst_54 [0] : vector<34x10xf32> to vector<10xf32>
    %161 = vector.shape_cast %160 : vector<10xf32> to vector<1x10xf32>
    %cst_55 = arith.constant 0.000000e+00 : f32
    %162 = vector.shape_cast %161 : vector<1x10xf32> to vector<1x10xf32>
    %163 = vector.broadcast %162 : vector<1x10xf32> to vector<34x10xf32>
    %164 = vector.broadcast %cst_55 : f32 to vector<34x10xf32>
    %165 = arith.select %16, %163, %164 : vector<34x10xi1>, vector<34x10xf32>
    %cst_56 = arith.constant dense<0.000000e+00> : vector<34xf32>
    %166 = vector.multi_reduction <add>, %165, %cst_56 [1] : vector<34x10xf32> to vector<34xf32>
    %167 = vector.shape_cast %166 : vector<34xf32> to vector<34x1xf32>
    %168 = tpu.concatenate %154, %167 in 1 : vector<34x1xf32>, vector<34x1xf32> -> vector<34x2xf32>
    %169 = arith.addf %129, %141 : vector<34x2xf32>
    %170 = arith.subf %169, %168 : vector<34x2xf32>
    %171 = math.exp %170 : vector<34x2xf32>
    %cst_57 = arith.constant dense<0.000000e+00> : vector<10x2xf32>
    %172 = tpu.matmul %27, %171, %cst_57 {dimension_numbers = #tpu.dot_dimension_numbers<[1], [0], [0], [1], [0, 0, 1, 1], [], []>} : vector<10x34xf32>, vector<34x2xf32>, vector<10x2xf32> -> vector<10x2xf32>
    %cst_58 = arith.constant dense<0.000000e+00> : vector<34x2xf32>
    %173 = tpu.matmul %18, %172, %cst_58 {dimension_numbers = #tpu.dot_dimension_numbers<[1], [0], [0], [1], [0, 0, 1, 1], [], []>} : vector<34x10xf32>, vector<10x2xf32>, vector<34x2xf32> -> vector<34x2xf32>
    %cst_59 = arith.constant 5.000000e-01 : f32
    %174 = vector.broadcast %cst_59 : f32 to vector<34x2xf32>
    %175 = arith.mulf %171, %174 : vector<34x2xf32>
    %cst_60 = arith.constant 1.000000e-10 : f32
    %176 = vector.broadcast %cst_60 : f32 to vector<34x2xf32>
    %177 = arith.addf %173, %176 : vector<34x2xf32>
    %178 = arith.divf %175, %177 : vector<34x2xf32>
    %179 = vector.extract_strided_slice %178 {offsets = [0, 0], sizes = [34, 1], strides = [1, 1]} : vector<34x2xf32> to vector<34x1xf32>
    %180 = vector.extract_strided_slice %140 {offsets = [0, 0], sizes = [34, 32], strides = [1, 1]} : vector<34x64xf32> to vector<34x32xf32>
    %181 = vector.broadcast %179 : vector<34x1xf32> to vector<34x32xf32>
    %182 = arith.mulf %181, %180 : vector<34x32xf32>
    %183 = vector.extract_strided_slice %178 {offsets = [0, 1], sizes = [34, 1], strides = [1, 1]} : vector<34x2xf32> to vector<34x1xf32>
    %184 = vector.extract_strided_slice %140 {offsets = [0, 32], sizes = [34, 32], strides = [1, 1]} : vector<34x64xf32> to vector<34x32xf32>
    %185 = vector.broadcast %183 : vector<34x1xf32> to vector<34x32xf32>
    %186 = arith.mulf %185, %184 : vector<34x32xf32>
    %187 = arith.addf %182, %186 : vector<34x32xf32>
    %cst_61 = arith.constant dense<0.000000e+00> : vector<10x32xf32>
    %188 = tpu.matmul %27, %187, %cst_61 {dimension_numbers = #tpu.dot_dimension_numbers<[1], [0], [0], [1], [0, 0, 1, 1], [], []>} : vector<10x34xf32>, vector<34x32xf32>, vector<10x32xf32> -> vector<10x32xf32>
    %189 = arith.addf %188, %115 : vector<10x32xf32>
    %c712 = arith.constant 712 : index
    %c0_62 = arith.constant 0 : index
    %190 = vector.load %arg3[%c712, %c0_62] : memref<1024x256xf32, #tpu.memory_space<vmem>>, vector<32x256xf32>
    %cst_63 = arith.constant dense<0.000000e+00> : vector<10x256xf32>
    %191 = tpu.matmul %189, %190, %cst_63 {dimension_numbers = #tpu.dot_dimension_numbers<[1], [0], [0], [1], [0, 0, 1, 1], [], []>} : vector<10x32xf32>, vector<32x256xf32>, vector<10x256xf32> -> vector<10x256xf32>
    %c744 = arith.constant 744 : index
    %c0_64 = arith.constant 0 : index
    %192 = vector.load %arg3[%c744, %c0_64] : memref<1024x256xf32, #tpu.memory_space<vmem>>, vector<1x256xf32>
    %193 = vector.broadcast %192 : vector<1x256xf32> to vector<10x256xf32>
    %194 = arith.addf %191, %193 : vector<10x256xf32>
    %c1016_65 = arith.constant 1016 : index
    %c4 = arith.constant 4 : index
    %195 = vector.load %arg3[%c1016_65, %c4] : memref<1024x256xf32, #tpu.memory_space<vmem>>, vector<1x2xf32>
    %196 = vector.broadcast %40 : vector<10x1xf32> to vector<10x2xf32>
    %197 = vector.broadcast %195 : vector<1x2xf32> to vector<10x2xf32>
    %198 = arith.mulf %196, %197 : vector<10x2xf32>
    %c752 = arith.constant 752 : index
    %c0_66 = arith.constant 0 : index
    %199 = vector.load %arg3[%c752, %c0_66] : memref<1024x256xf32, #tpu.memory_space<vmem>>, vector<256x128xf32>
    %c1008 = arith.constant 1008 : index
    %c0_67 = arith.constant 0 : index
    %200 = vector.load %arg3[%c1008, %c0_67] : memref<1024x256xf32, #tpu.memory_space<vmem>>, vector<1x128xf32>
    %cst_68 = arith.constant 0.000000e+00 : f32
    %201 = vector.broadcast %cst_68 : f32 to vector<10x256xf32>
    %202 = arith.cmpf ogt, %194, %201 : vector<10x256xf32>
    %cst_69 = arith.constant 0.00999999977 : f32
    %203 = vector.broadcast %cst_69 : f32 to vector<10x256xf32>
    %204 = arith.mulf %203, %194 : vector<10x256xf32>
    %205 = arith.select %202, %194, %204 : vector<10x256xi1>, vector<10x256xf32>
    %cst_70 = arith.constant dense<0.000000e+00> : vector<10x128xf32>
    %206 = tpu.matmul %205, %199, %cst_70 {dimension_numbers = #tpu.dot_dimension_numbers<[1], [0], [0], [1], [0, 0, 1, 1], [], []>} : vector<10x256xf32>, vector<256x128xf32>, vector<10x128xf32> -> vector<10x128xf32>
    %207 = vector.broadcast %200 : vector<1x128xf32> to vector<10x128xf32>
    %208 = arith.addf %206, %207 : vector<10x128xf32>
    %209 = vector.extract_strided_slice %208 {offsets = [0, 0], sizes = [10, 64], strides = [1, 1]} : vector<10x128xf32> to vector<10x64xf32>
    %210 = vector.extract_strided_slice %208 {offsets = [0, 64], sizes = [10, 2], strides = [1, 1]} : vector<10x128xf32> to vector<10x2xf32>
    %211 = vector.extract_strided_slice %210 {offsets = [0, 0], sizes = [10, 1], strides = [1, 1]} : vector<10x2xf32> to vector<10x1xf32>
    %cst_71 = arith.constant 0xFF800000 : f32
    %212 = vector.shape_cast %211 : vector<10x1xf32> to vector<10x1xf32>
    %213 = vector.broadcast %212 : vector<10x1xf32> to vector<10x3xf32>
    %214 = vector.broadcast %cst_71 : f32 to vector<10x3xf32>
    %215 = arith.select %30, %213, %214 : vector<10x3xi1>, vector<10x3xf32>
    %cst_72 = arith.constant dense<0xFF800000> : vector<3xf32>
    %216 = vector.multi_reduction <maximumf>, %215, %cst_72 [0] : vector<10x3xf32> to vector<3xf32>
    %217 = vector.shape_cast %216 : vector<3xf32> to vector<1x3xf32>
    %cst_73 = arith.constant 0.000000e+00 : f32
    %218 = vector.shape_cast %217 : vector<1x3xf32> to vector<1x3xf32>
    %219 = vector.broadcast %218 : vector<1x3xf32> to vector<10x3xf32>
    %220 = vector.broadcast %cst_73 : f32 to vector<10x3xf32>
    %221 = arith.select %30, %219, %220 : vector<10x3xi1>, vector<10x3xf32>
    %cst_74 = arith.constant dense<0.000000e+00> : vector<10xf32>
    %222 = vector.multi_reduction <add>, %221, %cst_74 [1] : vector<10x3xf32> to vector<10xf32>
    %223 = vector.shape_cast %222 : vector<10xf32> to vector<10x1xf32>
    %224 = vector.extract_strided_slice %210 {offsets = [0, 1], sizes = [10, 1], strides = [1, 1]} : vector<10x2xf32> to vector<10x1xf32>
    %cst_75 = arith.constant 0xFF800000 : f32
    %225 = vector.shape_cast %224 : vector<10x1xf32> to vector<10x1xf32>
    %226 = vector.broadcast %225 : vector<10x1xf32> to vector<10x3xf32>
    %227 = vector.broadcast %cst_75 : f32 to vector<10x3xf32>
    %228 = arith.select %30, %226, %227 : vector<10x3xi1>, vector<10x3xf32>
    %cst_76 = arith.constant dense<0xFF800000> : vector<3xf32>
    %229 = vector.multi_reduction <maximumf>, %228, %cst_76 [0] : vector<10x3xf32> to vector<3xf32>
    %230 = vector.shape_cast %229 : vector<3xf32> to vector<1x3xf32>
    %cst_77 = arith.constant 0.000000e+00 : f32
    %231 = vector.shape_cast %230 : vector<1x3xf32> to vector<1x3xf32>
    %232 = vector.broadcast %231 : vector<1x3xf32> to vector<10x3xf32>
    %233 = vector.broadcast %cst_77 : f32 to vector<10x3xf32>
    %234 = arith.select %30, %232, %233 : vector<10x3xi1>, vector<10x3xf32>
    %cst_78 = arith.constant dense<0.000000e+00> : vector<10xf32>
    %235 = vector.multi_reduction <add>, %234, %cst_78 [1] : vector<10x3xf32> to vector<10xf32>
    %236 = vector.shape_cast %235 : vector<10xf32> to vector<10x1xf32>
    %237 = tpu.concatenate %223, %236 in 1 : vector<10x1xf32>, vector<10x1xf32> -> vector<10x2xf32>
    %238 = arith.addf %198, %210 : vector<10x2xf32>
    %239 = arith.subf %238, %237 : vector<10x2xf32>
    %240 = math.exp %239 : vector<10x2xf32>
    %cst_79 = arith.constant dense<0.000000e+00> : vector<3x2xf32>
    %241 = tpu.matmul %37, %240, %cst_79 {dimension_numbers = #tpu.dot_dimension_numbers<[1], [0], [0], [1], [0, 0, 1, 1], [], []>} : vector<3x10xf32>, vector<10x2xf32>, vector<3x2xf32> -> vector<3x2xf32>
    %cst_80 = arith.constant dense<0.000000e+00> : vector<10x2xf32>
    %242 = tpu.matmul %32, %241, %cst_80 {dimension_numbers = #tpu.dot_dimension_numbers<[1], [0], [0], [1], [0, 0, 1, 1], [], []>} : vector<10x3xf32>, vector<3x2xf32>, vector<10x2xf32> -> vector<10x2xf32>
    %cst_81 = arith.constant 5.000000e-01 : f32
    %243 = vector.broadcast %cst_81 : f32 to vector<10x2xf32>
    %244 = arith.mulf %240, %243 : vector<10x2xf32>
    %cst_82 = arith.constant 1.000000e-10 : f32
    %245 = vector.broadcast %cst_82 : f32 to vector<10x2xf32>
    %246 = arith.addf %242, %245 : vector<10x2xf32>
    %247 = arith.divf %244, %246 : vector<10x2xf32>
    %248 = vector.extract_strided_slice %247 {offsets = [0, 0], sizes = [10, 1], strides = [1, 1]} : vector<10x2xf32> to vector<10x1xf32>
    %249 = vector.extract_strided_slice %209 {offsets = [0, 0], sizes = [10, 32], strides = [1, 1]} : vector<10x64xf32> to vector<10x32xf32>
    %250 = vector.broadcast %248 : vector<10x1xf32> to vector<10x32xf32>
    %251 = arith.mulf %250, %249 : vector<10x32xf32>
    %252 = vector.extract_strided_slice %247 {offsets = [0, 1], sizes = [10, 1], strides = [1, 1]} : vector<10x2xf32> to vector<10x1xf32>
    %253 = vector.extract_strided_slice %209 {offsets = [0, 32], sizes = [10, 32], strides = [1, 1]} : vector<10x64xf32> to vector<10x32xf32>
    %254 = vector.broadcast %252 : vector<10x1xf32> to vector<10x32xf32>
    %255 = arith.mulf %254, %253 : vector<10x32xf32>
    %256 = arith.addf %251, %255 : vector<10x32xf32>
    %cst_83 = arith.constant dense<0.000000e+00> : vector<3x32xf32>
    %257 = tpu.matmul %37, %256, %cst_83 {dimension_numbers = #tpu.dot_dimension_numbers<[1], [0], [0], [1], [0, 0, 1, 1], [], []>} : vector<3x10xf32>, vector<10x32xf32>, vector<3x32xf32> -> vector<3x32xf32>
    %c0_84 = arith.constant 0 : index
    %c0_85 = arith.constant 0 : index
    %258 = vector.load %arg4[%c0_84, %c0_85] : memref<3x32xf32, #tpu.memory_space<vmem>>, vector<3x32xf32>
    tpu.vector_store %arg4[%c0_84, %c0_85], %257 {strides = array<i32>} : memref<3x32xf32, #tpu.memory_space<vmem>>, vector<3x32xf32>,
    return
  }
}

</mosaic_0001>

<bundles_post_ra>
// kernel: tpu_custom_call.1
= control target key start
LH: loop header
LB: loop body
LE: loop exit
PB: predicated region body
PF: predicated region fallthrough
CT: control target
= control target key end

     0   :  { %9 = vsyncpa [#allocation3], 0  ;;  %s5110_s0 = inlined_call_operand.vmem [shape: f32[10,33], index: 0, kind: input, shape index: {}]   ;;  %s5111_s1 = inlined_call_operand.vmem [shape: s32[40,8], index: 1, kind: input, shape index: {}]   ;;  %s5112_s2 = inlined_call_operand.vmem [shape: s32[8,40], index: 2, kind: input, shape index: {}]   ;;  %s5113_s3 = inlined_call_operand.hbm [shape: f32[1024,256], index: 3, kind: input, shape index: {}]   ;;  %s5114_s4 = inlined_call_operand.hbm [shape: f32[3,32], index: 4, kind: output, shape index: {}]  }
   0x1   :  { %10 = vsyncpa [#allocation4], 0  ;;  %s4251_s15 = smov [#allocation2]   ;;  %s4203_s19 = scalar_lea.hbm %s5113_s3, 32768 }
   0x2   :  { %s22_s16 = sshll.u32 %s4251_s15, 4  ;;  %p4204_p0 = scmp.ne.s32.totalorder %s5113_s3, %s4203_s19  ;;  %s23_s16 = int_to_ptr.vmem [resolvable:$true] %s22_s16 }
   0x3   :  { %p4207_p1 = scmp.lt.u32.totalorder %s4203_s19, %s5113_s3 }
   0x5   :  { %p4209_p2 = pnand %p4207_p1, %p4204_p0 }
   0x7   :  { %4212 = shalt.err (!%p4209_p2)
}
   0x8   :  { %s4213_s24 = scalar_lea.vmem %s23_s16, 32768  ;;  %p4218_p4 = scmp.lt.s32.totalorder %s23_s16, %s23_s16 }
   0x9   :  { %p4214_p3 = scmp.ne.s32.totalorder %s23_s16, %s4213_s24  ;;  %p4219_p5 = scmp.lt.s32.totalorder %s4213_s24, %s4213_s24 }
   0xb   :  { %p4220_p6 = por %p4219_p5, %p4218_p4 }
   0xd   :  { %p4221_p7 = pnand %p4220_p6, %p4214_p3 }
   0xf   :  { %4224 = shalt.err (!%p4221_p7)
}
  0x10   :  { %s4252_s25 = smov 256   ;;  %s4253_s26 = smov 16  }
  0x11   :  { %28 = dma.hbm_to_vmem [thread:$0]  %s5113_s3, 32768, %s23_s16, [#allocation3], %s4252_s25, %s4252_s25, %s4253_s26  }
  0x12   :  { %4247 = dma.done.wait [#allocation3], 32768  }
  0x13   :  { %4248 = vsyncadd [#allocation3], 4294934528  ;;  %v4254_v0 = vmov 1   ;;  %vm40_vm0 = vcmask 269312   ;;  %v34_v1 = vld [vmem:[#allocation2] sm:$0xff]  ;;  %v35_v2 = vld [vmem:[#allocation2 + $0x10] sm:$0xff]  ;;  %v132_v25 = vlaneseq }
  0x14   :  { %4089 = vset.pattern.permute.xlu0 %v4254_v0  ;;  %4095 = vset.pattern.permute.xlu1 %v4254_v0  ;;  %v36_v3 = vld [vmem:[#allocation2 + $0x20] sm:$0xff]  ;;  %v3832_v4 = vpack.c.bf16 %v35_v2, %v34_v1  ;;  %v37_v5 = vld [vmem:[#allocation2 + $0x30] sm:$0xff]  ;;  %v33_v9 = vld [vmem:[%s5110_s0 + $0x8] sm:$0x3]  ;;  %vm47_vm1 = vcmask 1040384   ;;  %v4255_v15 = vmov 0.0|0.0  }
  0x15   :  { %v32_v6 = vld [vmem:[%s5110_s0] sm:$0xff]  ;;  %v3836_v7 = vpack.c.bf16 %v37_v5, %v36_v3  ;;  %v227_v11 = vmax.f32 %v33_v9, 1e-30  ;;  %v127_v12 = vld [vmem:[%s5111_s1 + $0x8] sm:$0xff]  ;;  %v129_v14 = vld [vmem:[%s5111_s1 + $0x18] sm:$0xff]  ;;  %3840 = vmatprep.subr.bf16.mxu1 %v4255_v15  ;;  %vm4256_vm2 = vmmov 0  }
  0x16   :  { %3625 = vmatprep.mubr.msk.f32.mxu0 %vm40_vm0, %v32_v6  ;;  %v226_v8 = vmax.f32 %v32_v6, 1e-30  ;;  %v126_v10 = vld [vmem:[%s5111_s1] sm:$0xff]  ;;  %3833 = vmatprep.subr.bf16.mxu0 %v3832_v4  ;;  %v4257_v16 = vmov 0.0   ;;  %v4258_v20 = vmov 0   ;;  %s4259_s11 = smov 96  }
  0x17   :  { %165 = vperm.xlu0 %4089, %v126_v10   ;;  %3835 = vmatpush3.bf16.msra.mxu0 %v3832_v4  ;;  %v38_v13 = vld [vmem:[#allocation2 + $0x40] sm:$0x1]  ;;  %v128_v23 = vld [vmem:[%s5111_s1 + $0x10] sm:$0xff]  ;;  %v4354_v27 = vand.u32 127, %v132_v25  ;;  %vm5117_vm3 = vcmask 1041408   ;;  %vm4260_vm5 = vmmov 1  }
  0x18   :  { %4147 = vlog2.f32 %v226_v8  ;;  %3837 = vmatprep.subr.bf16.mxu0 %v3836_v7  ;;  %3632 = vmatprep.mubr.msk.f32.mxu1 %vm4256_vm2, %v4257_v16  ;;  %v130_v24 = vld [vmem:[%s5111_s1 + $0x20] sm:$0xff]  ;;  %vm4358_vm6 = vmpackc.low %vm5117_vm3, %vm4260_vm5  ;;  %vm239_vm7 = vcmask 80896   ;;  %v555_v63 = vld [vmem:[#allocation2 + $0x98] sm:$0xff]  ;;  %s4263_s16 = smov 64   ;;  %s4264_s19 = smov 66  }
  0x19   :  { %4149 = vlog2.f32 %v227_v11  ;;  %v39_v42 = vld [vmem:[#allocation2 + $0x41] ss:$0 sm:$0xff]  ;;  %v557_v1 = vld [vmem:[#allocation2 + $0xa8] sm:$0xff]  ;;  %v554_v2 = vld [vmem:[#allocation2 + $0x90] sm:$0xff]  ;;  %s4265_s20 = smov 2   ;;  %s4266_s21 = smov 126  }
  0x1a   :  { %v3852_v3 = vpack.c.bf16 %v557_v1, %v555_v63  ;;  %v556_v4 = vld [vmem:[#allocation2 + $0xa0] sm:$0xff]  ;;  %v559_v5 = vld [vmem:[#allocation2 + $0xb8] sm:$0xff]  ;;  %v561_v6 = vld [vmem:[#allocation2 + $0xc8] sm:$0xff]  ;;  %s4271_s26 = smov 4   ;;  %s4272_s27 = smov 124  }
  0x1b   :  { %168 = vperm.xlu0 %4089, %v127_v12   ;;  %3839 = vmatpush3.bf16.msra.mxu0 %v3836_v7  ;;  %v3854_v7 = vpack.c.bf16 %v556_v4, %v554_v2  ;;  %v3856_v8 = vpack.c.bf16 %v561_v6, %v559_v5  ;;  %v843_v2 = vld [vmem:[#allocation2 + $0x140] sm:$0xff]  ;;  %v862_v5 = vld [vmem:[#allocation2 + $0x270] sm:$0xff] }
  0x1c   :  { %3623 = vmatprep.subr.msk.mxu0 %vm47_vm1, %v38_v13  ;;  %v861_v4 = vld [vmem:[#allocation2 + $0x260] sm:$0xff] }
  0x1f   :  { %174 = vperm.xlu0 %4089, %v129_v14   ;;  %3624 = vmatpush3.msk.msra.mxu0 %vm47_vm1, %v38_v13  ;;  %v549_v13 = vld [vmem:[#allocation2 + $0x68] sm:$0xff]  ;;  %vm5115_vm1 = vcmask 261120  }
  0x20   :  { %3626 = vmatmul.mubr.msk.f32.vlgmr.msra.gmra.mrb[0].mxu0 %vm40_vm0, %v33_v9  ;;  %3844 = vmatprep.subr.bf16.mxu0 %v4255_v15  ;;  %v558_v9 = vld [vmem:[#allocation2 + $0xb0] sm:$0xff] }
  0x21   :  { %3651 = vmatprep.mubr.msk.f32.mxu0 %vm4256_vm2, %v4257_v16 }
  0x22   :  { %v4148_v17 = vpop.eup %4147 }
  0x23   :  { %v4150_v18 = vpop.eup %4149  ;;  %v4338_v19 = vmul.f32 0.6931472, %v4148_v17  ;;  %4096 = vset.pattern.permute.xlu0 %v4258_v20 }
  0x24   :  { %v4341_v21 = vmul.f32 0.6931472, %v4150_v18  ;;  %135 = vperm.xlu0 %4096, %v126_v10   ;;  %v560_v10 = vld [vmem:[#allocation2 + $0xc0] sm:$0xff] }
  0x25   :  { %v3858_v11 = vpack.c.bf16 %v560_v10, %v558_v9  ;;  %v853_v18 = vld [vmem:[#allocation2 + $0x1e0] sm:$0xff]  ;;  %v3884_v9 = vpack.c.bf16 %v862_v5, %v861_v4 }
  0x26   :  { %v4090_v22 = vpack.i.bf16 %v4341_v21, %v4338_v19  ;;  %v845_v10 = vld [vmem:[#allocation2 + $0x160] sm:$0xff] }
  0x28   :  { %4091 = vrot.lane.b32.xlu1 %v4090_v22, %s4259_s11  ;;  %144 = vperm.xlu0 %4096, %v129_v14   ;;  %v854_v22 = vld [vmem:[#allocation2 + $0x1f0] sm:$0xff] }
  0x2c   :  { %171 = vperm.xlu1 %4095, %v128_v23  }
  0x30   :  { %177 = vperm.xlu1 %4095, %v130_v24  }
  0x34   :  { %4097 = vset.pattern.permute.xlu1 %v4258_v20 }
  0x35   :  { %138 = vperm.xlu1 %4097, %v127_v12   ;;  %v547_v12 = vld [vmem:[#allocation2 + $0x58] sm:$0xff] }
  0x36   :  { %v3860_v14 = vpack.c.bf16 %v549_v13, %v547_v12  ;;  %v863_v12 = vld [vmem:[#allocation2 + $0x280] sm:$0xff]  ;;  %v864_v13 = vld [vmem:[#allocation2 + $0x290] sm:$0xff] }
  0x39   :  { %141 = vperm.xlu1 %4097, %v128_v23   ;;  %v837_v23 = vld [vmem:[#allocation2 + $0xe0] sm:$0xff] }
  0x3d   :  { %147 = vperm.xlu1 %4097, %v130_v24  }
  0x96   :  { %v166_v26 = vpop.permute.xlu0 %165 }
  0x97   :  { %vm179_vm4 = vcmp.eq.s32.totalorder %v4354_v27, %v166_v26  ;;  %v3868_v26 = vpack.c.bf16 %v854_v22, %v853_v18 }
  0x98   :  { %v4363_v34 = vsel %vm179_vm4, 1.0, %v4257_v16 }
  0x9a   :  { %v4092_v28 = vpop.permute.xlu1 %4091  ;;  %v169_v33 = vpop.permute.xlu0 %168 }
  0x9b   :  { %v4094_v29 = vunpack.i.h.bf16 %v4092_v28  ;;  %v4093_v30 = vunpack.i.l.bf16 %v4092_v28  ;;  %vm180_vm8 = vcmp.eq.s32.totalorder %v4354_v27, %v169_v33  ;;  %v838_v28 = vld [vmem:[#allocation2 + $0xf0] sm:$0xff] }
  0x9c   :  { %v4372_v35 = vsel %vm180_vm8, 1.0, %v4257_v16 }
  0x9d   :  { %v3841_v32 = vpack.c.bf16 %v4094_v29, %v4093_v30  ;;  %v855_v29 = vld [vmem:[#allocation2 + $0x200] sm:$0xff]  ;;  %v856_v30 = vld [vmem:[#allocation2 + $0x210] sm:$0xff] }
  0x9e   :  { %v175_v36 = vpop.permute.xlu0 %174  ;;  %v3872_v33 = vpack.c.bf16 %v856_v30, %v855_v29 }
  0x9f   :  { %3843 = vmatpush3.bf16.msk.msra.mxu1 %vm4358_vm6, %v3841_v32  ;;  %vm182_vm10 = vcmp.eq.s32.totalorder %v4354_v27, %v175_v36  ;;  %v3870_v32 = vpack.c.bf16 %v838_v28, %v837_v23  ;;  %v839_v36 = vld [vmem:[#allocation2 + $0x100] sm:$0xff]  ;;  %v3888_v23 = vpack.c.bf16 %v864_v13, %v863_v12 }
  0xa0   :  { %3848 = vmatprep.subr.bf16.mxu1 %v4255_v15  ;;  %v4388_v39 = vsel %vm182_vm10, 1.0, %v4257_v16 }
  0xa2   :  { %3633 = vmatmul.mubr.msk.f32.vlgmr.msra.gmra.mrb[0].mxu1 %vm239_vm7, %v4363_v34 }
  0xa3   :  { %3635 = vmatprep.mubr.msk.f32.mxu1 %vm4256_vm2, %v4257_v16  ;;  %v136_v44 = vpop.permute.xlu0 %135 }
  0xa4   :  { %vm4409_vm12 = vcmp.eq.s32.totalorder %v4354_v27, %v136_v44 }
  0xa5   :  { %v4422_v51 = vsel %vm4409_vm12, 1.0, %v4257_v16 }
  0xa6   :  { %3636 = vmatmul.mubr.msk.f32.gmra.mrb[2].mxu1 %vm239_vm7, %v4372_v35 }
  0xa7   :  { %3638 = vmatprep.mubr.msk.f32.mxu1 %vm4256_vm2, %v4257_v16  ;;  %v145_v56 = vpop.permute.xlu0 %144 }
  0xa8   :  { %vm4461_vm15 = vcmp.eq.s32.totalorder %v4354_v27, %v145_v56  ;;  %v859_v56 = vld [vmem:[#allocation2 + $0x240] sm:$0xff] }
  0xa9   :  { %v4476_v60 = vsel %vm4461_vm15, 1.0, %v4257_v16 }
  0xab   :  { %v172_v37 = vpop.permute.xlu1 %171 }
  0xac   :  { %vm181_vm9 = vcmp.eq.s32.totalorder %v4354_v27, %v172_v37  ;;  %v840_v37 = vld [vmem:[#allocation2 + $0x110] sm:$0xff] }
  0xad   :  { %v4383_v38 = vsel %vm181_vm9, 1.0, %v4257_v16  ;;  %v3874_v44 = vpack.c.bf16 %v840_v37, %v839_v36  ;;  %v551_v36 = vld [vmem:[#allocation2 + $0x78] sm:$0xff]  ;;  %v553_v37 = vld [vmem:[#allocation2 + $0x88] sm:$0xff] }
  0xae   :  { %3639 = vmatmul.mubr.msk.f32.gmra.mrb[4].mxu1 %vm239_vm7, %v4383_v38 }
  0xaf   :  { %3641 = vmatprep.mubr.msk.f32.mxu1 %vm4256_vm2, %v4257_v16  ;;  %v178_v40 = vpop.permute.xlu1 %177 }
  0xb0   :  { %vm183_vm11 = vcmp.eq.s32.totalorder %v4354_v27, %v178_v40  ;;  %v857_v40 = vld [vmem:[#allocation2 + $0x220] sm:$0xff] }
  0xb1   :  { %v4396_v41 = vsel %vm183_vm11, 1.0, %v4257_v16 }
  0xb2   :  { %3642 = vmatmul.mubr.msk.f32.gmra.mrb[6].mxu1 %vm239_vm7, %v4388_v39 }
  0xb3   :  { %3644 = vmatprep.mubr.msk.f32.mxu1 %vm4256_vm2, %v4257_v16 }
  0xb4   :  { %v139_v48 = vpop.permute.xlu1 %138 }
  0xb5   :  { %vm4425_vm13 = vcmp.eq.s32.totalorder %v4354_v27, %v139_v48 }
  0xb6   :  { %3645 = vmatmul.mubr.msk.f32.gmra.mrb[8].mxu1 %vm239_vm7, %v4396_v41  ;;  %v4440_v54 = vsel %vm4425_vm13, 1.0, %v4257_v16 }
  0xb7   :  { %3670 = vmatprep.mubr.msk.f32.mxu1 %vm4256_vm2, %v4257_v16 }
  0xb8   :  { %v142_v53 = vpop.permute.xlu1 %141 }
  0xb9   :  { %vm4443_vm14 = vcmp.eq.s32.totalorder %v4354_v27, %v142_v53  ;;  %v842_v53 = vld [vmem:[#allocation2 + $0x130] sm:$0xff] }
  0xba   :  { %v4458_v57 = vsel %vm4443_vm14, 1.0, %v4257_v16 }
  0xbc   :  { %v148_v59 = vpop.permute.xlu1 %147 }
  0xbd   :  { %vm4479_vm0 = vcmp.eq.s32.totalorder %v4354_v27, %v148_v59  ;;  %v860_v59 = vld [vmem:[#allocation2 + $0x250] sm:$0xff] }
  0xbe   :  { %v4494_v62 = vsel %vm4479_vm0, 1.0, %v4257_v16  ;;  %v3880_v1 = vpack.c.bf16 %v860_v59, %v859_v56 }
  0xf3   :  { %v3627_v43 = vpop.f32.mrb[0].mxu0 }
  0xf4   :  { %v4404_v45 = vadd.f32 %v3627_v43, %v39_v42  ;;  %v117_v46 = vpop.f32.mrb[1].mxu0 }
  0xf5   :  { %v4406_v47 = vadd.f32 %v117_v46, %v39_v42  ;;  %v858_v42 = vld [vmem:[#allocation2 + $0x230] sm:$0xff] }
  0xf6   :  { %v3876_v48 = vpack.c.bf16 %v858_v42, %v857_v40  ;;  %v3864_v42 = vpack.c.bf16 %v553_v37, %v551_v36  ;;  %v867_v36 = vld [vmem:[#allocation2 + $0x2c0] sm:$0xff]  ;;  %v868_v37 = vld [vmem:[#allocation2 + $0x2d0] sm:$0xff] }
  0xf7   :  { %v3845_v50 = vpack.c.bf16 %v4404_v45, %v4406_v47 }
  0xf9   :  { %3847 = vmatpush3.bf16.msk.msra.mxu0 %vm4358_vm6, %v3845_v50  ;;  %3851 = vmatpush3.bf16.msk.msra.mxu1 %vm4358_vm6, %v3845_v50  ;;  %v841_v50 = vld [vmem:[#allocation2 + $0x120] sm:$0xff] }
  0xfa   :  { %3853 = vmatprep.subr.bf16.mxu0 %v3852_v3  ;;  %3869 = vmatprep.subr.bf16.mxu1 %v3868_v26  ;;  %v3878_v63 = vpack.c.bf16 %v842_v53, %v841_v50  ;;  %v844_v3 = vld [vmem:[#allocation2 + $0x150] sm:$0xff] }
  0xfb   :  { %v848_v26 = vld [vmem:[#allocation2 + $0x190] sm:$0xff] }
  0xfc   :  { %3671 = vmatmul.mubr.msk.f32.vlgmr.msra.gmra.mrb[10].mxu1 %vm239_vm7, %v4363_v34  ;;  %3652 = vmatmul.mubr.msk.f32.vlgmr.msra.gmra.mrb[2].mxu0 %vm239_vm7, %v4422_v51 }
  0xfd   :  { %3673 = vmatprep.mubr.msk.f32.mxu1 %vm4256_vm2, %v4257_v16  ;;  %3654 = vmatprep.mubr.msk.f32.mxu0 %vm4256_vm2, %v4257_v16 }
  0xfe   :  { %3855 = vmatpush1.bf16.msra.mxu0 %v3854_v7  ;;  %3871 = vmatpush3.bf16.msra.mxu1 %v3870_v32  ;;  %v3882_v7 = vpack.c.bf16 %v844_v3, %v843_v2  ;;  %v546_v32 = vld [vmem:[#allocation2 + $0x50] sm:$0xff] }
  0xff   :  { %3857 = vmatprep.subr.bf16.mxu0 %v3856_v8  ;;  %3873 = vmatprep.subr.bf16.mxu1 %v3872_v33  ;;  %v548_v33 = vld [vmem:[#allocation2 + $0x60] sm:$0xff] }
 0x100   :  { %3674 = vmatmul.mubr.msk.f32.gmra.mrb[12].mxu1 %vm239_vm7, %v4372_v35  ;;  %3655 = vmatmul.mubr.msk.f32.gmra.mrb[4].mxu0 %vm239_vm7, %v4440_v54  ;;  %v3862_v40 = vpack.c.bf16 %v548_v33, %v546_v32  ;;  %v850_v32 = vld [vmem:[#allocation2 + $0x1b0] sm:$0xff] }
 0x101   :  { %3676 = vmatprep.mubr.msk.f32.mxu1 %vm4256_vm2, %v4257_v16  ;;  %3657 = vmatprep.mubr.msk.f32.mxu0 %vm4256_vm2, %v4257_v16 }
 0x102   :  { %3859 = vmatpush1.bf16.msra.mxu0 %v3858_v11  ;;  %3875 = vmatpush3.bf16.msra.mxu1 %v3874_v44  ;;  %v846_v11 = vld [vmem:[#allocation2 + $0x170] sm:$0xff] }
 0x103   :  { %3861 = vmatprep.subr.bf16.mxu0 %v3860_v14  ;;  %3877 = vmatprep.subr.bf16.mxu1 %v3876_v48  ;;  %v3886_v18 = vpack.c.bf16 %v846_v11, %v845_v10  ;;  %v550_v44 = vld [vmem:[#allocation2 + $0x70] sm:$0xff] }
 0x104   :  { %3677 = vmatmul.mubr.msk.f32.gmra.mrb[14].mxu1 %vm239_vm7, %v4383_v38  ;;  %3658 = vmatmul.mubr.msk.f32.gmra.mrb[6].mxu0 %vm239_vm7, %v4458_v57 }
 0x105   :  { %3679 = vmatprep.mubr.msk.f32.mxu1 %vm4256_vm2, %v4257_v16  ;;  %3660 = vmatprep.mubr.msk.f32.mxu0 %vm4256_vm2, %v4257_v16 }
 0x106   :  { %3879 = vmatpush3.bf16.msra.mxu1 %v3878_v63 }
 0x107   :  { %3881 = vmatprep.subr.bf16.mxu1 %v3880_v1 }
 0x108   :  { %3680 = vmatmul.mubr.msk.f32.gmra.mrb[16].mxu1 %vm239_vm7, %v4388_v39  ;;  %3661 = vmatmul.mubr.msk.f32.gmra.mrb[8].mxu0 %vm239_vm7, %v4476_v60 }
 0x109   :  { %3682 = vmatprep.mubr.msk.f32.mxu1 %vm4256_vm2, %v4257_v16  ;;  %3663 = vmatprep.mubr.msk.f32.mxu0 %vm4256_vm2, %v4257_v16 }
 0x10a   :  { %3883 = vmatpush3.bf16.msra.mxu1 %v3882_v7 }
 0x10b   :  { %3885 = vmatprep.subr.bf16.mxu1 %v3884_v9 }
 0x10c   :  { %3683 = vmatmul.mubr.msk.f32.gmra.mrb[18].mxu1 %vm239_vm7, %v4396_v41  ;;  %3664 = vmatmul.mubr.msk.f32.gmra.mrb[10].mxu0 %vm239_vm7, %v4494_v62 }
 0x10d   :  { %642 = vmatprep.mubr.f32.mxu0 %v4257_v16 }
 0x10e   :  { %3887 = vmatpush3.bf16.msra.mxu1 %v3886_v18 }
 0x10f   :  { %3889 = vmatprep.subr.bf16.mxu1 %v3888_v23 }
 0x175   :  { %v4501_v17 = vpop.f32.mrb[0].mxu1 }
 0x176   :  { %v3634_v24 = vpop.f32.mrb[1].mxu1 }
 0x177   :  { %v847_v24 = vld [vmem:[#allocation2 + $0x180] sm:$0xff] }
 0x178   :  { %v3890_v29 = vpack.c.bf16 %v848_v26, %v847_v24  ;;  %v865_v24 = vld [vmem:[#allocation2 + $0x2a0] sm:$0xff]  ;;  %v866_v26 = vld [vmem:[#allocation2 + $0x2b0] sm:$0xff] }
 0x179   :  { %v4503_v43 = vpop.f32.mrb[2].mxu1 }
 0x17a   :  { %v3637_v46 = vpop.f32.mrb[3].mxu1  ;;  %3891 = vmatpush3.bf16.msra.mxu1 %v3890_v29  ;;  %v3892_v29 = vpack.c.bf16 %v866_v26, %v865_v24 }
 0x17b   :  { %v552_v46 = vld [vmem:[#allocation2 + $0x80] sm:$0xff] }
 0x17c   :  { %v3866_v59 = vpack.c.bf16 %v552_v46, %v550_v44  ;;  %3893 = vmatprep.subr.bf16.mxu1 %v3892_v29  ;;  %v852_v44 = vld [vmem:[#allocation2 + $0x1d0] sm:$0xff] }
 0x181   :  { %v4505_v6 = vpop.f32.mrb[4].mxu1 }
 0x182   :  { %v3640_v8 = vpop.f32.mrb[5].mxu1 }
 0x185   :  { %v4507_v14 = vpop.f32.mrb[6].mxu1 }
 0x186   :  { %v3643_v22 = vpop.f32.mrb[7].mxu1 }
 0x189   :  { %v4509_v28 = vpop.f32.mrb[8].mxu1 }
 0x18a   :  { %v3646_v30 = vpop.f32.mrb[9].mxu1 }
 0x18b   :  { %v849_v30 = vld [vmem:[#allocation2 + $0x1a0] sm:$0xff] }
 0x18c   :  { %v3894_v33 = vpack.c.bf16 %v850_v32, %v849_v30 }
 0x18e   :  { %3895 = vmatpush3.bf16.msra.mxu1 %v3894_v33 }
 0x1cf   :  { %v522_v48 = vpop.f32.mrb[10].mxu1  ;;  %v432_v50 = vpop.f32.mrb[2].mxu0 }
 0x1d0   :  { %v3672_v53 = vpop.f32.mrb[11].mxu1  ;;  %3325 = vmatmul.mubr.msk.f32.vlgmr.msra.gmra.mrb[12].mxu0 %vm5115_vm1, %v522_v48  ;;  %v3653_v56 = vpop.f32.mrb[3].mxu0  ;;  %v4532_v48 = vshrl.u32 %v132_v25, 7 }
 0x1d1   :  { %648 = vmatprep.mubr.f32.mxu0 %v4257_v16  ;;  %3863 = vmatpush1.bf16.msra.mxu0 %v3862_v40  ;;  %v3896_v40 = vpack.c.bf16 %v868_v37, %v867_v36  ;;  %v784_v53 = vld [vmem:[#allocation2 + $0xd0] ss:$8 sm:$0x3] }
 0x1d2   :  { %3865 = vmatprep.subr.bf16.mxu0 %v3864_v42  ;;  %v851_v42 = vld [vmem:[#allocation2 + $0x1c0] sm:$0xff]  ;;  %v4538_v56 = vsub.s32 1, %v4532_v48 }
 0x1d3   :  { %v527_v63 = vpop.f32.mrb[12].mxu1  ;;  %v437_v1 = vpop.f32.mrb[4].mxu0  ;;  %v3898_v46 = vpack.c.bf16 %v852_v44, %v851_v42  ;;  %3897 = vmatprep.subr.bf16.mxu1 %v3896_v40 }
 0x1d4   :  { %v3675_v2 = vpop.f32.mrb[13].mxu1  ;;  %3326 = vmatmul.mubr.msk.f32.gmra.mrb[14].mxu0 %vm5115_vm1, %v527_v63  ;;  %v3656_v3 = vpop.f32.mrb[5].mxu0  ;;  %v793_v63 = vrot.slane %v784_v53, %v4538_v56 }
 0x1d5   :  { %654 = vmatprep.mubr.f32.mxu0 %v4257_v16  ;;  %3867 = vmatpush1.bf16.msra.mxu0 %v3866_v59 }
 0x1d6   :  { %3899 = vmatpush3.bf16.msra.mxu1 %v3898_v46 }
 0x1d7   :  { %v532_v4 = vpop.f32.mrb[14].mxu1  ;;  %v442_v5 = vpop.f32.mrb[6].mxu0  ;;  %3908 = vmatprep.subr.bf16.mxu1 %v4255_v15 }
 0x1d8   :  { %v3678_v7 = vpop.f32.mrb[15].mxu1  ;;  %3327 = vmatmul.mubr.msk.f32.gmra.mrb[16].mxu0 %vm5115_vm1, %v532_v4  ;;  %v3659_v8 = vpop.f32.mrb[7].mxu0 }
 0x1d9   :  { %660 = vmatprep.mubr.f32.mxu0 %v4257_v16 }
 0x1db   :  { %v537_v9 = vpop.f32.mrb[16].mxu1  ;;  %v447_v10 = vpop.f32.mrb[8].mxu0 }
 0x1dc   :  { %v3681_v11 = vpop.f32.mrb[17].mxu1  ;;  %3328 = vmatmul.mubr.msk.f32.gmra.mrb[18].mxu0 %vm5115_vm1, %v537_v9  ;;  %v3662_v12 = vpop.f32.mrb[9].mxu0 }
 0x1dd   :  { %666 = vmatprep.mubr.f32.mxu0 %v4257_v16 }
 0x1df   :  { %v542_v13 = vpop.f32.mrb[18].mxu1  ;;  %v452_v18 = vpop.f32.mrb[10].mxu0 }
 0x1e0   :  { %v3684_v22 = vpop.f32.mrb[19].mxu1  ;;  %3329 = vmatmul.mubr.msk.f32.gmra.mrb[20].mxu0 %vm5115_vm1, %v542_v13  ;;  %v3665_v23 = vpop.f32.mrb[11].mxu0 }
 0x1e1   :  { %752 = vmatprep.mubr.f32.mxu0 %v4257_v16 }
 0x1e4   :  { %3330 = vmatmul.mubr.msk.f32.vlgmr.msra.gmra.mrb[12].mxu0 %vm5115_vm1, %v432_v50  ;;  %v4535_v50 = vsub.s32 0, %v4532_v48 }
 0x1e5   :  { %758 = vmatprep.mubr.f32.mxu0 %v4257_v16 }
 0x1e6   :  { %v789_v59 = vrot.slane %v784_v53, %v4535_v50 }
 0x1e8   :  { %3331 = vmatmul.mubr.msk.f32.gmra.mrb[14].mxu0 %vm5115_vm1, %v437_v1 }
 0x1e9   :  { %764 = vmatprep.mubr.f32.mxu0 %v4257_v16 }
 0x1ec   :  { %3332 = vmatmul.mubr.msk.f32.gmra.mrb[16].mxu0 %vm5115_vm1, %v442_v5 }
 0x1ed   :  { %770 = vmatprep.mubr.f32.mxu0 %v4257_v16 }
 0x1f0   :  { %3333 = vmatmul.mubr.msk.f32.gmra.mrb[18].mxu0 %vm5115_vm1, %v447_v10 }
 0x1f1   :  { %776 = vmatprep.mubr.f32.mxu0 %v4257_v16 }
 0x1f4   :  { %3334 = vmatmul.mubr.msk.f32.gmra.mrb[20].mxu0 %vm5115_vm1, %v452_v18 }
 0x2b7   :  { %v754_v1 = vpop.f32.mrb[12].mxu0 }
 0x2b8   :  { %v796_v2 = vadd.f32 %v789_v59, %v754_v1  ;;  %v756_v3 = vpop.f32.mrb[13].mxu0 }
 0x2b9   :  { %v797_v4 = vadd.f32 %v793_v63, %v756_v3 }
 0x2ba   :  { %v880_v5 = vmul.f32 0.01, %v796_v2  ;;  %vm870_vm4 = vcmp.gt.f32.partialorder %v796_v2, 0.0 }
 0x2bb   :  { %v881_v7 = vmul.f32 0.01, %v797_v4  ;;  %v760_v25 = vpop.f32.mrb[14].mxu0  ;;  %vm871_vm5 = vcmp.gt.f32.partialorder %v797_v4, 0.0 }
 0x2bc   :  { %v798_v8 = vadd.f32 %v789_v59, %v760_v25  ;;  %v762_v9 = vpop.f32.mrb[15].mxu0  ;;  %v890_v12 = vsel %vm870_vm4, %v796_v2, %v880_v5 }
 0x2bd   :  { %v799_v10 = vadd.f32 %v793_v63, %v762_v9  ;;  %v891_v11 = vsel %vm871_vm5, %v797_v4, %v881_v7 }
 0x2be   :  { %v882_v13 = vmul.f32 0.01, %v798_v8  ;;  %964 = vmatprep.mubr.f32.mxu1 %v891_v11  ;;  %vm872_vm9 = vcmp.gt.f32.partialorder %v798_v8, 0.0 }
 0x2bf   :  { %v883_v18 = vmul.f32 0.01, %v799_v10  ;;  %v766_v22 = vpop.f32.mrb[16].mxu0  ;;  %965 = vmatmul.mubr.f32.vlgmr.msra.gmra.mrb[20].mxu1 %v890_v12  ;;  %vm873_vm8 = vcmp.gt.f32.partialorder %v799_v10, 0.0  ;;  %v4261_v12 = vmov 64  }
 0x2c0   :  { %v800_v23 = vadd.f32 %v789_v59, %v766_v22  ;;  %v768_v24 = vpop.f32.mrb[17].mxu0  ;;  %v892_v32 = vsel %vm872_vm9, %v798_v8, %v882_v13  ;;  %4098 = vset.pattern.permute.xlu0 %v4261_v12  ;;  %v869_v13 = vld [vmem:[#allocation2 + $0x2e0] ss:$0 sm:$0xff] }
 0x2c1   :  { %v801_v26 = vadd.f32 %v793_v63, %v768_v24  ;;  %v893_v29 = vsel %vm873_vm8, %v799_v10, %v883_v18 }
 0x2c2   :  { %v884_v30 = vmul.f32 0.01, %v800_v23  ;;  %969 = vmatprep.mubr.f32.mxu1 %v893_v29  ;;  %vm874_vm11 = vcmp.gt.f32.partialorder %v800_v23, 0.0 }
 0x2c3   :  { %v885_v33 = vmul.f32 0.01, %v801_v26  ;;  %v772_v36 = vpop.f32.mrb[18].mxu0  ;;  %970 = vmatmul.mubr.f32.gmra.mrb[22].mxu1 %v892_v32  ;;  %vm875_vm10 = vcmp.gt.f32.partialorder %v801_v26, 0.0 }
 0x2c4   :  { %v802_v37 = vadd.f32 %v789_v59, %v772_v36  ;;  %v774_v40 = vpop.f32.mrb[19].mxu0  ;;  %v894_v53 = vsel %vm874_vm11, %v800_v23, %v884_v30  ;;  %vm5116_vm11 = vcmask 277504  }
 0x2c5   :  { %v803_v42 = vadd.f32 %v793_v63, %v774_v40  ;;  %v895_v44 = vsel %vm875_vm10, %v801_v26, %v885_v33  ;;  %vm1024_vm10 = vcmask 74752  }
 0x2c6   :  { %v886_v46 = vmul.f32 0.01, %v802_v37  ;;  %974 = vmatprep.mubr.f32.mxu1 %v895_v44  ;;  %vm876_vm5 = vcmp.gt.f32.partialorder %v802_v37, 0.0 }
 0x2c7   :  { %v887_v1 = vmul.f32 0.01, %v803_v42  ;;  %v778_v2 = vpop.f32.mrb[20].mxu0  ;;  %975 = vmatmul.mubr.f32.gmra.mrb[24].mxu1 %v894_v53  ;;  %vm877_vm4 = vcmp.gt.f32.partialorder %v803_v42, 0.0 }
 0x2c8   :  { %v804_v3 = vadd.f32 %v789_v59, %v778_v2  ;;  %v780_v4 = vpop.f32.mrb[21].mxu0  ;;  %v896_v8 = vsel %vm876_vm5, %v802_v37, %v886_v46  ;;  %v4262_v59 = vmov 65   ;;  %vm1116_vm5 = vcmask 7168  }
 0x2c9   :  { %v805_v5 = vadd.f32 %v793_v63, %v780_v4  ;;  %v897_v7 = vsel %vm877_vm4, %v803_v42, %v887_v1  ;;  %4099 = vset.pattern.permute.xlu1 %v4262_v59 }
 0x2ca   :  { %v888_v25 = vmul.f32 0.01, %v804_v3  ;;  %979 = vmatprep.mubr.f32.mxu1 %v897_v7  ;;  %vm878_vm9 = vcmp.gt.f32.partialorder %v804_v3, 0.0 }
 0x2cb   :  { %v889_v9 = vmul.f32 0.01, %v805_v5  ;;  %980 = vmatmul.mubr.f32.gmra.mrb[26].mxu1 %v896_v8  ;;  %vm879_vm8 = vcmp.gt.f32.partialorder %v805_v5, 0.0 }
 0x2cc   :  { %v898_v11 = vsel %vm878_vm9, %v804_v3, %v888_v25 }
 0x2cd   :  { %v899_v10 = vsel %vm879_vm8, %v805_v5, %v889_v9 }
 0x2ce   :  { %984 = vmatprep.mubr.f32.mxu1 %v899_v10 }
 0x2cf   :  { %985 = vmatmul.mubr.f32.gmra.mrb[28].mxu1 %v898_v11 }
 0x2d0   :  { %3702 = vmatprep.mubr.msk.f32.mxu1 %vm4256_vm2, %v4257_v16 }
 0x392   :  { %v3450_v63 = vpop.f32.mrb[20].mxu1 }
 0x393   :  { %v3451_v18 = vpop.f32.mrb[21].mxu1 }
 0x394   :  { %v3452_v22 = vadd.f32 %v3451_v18, %v3450_v63 }
 0x396   :  { %v4546_v23 = vadd.f32 %v3452_v22, %v869_v13  ;;  %v3453_v24 = vpop.f32.mrb[22].mxu1 }
 0x397   :  { %v3454_v26 = vpop.f32.mrb[23].mxu1 }
 0x398   :  { %v3455_v29 = vadd.f32 %v3454_v26, %v3453_v24  ;;  %1057 = vperm.xlu1 %4099, %v4546_v23   ;;  %992 = vperm.xlu0 %4098, %v4546_v23  }
 0x39a   :  { %v4550_v30 = vadd.f32 %v3455_v29, %v869_v13  ;;  %v3456_v32 = vpop.f32.mrb[24].mxu1 }
 0x39b   :  { %v3457_v33 = vpop.f32.mrb[25].mxu1 }
 0x39c   :  { %v3458_v36 = vadd.f32 %v3457_v33, %v3456_v32  ;;  %4100 = vset.pattern.permute.xlu1 %v4261_v12 }
 0x39d   :  { %997 = vperm.xlu1 %4100, %v4550_v30  }
 0x39e   :  { %v3459_v37 = vpop.f32.mrb[26].mxu1  ;;  %v4559_v2 = vadd.f32 %v3458_v36, %v869_v13 }
 0x39f   :  { %v3460_v40 = vpop.f32.mrb[27].mxu1 }
 0x3a0   :  { %v3461_v42 = vadd.f32 %v3460_v40, %v3459_v37 }
 0x3a1   :  { %4101 = vset.pattern.permute.xlu1 %v4262_v59 }
 0x3a2   :  { %v4555_v44 = vadd.f32 %v3461_v42, %v869_v13  ;;  %1061 = vperm.xlu1 %4101, %v4550_v30   ;;  %v3462_v46 = vpop.f32.mrb[28].mxu1 }
 0x3a3   :  { %v3463_v53 = vpop.f32.mrb[29].mxu1 }
 0x3a4   :  { %v3464_v1 = vadd.f32 %v3463_v53, %v3462_v46  ;;  %1007 = vperm.xlu0 %4098, %v4555_v44  }
 0x3a6   :  { %v4561_v3 = vadd.f32 %v3464_v1, %v869_v13  ;;  %4102 = vset.pattern.permute.xlu1 %v4261_v12 }
 0x3a7   :  { %1002 = vperm.xlu1 %4102, %v4559_v2  }
 0x3a8   :  { %4104 = vset.pattern.permute.xlu0 %v4262_v59 }
 0x3a9   :  { %1073 = vperm.xlu0 %4104, %v4561_v3  }
 0x3ab   :  { %1012 = vperm.xlu1 %4102, %v4561_v3  }
 0x3ad   :  { %1069 = vperm.xlu0 %4104, %v4555_v44  }
 0x3af   :  { %4103 = vset.pattern.permute.xlu1 %v4262_v59 }
 0x3b0   :  { %1065 = vperm.xlu1 %4103, %v4559_v2  }
 0x3b1   :  { %4106 = vset.pattern.permute.xlu0 %v4258_v20 }
 0x3b2   :  { %814 = vperm.xlu0 %4106, %v4503_v43  }
 0x3b4   :  { %4105 = vset.pattern.permute.xlu1 %v4258_v20 }
 0x3b5   :  { %809 = vperm.xlu1 %4105, %v4501_v17  }
 0x3b6   :  { %824 = vperm.xlu0 %4106, %v4507_v14  }
 0x3b9   :  { %819 = vperm.xlu1 %4105, %v4505_v6  }
 0x3ba   :  { %4108 = vset.pattern.permute.xlu0 %v4254_v0 }
 0x3bd   :  { %1122 = vrot.lane.b32.xlu1 %v4546_v23, %s4263_s16 }
 0x417   :  { %v1058_v4 = vpop.permute.xlu1 %1057  ;;  %v993_v7 = vpop.permute.xlu0 %992 }
 0x418   :  { %v1015_v17 = vsel %vm4409_vm12, %v993_v7, -inf  ;;  %v1076_v10 = vsel %vm4409_vm12, %v1058_v4, -inf }
 0x419   :  { %v1020_v24 = vsel %vm239_vm7, %v1015_v17, -inf  ;;  %v1081_v33 = vsel %vm239_vm7, %v1076_v10, -inf }
 0x41c   :  { %v998_v5 = vpop.permute.xlu1 %997 }
 0x41d   :  { %v1016_v11 = vsel %vm4425_vm13, %v998_v5, -inf }
 0x41e   :  { %v1021_v36 = vsel %vm239_vm7, %v1016_v11, -inf }
 0x421   :  { %v1062_v25 = vpop.permute.xlu1 %1061 }
 0x422   :  { %v1077_v40 = vsel %vm4425_vm13, %v1062_v25, -inf }
 0x423   :  { %v1008_v8 = vpop.permute.xlu0 %1007 }
 0x424   :  { %v1018_v13 = vsel %vm4461_vm15, %v1008_v8, -inf  ;;  %v1082_v8 = vsel %vm239_vm7, %v1077_v40, -inf }
 0x425   :  { %v1023_v42 = vsel %vm239_vm7, %v1018_v13, -inf }
 0x426   :  { %v1003_v43 = vpop.permute.xlu1 %1002 }
 0x427   :  { %v1017_v6 = vsel %vm4443_vm14, %v1003_v43, -inf }
 0x428   :  { %v1074_v9 = vpop.permute.xlu0 %1073  ;;  %v1022_v26 = vsel %vm239_vm7, %v1017_v6, -inf }
 0x429   :  { %v1080_v14 = vsel %vm4479_vm0, %v1074_v9, -inf  ;;  %v1028_v1 = vmax.f32 %v1022_v26, %v1023_v42 }
 0x42a   :  { %v1013_v63 = vpop.permute.xlu1 %1012  ;;  %v1085_v18 = vsel %vm1024_vm10, %v1080_v14, -inf }
 0x42b   :  { %v1019_v22 = vsel %vm4479_vm0, %v1013_v63, -inf  ;;  %v1086_v46 = vmax.f32 %v1081_v33, %v1085_v18 }
 0x42c   :  { %v1025_v29 = vsel %vm1024_vm10, %v1019_v22, -inf  ;;  %v1070_v32 = vpop.permute.xlu0 %1069 }
 0x42d   :  { %v1026_v37 = vmax.f32 %v1020_v24, %v1025_v29  ;;  %v1079_v53 = vsel %vm4461_vm15, %v1070_v32, -inf  ;;  %v1087_v25 = vmax.f32 %v1086_v46, %v1082_v8 }
 0x42e   :  { %v1084_v9 = vsel %vm239_vm7, %v1079_v53, -inf }
 0x42f   :  { %v1027_v4 = vmax.f32 %v1026_v37, %v1021_v36  ;;  %v1066_v5 = vpop.permute.xlu1 %1065 }
 0x430   :  { %v1078_v7 = vsel %vm4443_vm14, %v1066_v5, -inf }
 0x431   :  { %v1029_v43 = vmax.f32 %v1027_v4, %v1028_v1  ;;  %v1083_v17 = vsel %vm239_vm7, %v1078_v7, -inf }
 0x432   :  { %v1088_v6 = vmax.f32 %v1083_v17, %v1084_v9 }
 0x433   :  { %v1030_v14 = vrot.slane %v1029_v43, 4 }
 0x434   :  { %v1089_v10 = vmax.f32 %v1087_v25, %v1088_v6 }
 0x435   :  { %v1031_v11 = vmax.f32 %v1029_v43, %v1030_v14 }
 0x436   :  { %v1090_v63 = vrot.slane %v1089_v10, 4 }
 0x437   :  { %v1032_v13 = vrot.slane %v1031_v11, 2 }
 0x438   :  { %v1091_v18 = vmax.f32 %v1089_v10, %v1090_v63 }
 0x439   :  { %v1033_v22 = vmax.f32 %v1031_v11, %v1032_v13 }
 0x43a   :  { %v1092_v24 = vrot.slane %v1091_v18, 2 }
 0x43b   :  { %v1034_v26 = vrot.slane %v1033_v22, 1 }
 0x43c   :  { %v1093_v29 = vmax.f32 %v1091_v18, %v1092_v24  ;;  %v131_v18 = vld [vmem:[%s5112_s2] sm:$0xff]  ;;  %v815_v24 = vpop.permute.xlu0 %814 }
 0x43d   :  { %v1035_v32 = vmax.f32 %v1033_v22, %v1034_v26  ;;  %v4654_v22 = vrot.slane %v131_v18, %v4535_v50 }
 0x43e   :  { %v1094_v33 = vrot.slane %v1093_v29, 1 }
 0x43f   :  { %v1037_v36 = vsel %vm4425_vm13, %v1035_v32, 0.0  ;;  %v1036_v37 = vsel %vm4409_vm12, %v1035_v32, 0.0  ;;  %v1039_v7 = vsel %vm4461_vm15, %v1035_v32, 0.0  ;;  %v1038_v8 = vsel %vm4443_vm14, %v1035_v32, 0.0 }
 0x440   :  { %v1095_v40 = vmax.f32 %v1093_v29, %v1094_v33  ;;  %v1044_v42 = vsel %vm239_vm7, %v1037_v36, 0.0  ;;  %v1041_v46 = vsel %vm239_vm7, %v1036_v37, 0.0  ;;  %v1050_v43 = vsel %vm239_vm7, %v1039_v7, 0.0  ;;  %v825_v29 = vpop.permute.xlu0 %824 }
 0x441   :  { %1045 = vadd.xlane.f32.xlu0 %v1044_v42  ;;  %1042 = vadd.xlane.f32.xlu1 %v1041_v46  ;;  %v1047_v9 = vsel %vm239_vm7, %v1038_v8, 0.0  ;;  %v1040_v63 = vsel %vm4479_vm0, %v1035_v32, 0.0  ;;  %vm201_vm4 = vcmp.eq.s32.totalorder %v4532_v48, %v4654_v22 }
 0x442   :  { %v1097_v53 = vsel %vm4425_vm13, %v1095_v40, 0.0  ;;  %v1096_v1 = vsel %vm4409_vm12, %v1095_v40, 0.0  ;;  %v1100_v17 = vsel %vm4479_vm0, %v1095_v40, 0.0  ;;  %v1098_v25 = vsel %vm4443_vm14, %v1095_v40, 0.0 }
 0x443   :  { %v1104_v4 = vsel %vm239_vm7, %v1097_v53, 0.0  ;;  %v1101_v5 = vsel %vm239_vm7, %v1096_v1, 0.0  ;;  %v1113_v6 = vsel %vm1024_vm10, %v1100_v17, 0.0  ;;  %v1107_v14 = vsel %vm239_vm7, %v1098_v25, 0.0  ;;  %v806_v53 = vld [vmem:[#allocation2 + $0x7f0] ss:$0 sm:$0xff] }
 0x444   :  { %v1099_v10 = vsel %vm4461_vm15, %v1095_v40, 0.0  ;;  %v1053_v13 = vsel %vm1024_vm10, %v1040_v63, 0.0 }
 0x445   :  { %1105 = vadd.xlane.f32.xlu0 %v1104_v4  ;;  %1102 = vadd.xlane.f32.xlu1 %v1101_v5  ;;  %v1110_v11 = vsel %vm239_vm7, %v1099_v10, 0.0 }
 0x449   :  { %1051 = vadd.xlane.f32.xlu0 %v1050_v43  ;;  %1048 = vadd.xlane.f32.xlu1 %v1047_v9  ;;  %v4667_v9 = vmul.f32 %v815_v24, %v806_v53 }
 0x44d   :  { %1114 = vadd.xlane.f32.xlu0 %v1113_v6  ;;  %1108 = vadd.xlane.f32.xlu1 %v1107_v14 }
 0x451   :  { %1111 = vadd.xlane.f32.xlu1 %v1110_v11 }
 0x455   :  { %1054 = vadd.xlane.f32.xlu1 %v1053_v13 }
 0x463   :  { %1124 = vrot.lane.b32.xlu0 %v4550_v30, %s4263_s16 }
 0x466   :  { %829 = vperm.xlu1 %4105, %v4509_v28   ;;  %v4659_v28 = vsel %vm201_vm4, 1.0, %v4257_v16 }
 0x467   :  { %3695 = vmatprep.mubr.msk.f32.mxu0 %vm5116_vm11, %v4659_v28 }
 0x46a   :  { %1126 = vrot.lane.b32.xlu1 %v4559_v2, %s4263_s16 }
 0x46b   :  { %4107 = vset.pattern.permute.xlu1 %v4254_v0  ;;  %v810_v0 = vpop.permute.xlu1 %809 }
 0x46c   :  { %v4663_v1 = vmul.f32 %v810_v0, %v806_v53 }
 0x46e   :  { %1128 = vrot.lane.b32.xlu1 %v4555_v44, %s4263_s16 }
 0x46f   :  { %v820_v26 = vpop.permute.xlu1 %819 }
 0x470   :  { %v4671_v0 = vmul.f32 %v820_v26, %v806_v53 }
 0x472   :  { %1130 = vrot.lane.b32.xlu1 %v4561_v3, %s4263_s16 }
 0x473   :  { %v1123_v32 = vpop.permute.xlu1 %1122 }
 0x474   :  { %v1137_v5 = vadd.f32 %v1123_v32, %v4663_v1 }
 0x4ce   :  { %v1046_v33 = vpop.xlane.xlu0 %1045  ;;  %v1043_v36 = vpop.xlane.xlu1 %1042 }
 0x4d2   :  { %v1106_v37 = vpop.xlane.xlu0 %1105  ;;  %v1103_v40 = vpop.xlane.xlu1 %1102 }
 0x4d3   :  { %v1117_v4 = vsel %vm1116_vm5, %v1043_v36, %v1103_v40  ;;  %v1118_v14 = vsel %vm1116_vm5, %v1046_v33, %v1106_v37  ;;  %v4675_v40 = vmul.f32 %v825_v29, %v806_v53 }
 0x4d4   :  { %v1142_v43 = vsub.f32 %v1137_v5, %v1117_v4 }
 0x4d6   :  { %v1052_v42 = vpop.xlane.xlu0 %1051  ;;  %v1049_v46 = vpop.xlane.xlu1 %1048  ;;  %v1147_v10 = vmul.f32 1.442695, %v1142_v43 }
 0x4d8   :  { %4151 = vpow2.f32 %v1147_v10 }
 0x4da   :  { %v1115_v7 = vpop.xlane.xlu0 %1114  ;;  %v1109_v8 = vpop.xlane.xlu1 %1108 }
 0x4db   :  { %v1119_v24 = vsel %vm1116_vm5, %v1049_v46, %v1109_v8 }
 0x4de   :  { %v1125_v17 = vpop.permute.xlu0 %1124  ;;  %v1112_v25 = vpop.xlane.xlu1 %1111 }
 0x4df   :  { %v1138_v6 = vadd.f32 %v1125_v17, %v4667_v9  ;;  %v1120_v43 = vsel %vm1116_vm5, %v1052_v42, %v1112_v25  ;;  %v196_v25 = vadd.s32 8, %v4532_v48 }
 0x4e1   :  { %v1143_v11 = vsub.f32 %v1138_v6, %v1118_v14  ;;  %vm202_vm8 = vcmp.eq.s32.totalorder %v196_v25, %v4654_v22 }
 0x4e2   :  { %v1055_v63 = vpop.xlane.xlu1 %1054  ;;  %v4152_v5 = vpop.eup %4151 }
 0x4e3   :  { %v1149_v13 = vmul.f32 1.442695, %v1143_v11  ;;  %v1121_v8 = vsel %vm1116_vm5, %v1055_v63, %v1115_v7 }
 0x4e5   :  { %4153 = vpow2.f32 %v1149_v13 }
 0x4e6   :  { %v830_v18 = vpop.permute.xlu1 %829 }
 0x4e7   :  { %v4682_v14 = vmul.f32 %v830_v18, %v806_v53 }
 0x4ea   :  { %v1127_v32 = vpop.permute.xlu1 %1126 }
 0x4eb   :  { %v1139_v36 = vadd.f32 %v1127_v32, %v4671_v0 }
 0x4ed   :  { %v1144_v4 = vsub.f32 %v1139_v36, %v1119_v24  ;;  %v4690_v24 = vsel %vm202_vm8, 1.0, %v4257_v16 }
 0x4ee   :  { %v1129_v17 = vpop.permute.xlu1 %1128 }
 0x4ef   :  { %v4677_v33 = vpop.eup %4153  ;;  %v1140_v37 = vadd.f32 %v1129_v17, %v4675_v40  ;;  %v1151_v6 = vmul.f32 1.442695, %v1144_v4 }
 0x4f0   :  { %v3900_v26 = vpack.c.bf16 %v4677_v33, %v4152_v5 }
 0x4f1   :  { %v1145_v10 = vsub.f32 %v1140_v37, %v1120_v43  ;;  %4155 = vpow2.f32 %v1151_v6 }
 0x4f2   :  { %3901 = vmatprep.subr.bf16.mxu0 %v3900_v26  ;;  %v1131_v11 = vpop.permute.xlu1 %1130 }
 0x4f3   :  { %v1153_v46 = vmul.f32 1.442695, %v1145_v10  ;;  %v1141_v29 = vadd.f32 %v1131_v11, %v4682_v14  ;;  %3903 = vmatpush3.bf16.msra.mxu0 %v3900_v26 }
 0x4f5   :  { %4157 = vpow2.f32 %v1153_v46  ;;  %v1146_v13 = vsub.f32 %v1141_v29, %v1121_v8  ;;  %v1242_v8 = vmul.f32 0.5, %v4152_v5 }
 0x4f7   :  { %v1155_v32 = vmul.f32 1.442695, %v1146_v13 }
 0x4f9   :  { %4159 = vpow2.f32 %v1155_v32 }
 0x4fb   :  { %v4156_v42 = vpop.eup %4155 }
 0x4ff   :  { %v4158_v36 = vpop.eup %4157 }
 0x500   :  { %v3904_v53 = vpack.c.bf16 %v4158_v36, %v4156_v42  ;;  %v1245_v5 = vmul.f32 0.5, %v4158_v36 }
 0x502   :  { %3905 = vmatprep.subr.bf16.mxu0 %v3904_v53 }
 0x503   :  { %v4160_v18 = vpop.eup %4159  ;;  %3907 = vmatpush3.bf16.msra.mxu0 %v3904_v53 }
 0x504   :  { %3693 = vmatprep.subr.msk.mxu0 %vm5117_vm3, %v4160_v18 }
 0x507   :  { %3694 = vmatpush3.msk.msra.mxu0 %vm5117_vm3, %v4160_v18 }
 0x508   :  { %3696 = vmatmul.mubr.msk.f32.vlgmr.msra.gmra.mrb[22].mxu0 %vm5116_vm11, %v4690_v24 }
 0x509   :  { %3727 = vmatprep.mubr.msk.f32.mxu0 %vm5116_vm11, %v4659_v28 }
 0x5db   :  { %v3697_v7 = vpop.f32.mrb[22].mxu0 }
 0x5dc   :  { %v1233_v63 = vpop.f32.mrb[23].mxu0 }
 0x5dd   :  { %v3909_v4 = vpack.c.bf16 %v3697_v7, %v1233_v63  ;;  %v1243_v63 = vmul.f32 0.5, %v4677_v33 }
 0x5df   :  { %3911 = vmatpush3.bf16.msk.msra.mxu1 %vm4358_vm6, %v3909_v4 }
 0x5e0   :  { %3924 = vmatprep.subr.bf16.mxu1 %v4255_v15 }
 0x5e2   :  { %3703 = vmatmul.mubr.msk.f32.vlgmr.msra.gmra.mrb[30].mxu1 %vm239_vm7, %v4422_v51 }
 0x5e3   :  { %3705 = vmatprep.mubr.msk.f32.mxu1 %vm4256_vm2, %v4257_v16 }
 0x5e6   :  { %3706 = vmatmul.mubr.msk.f32.gmra.mrb[32].mxu1 %vm239_vm7, %v4440_v54 }
 0x5e7   :  { %3708 = vmatprep.mubr.msk.f32.mxu1 %vm4256_vm2, %v4257_v16 }
 0x5ea   :  { %3709 = vmatmul.mubr.msk.f32.gmra.mrb[34].mxu1 %vm239_vm7, %v4458_v57 }
 0x5eb   :  { %3711 = vmatprep.mubr.msk.f32.mxu1 %vm4256_vm2, %v4257_v16 }
 0x5ee   :  { %3712 = vmatmul.mubr.msk.f32.gmra.mrb[36].mxu1 %vm239_vm7, %v4476_v60 }
 0x5ef   :  { %3714 = vmatprep.mubr.msk.f32.mxu1 %vm4256_vm2, %v4257_v16 }
 0x5f2   :  { %3715 = vmatmul.mubr.msk.f32.gmra.mrb[38].mxu1 %vm239_vm7, %v4494_v62 }
 0x5f3   :  { %3753 = vmatprep.mubr.msk.f32.mxu1 %vm4256_vm2, %v4257_v16 }
 0x6b5   :  { %v1316_v22 = vpop.f32.mrb[30].mxu1 }
 0x6b6   :  { %v1317_v17 = vadd.f32 1e-10, %v1316_v22  ;;  %v3704_v37 = vpop.f32.mrb[31].mxu1 }
 0x6b8   :  { %4161 = vrcp.f32 %v1317_v17 }
 0x6b9   :  { %v1321_v43 = vpop.f32.mrb[32].mxu1 }
 0x6ba   :  { %v1322_v6 = vadd.f32 1e-10, %v1321_v43  ;;  %v3707_v26 = vpop.f32.mrb[33].mxu1  ;;  %v1244_v43 = vmul.f32 0.5, %v4156_v42 }
 0x6bc   :  { %4163 = vrcp.f32 %v1322_v6 }
 0x6bd   :  { %v1326_v10 = vpop.f32.mrb[34].mxu1 }
 0x6be   :  { %v1327_v11 = vadd.f32 1e-10, %v1326_v10  ;;  %v3710_v46 = vpop.f32.mrb[35].mxu1 }
 0x6bf   :  { %v1246_v46 = vmul.f32 0.5, %v4160_v18 }
 0x6c0   :  { %4165 = vrcp.f32 %v1327_v11 }
 0x6c1   :  { %v1331_v29 = vpop.f32.mrb[36].mxu1 }
 0x6c2   :  { %v4162_v13 = vpop.eup %4161  ;;  %v1332_v32 = vadd.f32 1e-10, %v1331_v29  ;;  %v3713_v25 = vpop.f32.mrb[37].mxu1 }
 0x6c3   :  { %v1341_v53 = vmul.f32 %v4162_v13, %v1242_v8 }
 0x6c4   :  { %4167 = vrcp.f32 %v1332_v32 }
 0x6c5   :  { %1381 = vperm.xlu1 %4107, %v1341_v53   ;;  %v1336_v7 = vpop.f32.mrb[38].mxu1 }
 0x6c6   :  { %v4164_v4 = vpop.eup %4163  ;;  %v1337_v22 = vadd.f32 1e-10, %v1336_v7  ;;  %v3716_v17 = vpop.f32.mrb[39].mxu1 }
 0x6c7   :  { %v1343_v37 = vmul.f32 %v4164_v4, %v1243_v63 }
 0x6c8   :  { %4169 = vrcp.f32 %v1337_v22 }
 0x6c9   :  { %1385 = vperm.xlu1 %4107, %v1343_v37  }
 0x6ca   :  { %v4166_v6 = vpop.eup %4165 }
 0x6cb   :  { %v1345_v26 = vmul.f32 %v4166_v6, %v1244_v43 }
 0x6cd   :  { %1389 = vperm.xlu0 %4108, %v1345_v26  }
 0x6ce   :  { %v4168_v10 = vpop.eup %4167 }
 0x6cf   :  { %v1347_v11 = vmul.f32 %v4168_v10, %v1245_v5 }
 0x6d1   :  { %4109 = vset.pattern.permute.xlu0 %v4258_v20  ;;  %1393 = vperm.xlu1 %4107, %v1347_v11  }
 0x6d2   :  { %v4170_v29 = vpop.eup %4169  ;;  %1352 = vperm.xlu0 %4109, %v1341_v53  }
 0x6d3   :  { %v1349_v33 = vmul.f32 %v4170_v29, %v1246_v46 }
 0x6d5   :  { %1397 = vperm.xlu1 %4107, %v1349_v33  }
 0x6d6   :  { %1367 = vperm.xlu0 %4109, %v1347_v11  }
 0x6d9   :  { %4110 = vset.pattern.permute.xlu1 %v4258_v20 }
 0x6da   :  { %1357 = vperm.xlu1 %4110, %v1343_v37   ;;  %4113 = vset.pattern.permute.xlu0 %v4261_v12 }
 0x6de   :  { %1362 = vperm.xlu1 %4110, %v1345_v26  }
 0x6e2   :  { %1372 = vperm.xlu1 %4110, %v1349_v33  }
 0x6e6   :  { %4111 = vset.pattern.permute.xlu1 %v4261_v12 }
 0x744   :  { %v1382_v42 = vpop.permute.xlu1 %1381 }
 0x745   :  { %v1400_v36 = vmul.f32 %v1382_v42, %v4546_v23 }
 0x747   :  { %1410 = vrot.lane.b32.xlu1 %v1400_v36, %s4259_s11 }
 0x748   :  { %v1386_v18 = vpop.permute.xlu1 %1385 }
 0x749   :  { %v1401_v8 = vmul.f32 %v1386_v18, %v4550_v30 }
 0x74b   :  { %1412 = vrot.lane.b32.xlu0 %v1401_v8, %s4259_s11 }
 0x74c   :  { %v1390_v13 = vpop.permute.xlu0 %1389 }
 0x74d   :  { %v1402_v20 = vmul.f32 %v1390_v13, %v4559_v2 }
 0x74f   :  { %1414 = vrot.lane.b32.xlu0 %v1402_v20, %s4259_s11 }
 0x750   :  { %v1394_v32 = vpop.permute.xlu1 %1393 }
 0x751   :  { %v1403_v25 = vmul.f32 %v1394_v32, %v4555_v44  ;;  %v1353_v22 = vpop.permute.xlu0 %1352 }
 0x752   :  { %v1375_v6 = vmul.f32 %v1353_v22, %v4546_v23  ;;  %v1701_v22 = vld [vmem:[#allocation2 + $0x340] sm:$0xff] }
 0x753   :  { %1416 = vrot.lane.b32.xlu1 %v1403_v25, %s4259_s11 }
 0x754   :  { %v1398_v53 = vpop.permute.xlu1 %1397 }
 0x755   :  { %v1404_v7 = vmul.f32 %v1398_v53, %v4561_v3  ;;  %v1368_v37 = vpop.permute.xlu0 %1367 }
 0x756   :  { %v1378_v33 = vmul.f32 %v1368_v37, %v4555_v44  ;;  %v1700_v44 = vld [vmem:[#allocation2 + $0x338] sm:$0xff]  ;;  %v1706_v37 = vld [vmem:[#allocation2 + $0x368] sm:$0xff] }
 0x757   :  { %1418 = vrot.lane.b32.xlu0 %v1404_v7, %s4259_s11 }
 0x759   :  { %v1358_v63 = vpop.permute.xlu1 %1357 }
 0x75a   :  { %v1376_v26 = vmul.f32 %v1358_v63, %v4550_v30 }
 0x75d   :  { %v1363_v4 = vpop.permute.xlu1 %1362 }
 0x75e   :  { %v1377_v42 = vmul.f32 %v1363_v4, %v4559_v2  ;;  %v1702_v2 = vld [vmem:[#allocation2 + $0x348] sm:$0xff]  ;;  %v1699_v4 = vld [vmem:[#allocation2 + $0x330] sm:$0xff] }
 0x75f   :  { %v3928_v7 = vpack.c.bf16 %v1702_v2, %v1700_v44  ;;  %v1972_v44 = vld [vmem:[#allocation2 + $0x4e0] sm:$0xff]  ;;  %v1973_v2 = vld [vmem:[#allocation2 + $0x4f0] sm:$0xff] }
 0x761   :  { %v1373_v17 = vpop.permute.xlu1 %1372 }
 0x762   :  { %v1379_v13 = vmul.f32 %v1373_v17, %v4561_v3  ;;  %v1704_v17 = vld [vmem:[#allocation2 + $0x358] sm:$0xff] }
 0x7b9   :  { %v1411_v43 = vpop.permute.xlu1 %1410 }
 0x7ba   :  { %v1425_v10 = vadd.f32 %v1411_v43, %v1375_v6  ;;  %v3932_v43 = vpack.c.bf16 %v1706_v37, %v1704_v17  ;;  %v1703_v6 = vld [vmem:[#allocation2 + $0x350] sm:$0xff] }
 0x7bb   :  { %v1975_v17 = vld [vmem:[#allocation2 + $0x510] sm:$0xff] }
 0x7bd   :  { %v1413_v5 = vpop.permute.xlu0 %1412 }
 0x7be   :  { %v1426_v11 = vadd.f32 %v1413_v5, %v1376_v26  ;;  %v1966_v5 = vld [vmem:[#allocation2 + $0x480] sm:$0xff] }
 0x7c0   :  { %v3912_v46 = vpack.c.bf16 %v1426_v11, %v1425_v10  ;;  %v1950_v10 = vld [vmem:[#allocation2 + $0x380] sm:$0xff] }
 0x7c1   :  { %v1415_v29 = vpop.permute.xlu0 %1414 }
 0x7c2   :  { %3913 = vmatprep.subr.bf16.mxu0 %v3912_v46  ;;  %v1427_v18 = vadd.f32 %v1415_v29, %v1377_v42  ;;  %v1968_v29 = vld [vmem:[#allocation2 + $0x4a0] sm:$0xff] }
 0x7c3   :  { %3915 = vmatpush3.bf16.msra.mxu0 %v3912_v46  ;;  %v1951_v46 = vld [vmem:[#allocation2 + $0x390] sm:$0xff] }
 0x7c4   :  { %v3946_v42 = vpack.c.bf16 %v1951_v46, %v1950_v10  ;;  %v1691_v10 = vld [vmem:[#allocation2 + $0x2f0] sm:$0xff]  ;;  %v1696_v46 = vld [vmem:[#allocation2 + $0x318] sm:$0xff] }
 0x7c5   :  { %v1417_v36 = vpop.permute.xlu1 %1416 }
 0x7c6   :  { %v1428_v8 = vadd.f32 %v1417_v36, %v1378_v33  ;;  %v1969_v33 = vld [vmem:[#allocation2 + $0x4b0] sm:$0xff] }
 0x7c7   :  { %v3948_v36 = vpack.c.bf16 %v1969_v33, %v1968_v29  ;;  %v1698_v29 = vld [vmem:[#allocation2 + $0x328] sm:$0xff] }
 0x7c8   :  { %v3916_v20 = vpack.c.bf16 %v1428_v8, %v1427_v18  ;;  %v1952_v18 = vld [vmem:[#allocation2 + $0x3a0] sm:$0xff]  ;;  %v1953_v8 = vld [vmem:[#allocation2 + $0x3b0] sm:$0xff] }
 0x7c9   :  { %v1419_v23 = vpop.permute.xlu0 %1418 }
 0x7ca   :  { %v1429_v32 = vadd.f32 %v1419_v23, %v1379_v13  ;;  %3917 = vmatprep.subr.bf16.mxu0 %v3916_v20  ;;  %v1970_v13 = vld [vmem:[#allocation2 + $0x4c0] sm:$0xff] }
 0x7cb   :  { %3919 = vmatpush3.bf16.msra.mxu0 %v3916_v20  ;;  %v3950_v20 = vpack.c.bf16 %v1953_v8, %v1952_v18  ;;  %v1697_v18 = vld [vmem:[#allocation2 + $0x320] sm:$0xff] }
 0x7cc   :  { %3725 = vmatprep.subr.msk.mxu0 %vm5117_vm3, %v1429_v32 }
 0x7cf   :  { %3726 = vmatpush3.msk.msra.mxu0 %vm5117_vm3, %v1429_v32  ;;  %v1954_v32 = vld [vmem:[#allocation2 + $0x3c0] sm:$0xff] }
 0x7d0   :  { %3728 = vmatmul.mubr.msk.f32.vlgmr.msra.gmra.mrb[24].mxu0 %vm5116_vm11, %v4690_v24  ;;  %3920 = vmatprep.subr.bf16.mxu0 %v4255_v15 }
 0x7d1   :  { %3734 = vmatprep.mubr.msk.f32.mxu0 %vm4256_vm2, %v4257_v16 }
 0x8a3   :  { %v3729_v30 = vpop.f32.mrb[24].mxu0 }
 0x8a4   :  { %v4748_v3 = vadd.f32 %v3729_v30, %v4404_v45  ;;  %v1499_v25 = vpop.f32.mrb[25].mxu0  ;;  %v3930_v45 = vpack.c.bf16 %v1701_v22, %v1699_v4  ;;  %v1955_v30 = vld [vmem:[#allocation2 + $0x3d0] sm:$0xff]  ;;  %v1974_v22 = vld [vmem:[#allocation2 + $0x500] sm:$0xff] }
 0x8a5   :  { %v4751_v53 = vadd.f32 %v1499_v25, %v4406_v47  ;;  %v1705_v47 = vld [vmem:[#allocation2 + $0x360] sm:$0xff]  ;;  %v3954_v25 = vpack.c.bf16 %v1955_v30, %v1954_v32  ;;  %v1957_v4 = vld [vmem:[#allocation2 + $0x3f0] sm:$0xff] }
 0x8a6   :  { %v3934_v26 = vpack.c.bf16 %v1705_v47, %v1703_v6  ;;  %v1959_v6 = vld [vmem:[#allocation2 + $0x410] sm:$0xff]  ;;  %v1976_v47 = vld [vmem:[#allocation2 + $0x520] sm:$0xff] }
 0x8a7   :  { %v3921_v63 = vpack.c.bf16 %v4748_v3, %v4751_v53 }
 0x8a9   :  { %3923 = vmatpush3.bf16.msk.msra.mxu0 %vm4358_vm6, %v3921_v63  ;;  %3927 = vmatpush3.bf16.msk.msra.mxu1 %vm4358_vm6, %v3921_v63  ;;  %v1956_v63 = vld [vmem:[#allocation2 + $0x3e0] sm:$0xff] }
 0x8aa   :  { %3929 = vmatprep.subr.bf16.mxu0 %v3928_v7  ;;  %v3956_v7 = vpack.c.bf16 %v1973_v2, %v1972_v44  ;;  %v3958_v37 = vpack.c.bf16 %v1957_v4, %v1956_v63 }
 0x8ac   :  { %3735 = vmatmul.mubr.msk.f32.vlgmr.msra.gmra.mrb[26].mxu0 %vm239_vm7, %v4422_v51  ;;  %3754 = vmatmul.mubr.msk.f32.vlgmr.msra.gmra.mrb[40].mxu1 %vm239_vm7, %v4363_v34  ;;  %v1692_v34 = vld [vmem:[#allocation2 + $0x2f8] sm:$0xff] }
 0x8ad   :  { %3737 = vmatprep.mubr.msk.f32.mxu0 %vm4256_vm2, %v4257_v16  ;;  %3756 = vmatprep.mubr.msk.f32.mxu1 %vm4256_vm2, %v4257_v16 }
 0x8ae   :  { %3931 = vmatpush1.bf16.msra.mxu0 %v3930_v45  ;;  %v3960_v45 = vpack.c.bf16 %v1975_v17, %v1974_v22 }
 0x8af   :  { %3933 = vmatprep.subr.bf16.mxu0 %v3932_v43  ;;  %v1958_v43 = vld [vmem:[#allocation2 + $0x400] sm:$0xff] }
 0x8b0   :  { %3738 = vmatmul.mubr.msk.f32.gmra.mrb[28].mxu0 %vm239_vm7, %v4440_v54  ;;  %3757 = vmatmul.mubr.msk.f32.gmra.mrb[42].mxu1 %vm239_vm7, %v4372_v35  ;;  %v1694_v35 = vld [vmem:[#allocation2 + $0x308] sm:$0xff] }
 0x8b1   :  { %3740 = vmatprep.mubr.msk.f32.mxu0 %vm4256_vm2, %v4257_v16  ;;  %3759 = vmatprep.mubr.msk.f32.mxu1 %vm4256_vm2, %v4257_v16 }
 0x8b2   :  { %3935 = vmatpush1.bf16.msra.mxu0 %v3934_v26  ;;  %v1977_v26 = vld [vmem:[#allocation2 + $0x530] sm:$0xff] }
 0x8b4   :  { %3741 = vmatmul.mubr.msk.f32.gmra.mrb[30].mxu0 %vm239_vm7, %v4458_v57  ;;  %3760 = vmatmul.mubr.msk.f32.gmra.mrb[44].mxu1 %vm239_vm7, %v4383_v38  ;;  %v3936_v38 = vpack.c.bf16 %v1694_v35, %v1692_v34  ;;  %v3962_v34 = vpack.c.bf16 %v1959_v6, %v1958_v43  ;;  %v3964_v35 = vpack.c.bf16 %v1977_v26, %v1976_v47 }
 0x8b5   :  { %3743 = vmatprep.mubr.msk.f32.mxu0 %vm4256_vm2, %v4257_v16  ;;  %3762 = vmatprep.mubr.msk.f32.mxu1 %vm4256_vm2, %v4257_v16 }
 0x8b6   :  { %3937 = vmatprep.subr.bf16.mxu0 %v3936_v38  ;;  %v1960_v38 = vld [vmem:[#allocation2 + $0x420] sm:$0xff] }
 0x8b8   :  { %3744 = vmatmul.mubr.msk.f32.gmra.mrb[32].mxu0 %vm239_vm7, %v4476_v60  ;;  %3763 = vmatmul.mubr.msk.f32.gmra.mrb[46].mxu1 %vm239_vm7, %v4388_v39  ;;  %v1967_v39 = vld [vmem:[#allocation2 + $0x490] sm:$0xff] }
 0x8b9   :  { %3746 = vmatprep.mubr.msk.f32.mxu0 %vm4256_vm2, %v4257_v16  ;;  %3765 = vmatprep.mubr.msk.f32.mxu1 %vm4256_vm2, %v4257_v16  ;;  %v3944_v11 = vpack.c.bf16 %v1967_v39, %v1966_v5  ;;  %v1961_v5 = vld [vmem:[#allocation2 + $0x430] sm:$0xff] }
 0x8ba   :  { %v3966_v39 = vpack.c.bf16 %v1961_v5, %v1960_v38  ;;  %v1962_v5 = vld [vmem:[#allocation2 + $0x440] sm:$0xff] }
 0x8bb   :  { %3945 = vmatprep.subr.bf16.mxu1 %v3944_v11  ;;  %v1693_v11 = vld [vmem:[#allocation2 + $0x300] sm:$0xff] }
 0x8bc   :  { %3747 = vmatmul.mubr.msk.f32.gmra.mrb[34].mxu0 %vm239_vm7, %v4494_v62  ;;  %3766 = vmatmul.mubr.msk.f32.gmra.mrb[48].mxu1 %vm239_vm7, %v4396_v41  ;;  %v1971_v41 = vld [vmem:[#allocation2 + $0x4d0] sm:$0xff]  ;;  %v3938_v33 = vpack.c.bf16 %v1693_v11, %v1691_v10  ;;  %v1980_v11 = vld [vmem:[#allocation2 + $0x560] sm:$0xff] }
 0x8bd   :  { %1786 = vmatprep.mubr.f32.mxu0 %v4257_v16  ;;  %3947 = vmatpush3.bf16.msra.mxu1 %v3946_v42  ;;  %v3952_v23 = vpack.c.bf16 %v1971_v41, %v1970_v13  ;;  %v3940_v42 = vpack.c.bf16 %v1698_v29, %v1696_v46  ;;  %v1981_v46 = vld [vmem:[#allocation2 + $0x570] sm:$0xff] }
 0x8be   :  { %3949 = vmatprep.subr.bf16.mxu1 %v3948_v36  ;;  %v1695_v36 = vld [vmem:[#allocation2 + $0x310] sm:$0xff]  ;;  %v3972_v29 = vpack.c.bf16 %v1981_v46, %v1980_v11 }
 0x8c1   :  { %3951 = vmatpush3.bf16.msra.mxu1 %v3950_v20 }
 0x8c2   :  { %3953 = vmatprep.subr.bf16.mxu1 %v3952_v23  ;;  %v3942_v23 = vpack.c.bf16 %v1697_v18, %v1695_v36  ;;  %v1928_v18 = vld [vmem:[#allocation2 + $0x370] ss:$8 sm:$0x3] }
 0x8c5   :  { %3955 = vmatpush3.bf16.msra.mxu1 %v3954_v25 }
 0x8c6   :  { %3957 = vmatprep.subr.bf16.mxu1 %v3956_v7 }
 0x8c9   :  { %3959 = vmatpush3.bf16.msra.mxu1 %v3958_v37 }
 0x8ca   :  { %3961 = vmatprep.subr.bf16.mxu1 %v3960_v45 }
 0x8cd   :  { %3963 = vmatpush3.bf16.msra.mxu1 %v3962_v34  ;;  %v1978_v34 = vld [vmem:[#allocation2 + $0x540] sm:$0xff] }
 0x8ce   :  { %3965 = vmatprep.subr.bf16.mxu1 %v3964_v35  ;;  %v1979_v35 = vld [vmem:[#allocation2 + $0x550] sm:$0xff] }
 0x8cf   :  { %v3968_v38 = vpack.c.bf16 %v1979_v35, %v1978_v34 }
 0x8d1   :  { %3967 = vmatpush3.bf16.msra.mxu1 %v3966_v39  ;;  %v1963_v39 = vld [vmem:[#allocation2 + $0x450] sm:$0xff] }
 0x8d2   :  { %v3970_v10 = vpack.c.bf16 %v1963_v39, %v1962_v5  ;;  %3969 = vmatprep.subr.bf16.mxu1 %v3968_v38 }
 0x8d5   :  { %3971 = vmatpush3.bf16.msra.mxu1 %v3970_v10 }
 0x8d6   :  { %3973 = vmatprep.subr.bf16.mxu1 %v3972_v29 }
 0x97f   :  { %v1577_v8 = vpop.f32.mrb[26].mxu0  ;;  %v1667_v13 = vpop.f32.mrb[40].mxu1 }
 0x980   :  { %v3736_v41 = vpop.f32.mrb[27].mxu0  ;;  %v3755_v20 = vpop.f32.mrb[41].mxu1  ;;  %3359 = vmatmul.mubr.msk.f32.vlgmr.msra.gmra.mrb[36].mxu0 %vm5115_vm1, %v1667_v13  ;;  %v1937_v13 = vrot.slane %v1928_v18, %v4538_v56 }
 0x981   :  { %1792 = vmatprep.mubr.f32.mxu0 %v4257_v16  ;;  %3939 = vmatpush1.bf16.msra.mxu0 %v3938_v33  ;;  %v1964_v33 = vld [vmem:[#allocation2 + $0x460] sm:$0xff] }
 0x982   :  { %3941 = vmatprep.subr.bf16.mxu0 %v3940_v42  ;;  %v1965_v42 = vld [vmem:[#allocation2 + $0x470] sm:$0xff] }
 0x983   :  { %v1582_v32 = vpop.f32.mrb[28].mxu0  ;;  %v1672_v30 = vpop.f32.mrb[42].mxu1  ;;  %v3974_v36 = vpack.c.bf16 %v1965_v42, %v1964_v33 }
 0x984   :  { %v3739_v44 = vpop.f32.mrb[29].mxu0  ;;  %v3758_v2 = vpop.f32.mrb[43].mxu1  ;;  %3360 = vmatmul.mubr.msk.f32.gmra.mrb[38].mxu0 %vm5115_vm1, %v1672_v30 }
 0x985   :  { %1798 = vmatprep.mubr.f32.mxu0 %v4257_v16  ;;  %3943 = vmatpush1.bf16.msra.mxu0 %v3942_v23 }
 0x986   :  { %3975 = vmatpush3.bf16.msra.mxu1 %v3974_v36 }
 0x987   :  { %v1587_v25 = vpop.f32.mrb[30].mxu0  ;;  %v1677_v7 = vpop.f32.mrb[44].mxu1  ;;  %3984 = vmatprep.subr.bf16.mxu1 %v4255_v15 }
 0x988   :  { %v3742_v63 = vpop.f32.mrb[31].mxu0  ;;  %v3761_v4 = vpop.f32.mrb[45].mxu1  ;;  %3361 = vmatmul.mubr.msk.f32.gmra.mrb[40].mxu0 %vm5115_vm1, %v1677_v7 }
 0x989   :  { %1804 = vmatprep.mubr.f32.mxu0 %v4257_v16 }
 0x98b   :  { %v1592_v22 = vpop.f32.mrb[32].mxu0  ;;  %v1682_v17 = vpop.f32.mrb[46].mxu1 }
 0x98c   :  { %v3745_v37 = vpop.f32.mrb[33].mxu0  ;;  %v3764_v45 = vpop.f32.mrb[47].mxu1  ;;  %3362 = vmatmul.mubr.msk.f32.gmra.mrb[42].mxu0 %vm5115_vm1, %v1682_v17 }
 0x98d   :  { %1810 = vmatprep.mubr.f32.mxu0 %v4257_v16 }
 0x98f   :  { %v1597_v43 = vpop.f32.mrb[34].mxu0  ;;  %v1687_v6 = vpop.f32.mrb[48].mxu1 }
 0x990   :  { %v3748_v47 = vpop.f32.mrb[35].mxu0  ;;  %v3767_v26 = vpop.f32.mrb[49].mxu1  ;;  %3363 = vmatmul.mubr.msk.f32.gmra.mrb[44].mxu0 %vm5115_vm1, %v1687_v6 }
 0x991   :  { %1896 = vmatprep.mubr.f32.mxu0 %v4257_v16 }
 0x994   :  { %3364 = vmatmul.mubr.msk.f32.vlgmr.msra.gmra.mrb[36].mxu0 %vm5115_vm1, %v1577_v8  ;;  %v1933_v8 = vrot.slane %v1928_v18, %v4535_v50 }
 0x995   :  { %1902 = vmatprep.mubr.f32.mxu0 %v4257_v16 }
 0x998   :  { %3365 = vmatmul.mubr.msk.f32.gmra.mrb[38].mxu0 %vm5115_vm1, %v1582_v32 }
 0x999   :  { %1908 = vmatprep.mubr.f32.mxu0 %v4257_v16 }
 0x99c   :  { %3366 = vmatmul.mubr.msk.f32.gmra.mrb[40].mxu0 %vm5115_vm1, %v1587_v25 }
 0x99d   :  { %1914 = vmatprep.mubr.f32.mxu0 %v4257_v16 }
 0x9a0   :  { %3367 = vmatmul.mubr.msk.f32.gmra.mrb[42].mxu0 %vm5115_vm1, %v1592_v22 }
 0x9a1   :  { %1920 = vmatprep.mubr.f32.mxu0 %v4257_v16 }
 0x9a4   :  { %3368 = vmatmul.mubr.msk.f32.gmra.mrb[44].mxu0 %vm5115_vm1, %v1597_v43 }
 0x9a5   :  { %3778 = vmatprep.mubr.msk.f32.mxu0 %vm5116_vm11, %v4659_v28 }
 0xa67   :  { %v1898_v41 = vpop.f32.mrb[36].mxu0 }
 0xa68   :  { %v1940_v20 = vadd.f32 %v1933_v8, %v1898_v41  ;;  %v1900_v23 = vpop.f32.mrb[37].mxu0 }
 0xa69   :  { %v1941_v32 = vadd.f32 %v1937_v13, %v1900_v23 }
 0xa6a   :  { %v1993_v30 = vmul.f32 0.01, %v1940_v20  ;;  %vm1983_vm9 = vcmp.gt.f32.partialorder %v1940_v20, 0.0 }
 0xa6b   :  { %v1994_v44 = vmul.f32 0.01, %v1941_v32  ;;  %v1904_v2 = vpop.f32.mrb[38].mxu0  ;;  %vm1984_vm4 = vcmp.gt.f32.partialorder %v1941_v32, 0.0 }
 0xa6c   :  { %v1942_v25 = vadd.f32 %v1933_v8, %v1904_v2  ;;  %v1906_v7 = vpop.f32.mrb[39].mxu0  ;;  %v2003_v22 = vsel %vm1983_vm9, %v1940_v20, %v1993_v30 }
 0xa6d   :  { %v1943_v63 = vadd.f32 %v1937_v13, %v1906_v7  ;;  %v2004_v4 = vsel %vm1984_vm4, %v1941_v32, %v1994_v44 }
 0xa6e   :  { %v1995_v17 = vmul.f32 0.01, %v1942_v25  ;;  %2077 = vmatprep.mubr.f32.mxu1 %v2004_v4  ;;  %vm1985_vm1 = vcmp.gt.f32.partialorder %v1942_v25, 0.0 }
 0xa6f   :  { %v1996_v37 = vmul.f32 0.01, %v1943_v63  ;;  %v1910_v45 = vpop.f32.mrb[40].mxu0  ;;  %2078 = vmatmul.mubr.f32.vlgmr.msra.gmra.mrb[50].mxu1 %v2003_v22  ;;  %vm1986_vm8 = vcmp.gt.f32.partialorder %v1943_v63, 0.0 }
 0xa70   :  { %v1944_v43 = vadd.f32 %v1933_v8, %v1910_v45  ;;  %v1912_v6 = vpop.f32.mrb[41].mxu0  ;;  %v2005_v35 = vsel %vm1985_vm1, %v1942_v25, %v1995_v17 }
 0xa71   :  { %v1945_v47 = vadd.f32 %v1937_v13, %v1912_v6  ;;  %v2006_v26 = vsel %vm1986_vm8, %v1943_v63, %v1996_v37  ;;  %v1982_v63 = vld [vmem:[#allocation2 + $0x580] ss:$0 sm:$0xff] }
 0xa72   :  { %v1997_v34 = vmul.f32 0.01, %v1944_v43  ;;  %2082 = vmatprep.mubr.f32.mxu1 %v2006_v26  ;;  %vm1987_vm4 = vcmp.gt.f32.partialorder %v1944_v43, 0.0 }
 0xa73   :  { %v1998_v38 = vmul.f32 0.01, %v1945_v47  ;;  %v1916_v5 = vpop.f32.mrb[42].mxu0  ;;  %2083 = vmatmul.mubr.f32.gmra.mrb[52].mxu1 %v2005_v35  ;;  %vm1988_vm11 = vcmp.gt.f32.partialorder %v1945_v47, 0.0 }
 0xa74   :  { %v1946_v39 = vadd.f32 %v1933_v8, %v1916_v5  ;;  %v1918_v10 = vpop.f32.mrb[43].mxu0  ;;  %v2007_v33 = vsel %vm1987_vm4, %v1944_v43, %v1997_v34 }
 0xa75   :  { %v1947_v11 = vadd.f32 %v1937_v13, %v1918_v10  ;;  %v2008_v46 = vsel %vm1988_vm11, %v1945_v47, %v1998_v38  ;;  %vm5137_vm11 = vcmask 261120  }
 0xa76   :  { %v1999_v29 = vmul.f32 0.01, %v1946_v39  ;;  %2087 = vmatprep.mubr.f32.mxu1 %v2008_v46  ;;  %vm1989_vm8 = vcmp.gt.f32.partialorder %v1946_v39, 0.0  ;;  %vm5138_vm4 = vmmov %vm5137_vm11 }
 0xa77   :  { %v2000_v42 = vmul.f32 0.01, %v1947_v11  ;;  %v1922_v36 = vpop.f32.mrb[44].mxu0  ;;  %2088 = vmatmul.mubr.f32.gmra.mrb[54].mxu1 %v2007_v33  ;;  %vm1990_vm9 = vcmp.gt.f32.partialorder %v1947_v11, 0.0 }
 0xa78   :  { %v1948_v18 = vadd.f32 %v1933_v8, %v1922_v36  ;;  %v1924_v41 = vpop.f32.mrb[45].mxu0  ;;  %v2009_v30 = vsel %vm1989_vm8, %v1946_v39, %v1999_v29 }
 0xa79   :  { %v1949_v20 = vadd.f32 %v1937_v13, %v1924_v41  ;;  %v2010_v23 = vsel %vm1990_vm9, %v1947_v11, %v2000_v42 }
 0xa7a   :  { %v2001_v32 = vmul.f32 0.01, %v1948_v18  ;;  %2092 = vmatprep.mubr.f32.mxu1 %v2010_v23  ;;  %vm1991_vm3 = vcmp.gt.f32.partialorder %v1948_v18, 0.0 }
 0xa7b   :  { %v2002_v44 = vmul.f32 0.01, %v1949_v20  ;;  %2093 = vmatmul.mubr.f32.gmra.mrb[56].mxu1 %v2009_v30  ;;  %vm1992_vm1 = vcmp.gt.f32.partialorder %v1949_v20, 0.0 }
 0xa7c   :  { %v2011_v25 = vsel %vm1991_vm3, %v1948_v18, %v2001_v32  ;;  %vm5130_vm3 = vcmask 1041408  }
 0xa7d   :  { %v2012_v2 = vsel %vm1992_vm1, %v1949_v20, %v2002_v44 }
 0xa7e   :  { %2097 = vmatprep.mubr.f32.mxu1 %v2012_v2 }
 0xa7f   :  { %2098 = vmatmul.mubr.f32.gmra.mrb[58].mxu1 %v2011_v25 }
 0xa80   :  { %3785 = vmatprep.mubr.msk.f32.mxu1 %vm4256_vm2, %v4257_v16 }
 0xb42   :  { %v3532_v7 = vpop.f32.mrb[50].mxu1 }
 0xb43   :  { %v3533_v8 = vpop.f32.mrb[51].mxu1 }
 0xb44   :  { %v3534_v4 = vadd.f32 %v3533_v8, %v3532_v7 }
 0xb46   :  { %v4822_v13 = vadd.f32 %v3534_v4, %v1982_v63  ;;  %v3535_v22 = vpop.f32.mrb[52].mxu1 }
 0xb47   :  { %v3536_v17 = vpop.f32.mrb[53].mxu1 }
 0xb48   :  { %v3537_v37 = vadd.f32 %v3536_v17, %v3535_v22  ;;  %2105 = vperm.xlu1 %4111, %v4822_v13  }
 0xb4a   :  { %v4825_v45 = vadd.f32 %v3537_v37, %v1982_v63  ;;  %v3538_v43 = vpop.f32.mrb[54].mxu1 }
 0xb4b   :  { %v3539_v6 = vpop.f32.mrb[55].mxu1 }
 0xb4c   :  { %v3540_v47 = vadd.f32 %v3539_v6, %v3538_v43  ;;  %2110 = vperm.xlu0 %4113, %v4825_v45   ;;  %4112 = vset.pattern.permute.xlu1 %v4262_v59 }
 0xb4d   :  { %2169 = vperm.xlu1 %4112, %v4822_v13  }
 0xb4e   :  { %v3541_v26 = vpop.f32.mrb[56].mxu1  ;;  %v4833_v10 = vadd.f32 %v3540_v47, %v1982_v63 }
 0xb4f   :  { %v3542_v34 = vpop.f32.mrb[57].mxu1 }
 0xb50   :  { %v3543_v35 = vadd.f32 %v3542_v34, %v3541_v26 }
 0xb51   :  { %2173 = vperm.xlu1 %4112, %v4825_v45  }
 0xb52   :  { %v4831_v38 = vadd.f32 %v3543_v35, %v1982_v63  ;;  %v3544_v5 = vpop.f32.mrb[58].mxu1 }
 0xb53   :  { %v3545_v39 = vpop.f32.mrb[59].mxu1 }
 0xb54   :  { %v3546_v11 = vadd.f32 %v3545_v39, %v3544_v5  ;;  %2120 = vperm.xlu0 %4113, %v4831_v38  }
 0xb55   :  { %4114 = vset.pattern.permute.xlu1 %v4261_v12 }
 0xb56   :  { %v4837_v46 = vadd.f32 %v3546_v11, %v1982_v63  ;;  %2115 = vperm.xlu1 %4114, %v4833_v10  }
 0xb58   :  { %2125 = vperm.xlu0 %4113, %v4837_v46  }
 0xb5a   :  { %4116 = vset.pattern.permute.xlu1 %v4262_v59 }
 0xb5b   :  { %2185 = vperm.xlu1 %4116, %v4837_v46  }
 0xb5c   :  { %4115 = vset.pattern.permute.xlu0 %v4262_v59 }
 0xb5d   :  { %2177 = vperm.xlu0 %4115, %v4833_v10  }
 0xb5f   :  { %2181 = vperm.xlu1 %4116, %v4831_v38  }
 0xbc7   :  { %v2106_v29 = vpop.permute.xlu1 %2105 }
 0xbc8   :  { %v2128_v20 = vsel %vm4409_vm12, %v2106_v29, -inf }
 0xbc9   :  { %v2133_v25 = vsel %vm239_vm7, %v2128_v20, -inf }
 0xbcb   :  { %v2111_v42 = vpop.permute.xlu0 %2110 }
 0xbcc   :  { %v2170_v33 = vpop.permute.xlu1 %2169  ;;  %v2129_v30 = vsel %vm4425_vm13, %v2111_v42, -inf }
 0xbcd   :  { %v2188_v7 = vsel %vm4409_vm12, %v2170_v33, -inf  ;;  %v2134_v17 = vsel %vm239_vm7, %v2129_v30, -inf }
 0xbce   :  { %v2193_v6 = vsel %vm239_vm7, %v2188_v7, -inf }
 0xbd0   :  { %v2174_v36 = vpop.permute.xlu1 %2173 }
 0xbd1   :  { %v2189_v5 = vsel %vm4425_vm13, %v2174_v36, -inf }
 0xbd3   :  { %v2121_v18 = vpop.permute.xlu0 %2120 }
 0xbd4   :  { %v2131_v44 = vsel %vm4461_vm15, %v2121_v18, -inf  ;;  %v2194_v18 = vsel %vm239_vm7, %v2189_v5, -inf }
 0xbd5   :  { %v2116_v41 = vpop.permute.xlu1 %2115  ;;  %v2136_v37 = vsel %vm239_vm7, %v2131_v44, -inf }
 0xbd6   :  { %v2130_v23 = vsel %vm4443_vm14, %v2116_v41, -inf }
 0xbd7   :  { %v2126_v32 = vpop.permute.xlu0 %2125  ;;  %v2135_v63 = vsel %vm239_vm7, %v2130_v23, -inf }
 0xbd8   :  { %v2132_v2 = vsel %vm4479_vm0, %v2126_v32, -inf  ;;  %v2140_v47 = vmax.f32 %v2135_v63, %v2136_v37 }
 0xbd9   :  { %v2137_v8 = vsel %vm1024_vm10, %v2132_v2, -inf }
 0xbda   :  { %v2138_v4 = vmax.f32 %v2133_v25, %v2137_v8  ;;  %v2186_v22 = vpop.permute.xlu1 %2185 }
 0xbdb   :  { %v2192_v43 = vsel %vm4479_vm0, %v2186_v22, -inf }
 0xbdc   :  { %v2139_v26 = vmax.f32 %v2138_v4, %v2134_v17  ;;  %v2197_v34 = vsel %vm1024_vm10, %v2192_v43, -inf  ;;  %v2178_v35 = vpop.permute.xlu0 %2177 }
 0xbdd   :  { %v2198_v39 = vmax.f32 %v2193_v6, %v2197_v34  ;;  %v2190_v11 = vsel %vm4443_vm14, %v2178_v35, -inf }
 0xbde   :  { %v2141_v29 = vmax.f32 %v2139_v26, %v2140_v47  ;;  %v2182_v33 = vpop.permute.xlu1 %2181  ;;  %v2195_v20 = vsel %vm239_vm7, %v2190_v11, -inf }
 0xbdf   :  { %v2191_v42 = vsel %vm4461_vm15, %v2182_v33, -inf  ;;  %v2199_v32 = vmax.f32 %v2198_v39, %v2194_v18 }
 0xbe0   :  { %v2142_v41 = vrot.slane %v2141_v29, 4  ;;  %v2196_v23 = vsel %vm239_vm7, %v2191_v42, -inf }
 0xbe1   :  { %v2200_v30 = vmax.f32 %v2195_v20, %v2196_v23 }
 0xbe2   :  { %v2143_v44 = vmax.f32 %v2141_v29, %v2142_v41 }
 0xbe3   :  { %v2201_v36 = vmax.f32 %v2199_v32, %v2200_v30 }
 0xbe4   :  { %v2144_v2 = vrot.slane %v2143_v44, 2 }
 0xbe5   :  { %v2202_v25 = vrot.slane %v2201_v36, 4 }
 0xbe6   :  { %v2145_v7 = vmax.f32 %v2143_v44, %v2144_v2 }
 0xbe7   :  { %v2203_v63 = vmax.f32 %v2201_v36, %v2202_v25 }
 0xbe8   :  { %v2146_v8 = vrot.slane %v2145_v7, 1 }
 0xbe9   :  { %v2204_v4 = vrot.slane %v2203_v63, 2 }
 0xbea   :  { %v2147_v22 = vmax.f32 %v2145_v7, %v2146_v8 }
 0xbeb   :  { %v2205_v17 = vmax.f32 %v2203_v63, %v2204_v4 }
 0xbec   :  { %v2149_v37 = vsel %vm4425_vm13, %v2147_v22, 0.0  ;;  %v2148_v43 = vsel %vm4409_vm12, %v2147_v22, 0.0  ;;  %v2151_v29 = vsel %vm4461_vm15, %v2147_v22, 0.0  ;;  %v2150_v33 = vsel %vm4443_vm14, %v2147_v22, 0.0 }
 0xbed   :  { %v2206_v6 = vrot.slane %v2205_v17, 1  ;;  %v2156_v47 = vsel %vm239_vm7, %v2149_v37, 0.0  ;;  %v2153_v26 = vsel %vm239_vm7, %v2148_v43, 0.0  ;;  %v2162_v42 = vsel %vm239_vm7, %v2151_v29, 0.0 }
 0xbee   :  { %2157 = vadd.xlane.f32.xlu0 %v2156_v47  ;;  %2154 = vadd.xlane.f32.xlu1 %v2153_v26  ;;  %v2159_v52 = vsel %vm239_vm7, %v2150_v33, 0.0  ;;  %v2152_v32 = vsel %vm4479_vm0, %v2147_v22, 0.0 }
 0xbef   :  { %v2207_v34 = vmax.f32 %v2205_v17, %v2206_v6  ;;  %v2165_v58 = vsel %vm1024_vm10, %v2152_v32, 0.0 }
 0xbf1   :  { %v2209_v35 = vsel %vm4425_vm13, %v2207_v34, 0.0  ;;  %v2208_v5 = vsel %vm4409_vm12, %v2207_v34, 0.0  ;;  %v2211_v49 = vsel %vm4461_vm15, %v2207_v34, 0.0  ;;  %v2210_v18 = vsel %vm4443_vm14, %v2207_v34, 0.0  ;;  %vm5131_vm12 = vmmov %vm5130_vm3 }
 0xbf2   :  { %v2216_v39 = vsel %vm239_vm7, %v2209_v35, 0.0  ;;  %v2213_v11 = vsel %vm239_vm7, %v2208_v5, 0.0  ;;  %v2222_v41 = vsel %vm239_vm7, %v2211_v49, 0.0  ;;  %v2219_v20 = vsel %vm239_vm7, %v2210_v18, 0.0  ;;  %vm5134_vm15 = vmmov %vm5130_vm3 }
 0xbf3   :  { %2217 = vadd.xlane.f32.xlu1 %v2216_v39  ;;  %2214 = vadd.xlane.f32.xlu0 %v2213_v11  ;;  %v2212_v23 = vsel %vm4479_vm0, %v2207_v34, 0.0  ;;  %vm5132_vm13 = vcmask 277504   ;;  %vm5135_vm0 = vmmov %vm5130_vm3 }
 0xbf4   :  { %v2225_v30 = vsel %vm1024_vm10, %v2212_v23, 0.0  ;;  %vm5133_vm14 = vmmov %vm5132_vm13 }
 0xbf5   :  { %vm5136_vm10 = vmmov %vm5132_vm13 }
 0xbf7   :  { %2163 = vadd.xlane.f32.xlu1 %v2162_v42  ;;  %2160 = vadd.xlane.f32.xlu0 %v2159_v52 }
 0xbfb   :  { %2223 = vadd.xlane.f32.xlu1 %v2222_v41  ;;  %2220 = vadd.xlane.f32.xlu0 %v2219_v20 }
 0xbff   :  { %2226 = vadd.xlane.f32.xlu1 %v2225_v30  ;;  %2166 = vadd.xlane.f32.xlu0 %v2165_v58 }
 0xc10   :  { %2235 = vrot.lane.b32.xlu1 %v4825_v45, %s4264_s19 }
 0xc14   :  { %2237 = vrot.lane.b32.xlu1 %v4833_v10, %s4264_s19 }
 0xc15   :  { %2233 = vrot.lane.b32.xlu0 %v4822_v13, %s4264_s19 }
 0xc19   :  { %2239 = vrot.lane.b32.xlu0 %v4831_v38, %s4264_s19 }
 0xc7b   :  { %v2158_v55 = vpop.xlane.xlu0 %2157  ;;  %v2155_v44 = vpop.xlane.xlu1 %2154 }
 0xc80   :  { %v2215_v36 = vpop.xlane.xlu0 %2214  ;;  %v2218_v61 = vpop.xlane.xlu1 %2217 }
 0xc81   :  { %v2228_v2 = vsel %vm1116_vm5, %v2155_v44, %v2215_v36  ;;  %v2229_v25 = vsel %vm1116_vm5, %v2158_v55, %v2218_v61 }
 0xc82   :  { %2258 = vrot.lane.b32.xlu1 %v2228_v2, %s4265_s20  ;;  %2260 = vrot.lane.b32.xlu0 %v2229_v25, %s4265_s20 }
 0xc84   :  { %v2161_v7 = vpop.xlane.xlu0 %2160  ;;  %v2164_v63 = vpop.xlane.xlu1 %2163 }
 0xc88   :  { %v2221_v8 = vpop.xlane.xlu0 %2220  ;;  %v2224_v4 = vpop.xlane.xlu1 %2223 }
 0xc89   :  { %v2230_v22 = vsel %vm1116_vm5, %v2161_v7, %v2221_v8  ;;  %v2231_v17 = vsel %vm1116_vm5, %v2164_v63, %v2224_v4 }
 0xc8a   :  { %2262 = vrot.lane.b32.xlu1 %v2230_v22, %s4265_s20  ;;  %2264 = vrot.lane.b32.xlu0 %v2231_v17, %s4265_s20 }
 0xc8c   :  { %v2167_v37 = vpop.xlane.xlu0 %2166  ;;  %v2227_v43 = vpop.xlane.xlu1 %2226 }
 0xc8d   :  { %v2232_v6 = vsel %vm1116_vm5, %v2167_v37, %v2227_v43 }
 0xc8e   :  { %2241 = vrot.lane.b32.xlu1 %v4837_v46, %s4264_s19  ;;  %2266 = vrot.lane.b32.xlu0 %v2232_v6, %s4265_s20 }
 0xc90   :  { %v2234_v47 = vpop.permute.xlu0 %2233  ;;  %v2236_v26 = vpop.permute.xlu1 %2235 }
 0xc91   :  { %v2248_v5 = vadd.f32 %v2234_v47, %v4663_v1  ;;  %v2249_v39 = vadd.f32 %v2236_v26, %v4667_v9 }
 0xc94   :  { %v2240_v34 = vpop.permute.xlu0 %2239  ;;  %v2238_v35 = vpop.permute.xlu1 %2237 }
 0xc95   :  { %v2251_v18 = vadd.f32 %v2240_v34, %v4675_v40  ;;  %v2250_v41 = vadd.f32 %v2238_v35, %v4671_v0 }
 0xcf4   :  { %v2261_v11 = vpop.permute.xlu0 %2260  ;;  %v2259_v29 = vpop.permute.xlu1 %2258 }
 0xcf5   :  { %v2274_v33 = vsub.f32 %v2249_v39, %v2261_v11  ;;  %v2273_v42 = vsub.f32 %v2248_v5, %v2259_v29  ;;  %v4267_v39 = vmov 3  }
 0xcf6   :  { %4127 = vset.pattern.permute.xlu1 %v4267_v39  ;;  %4128 = vset.pattern.permute.xlu0 %v4267_v39  ;;  %v4200_v39 = vld [vmem:[%s5111_s1 + $0x8] sm:$0xff] }
 0xcf7   :  { %v2280_v52 = vmul.f32 1.442695, %v2274_v33  ;;  %v2278_v49 = vmul.f32 1.442695, %v2273_v42 }
 0xcf9   :  { %4171 = vpow2.f32 %v2280_v52 }
 0xcfa   :  { %4173 = vpow2.f32 %v2278_v49 }
 0xcfc   :  { %v2265_v20 = vpop.permute.xlu0 %2264  ;;  %v2263_v23 = vpop.permute.xlu1 %2262 }
 0xcfd   :  { %v2276_v32 = vsub.f32 %v2251_v18, %v2265_v20  ;;  %v2275_v30 = vsub.f32 %v2250_v41, %v2263_v23 }
 0xcff   :  { %v2284_v58 = vmul.f32 1.442695, %v2276_v32  ;;  %v2282_v1 = vmul.f32 1.442695, %v2275_v30 }
 0xd00   :  { %v2242_v55 = vpop.permute.xlu1 %2241  ;;  %v2267_v44 = vpop.permute.xlu0 %2266 }
 0xd01   :  { %4175 = vpow2.f32 %v2284_v58  ;;  %v2252_v9 = vadd.f32 %v2242_v55, %v4682_v14 }
 0xd02   :  { %4177 = vpow2.f32 %v2282_v1 }
 0xd03   :  { %v4926_v36 = vpop.eup %4171  ;;  %v2277_v61 = vsub.f32 %v2252_v9, %v2267_v44 }
 0xd04   :  { %v4928_v2 = vpop.eup %4173  ;;  %v2385_v44 = vmul.f32 0.5, %v4926_v36 }
 0xd05   :  { %v2286_v40 = vmul.f32 1.442695, %v2277_v61  ;;  %v4117_v0 = vpack.i.bf16 %v4926_v36, %v4928_v2  ;;  %v2384_v58 = vmul.f32 0.5, %v4928_v2  ;;  %v4268_v36 = vmov 2  }
 0xd07   :  { %4179 = vpow2.f32 %v2286_v40  ;;  %4118 = vrot.lane.b32.xlu1 %v4117_v0, %s4266_s21 }
 0xd0b   :  { %v4932_v25 = vpop.eup %4175 }
 0xd0c   :  { %v4934_v7 = vpop.eup %4177 }
 0xd0d   :  { %v4122_v14 = vpack.i.bf16 %v4932_v25, %v4934_v7 }
 0xd0f   :  { %4123 = vrot.lane.b32.xlu0 %v4122_v14, %s4266_s21  ;;  %v2386_v14 = vmul.f32 0.5, %v4934_v7 }
 0xd11   :  { %v4938_v63 = vpop.eup %4179 }
 0xd12   :  { %2301 = vrot.lane.b32.xlu1 %v4938_v63, %s4266_s21 }
 0xd79   :  { %v4119_v8 = vpop.permute.xlu1 %4118 }
 0xd7a   :  { %v4121_v4 = vunpack.i.h.bf16 %v4119_v8  ;;  %v4120_v22 = vunpack.i.l.bf16 %v4119_v8 }
 0xd7c   :  { %v3976_v17 = vpack.c.bf16 %v4121_v4, %v4120_v22  ;;  %v2387_v22 = vmul.f32 0.5, %v4932_v25 }
 0xd7e   :  { %3977 = vmatprep.subr.bf16.mxu0 %v3976_v17 }
 0xd7f   :  { %3979 = vmatpush3.bf16.msra.mxu0 %v3976_v17 }
 0xd81   :  { %v4124_v37 = vpop.permute.xlu0 %4123 }
 0xd82   :  { %v4126_v43 = vunpack.i.h.bf16 %v4124_v37  ;;  %v4125_v6 = vunpack.i.l.bf16 %v4124_v37  ;;  %v2388_v37 = vmul.f32 0.5, %v4938_v63 }
 0xd84   :  { %v3980_v47 = vpack.c.bf16 %v4126_v43, %v4125_v6  ;;  %v2302_v26 = vpop.permute.xlu1 %2301 }
 0xd86   :  { %3981 = vmatprep.subr.bf16.mxu0 %v3980_v47 }
 0xd87   :  { %3983 = vmatpush3.bf16.msra.mxu0 %v3980_v47 }
 0xd88   :  { %3776 = vmatprep.subr.msk.mxu0 %vm5130_vm3, %v2302_v26 }
 0xd8b   :  { %3777 = vmatpush3.msk.msra.mxu0 %vm5131_vm12, %v2302_v26 }
 0xd8c   :  { %3779 = vmatmul.mubr.msk.f32.vlgmr.msra.gmra.mrb[46].mxu0 %vm5132_vm13, %v4690_v24  ;;  %vm2916_vm13 = vcmask 23552  }
 0xd8d   :  { %3810 = vmatprep.mubr.msk.f32.mxu0 %vm5133_vm14, %v4659_v28  ;;  %vm2918_vm14 = vcmask 17408  }
 0xe5f   :  { %v3780_v34 = vpop.f32.mrb[46].mxu0 }
 0xe60   :  { %v2375_v35 = vpop.f32.mrb[47].mxu0 }
 0xe61   :  { %v3985_v5 = vpack.c.bf16 %v3780_v34, %v2375_v35 }
 0xe63   :  { %3987 = vmatpush3.bf16.msk.msra.mxu1 %vm4358_vm6, %v3985_v5 }
 0xe66   :  { %3786 = vmatmul.mubr.msk.f32.vlgmr.msra.gmra.mrb[60].mxu1 %vm239_vm7, %v4422_v51 }
 0xe67   :  { %3788 = vmatprep.mubr.msk.f32.mxu1 %vm4256_vm2, %v4257_v16 }
 0xe6a   :  { %3789 = vmatmul.mubr.msk.f32.gmra.mrb[62].mxu1 %vm239_vm7, %v4440_v54 }
 0xe6b   :  { %3791 = vmatprep.mubr.msk.f32.mxu1 %vm4256_vm2, %v4257_v16 }
 0xe6e   :  { %3792 = vmatmul.mubr.msk.f32.gmra.mrb[64].mxu1 %vm239_vm7, %v4458_v57 }
 0xe6f   :  { %3794 = vmatprep.mubr.msk.f32.mxu1 %vm4256_vm2, %v4257_v16 }
 0xe72   :  { %3795 = vmatmul.mubr.msk.f32.gmra.mrb[66].mxu1 %vm239_vm7, %v4476_v60 }
 0xe73   :  { %3797 = vmatprep.mubr.msk.f32.mxu1 %vm4256_vm2, %v4257_v16 }
 0xe76   :  { %3798 = vmatmul.mubr.msk.f32.gmra.mrb[68].mxu1 %vm239_vm7, %v4494_v62 }
 0xf39   :  { %v2458_v51 = vpop.f32.mrb[60].mxu1 }
 0xf3a   :  { %v2459_v54 = vadd.f32 1e-10, %v2458_v51  ;;  %v3787_v28 = vpop.f32.mrb[61].mxu1 }
 0xf3b   :  { %v4199_v28 = vld [vmem:[%s5111_s1] sm:$0xff]  ;;  %s4270_s1 = smov 68  }
 0xf3c   :  { %2487 = vrot.lane.b32.xlu0 %v2459_v54, %s4265_s20 }
 0xf3d   :  { %v2463_v57 = vpop.f32.mrb[62].mxu1 }
 0xf3e   :  { %v2464_v11 = vadd.f32 1e-10, %v2463_v57  ;;  %v3790_v29 = vpop.f32.mrb[63].mxu1 }
 0xf40   :  { %2489 = vrot.lane.b32.xlu1 %v2464_v11, %s4265_s20 }
 0xf41   :  { %v2468_v60 = vpop.f32.mrb[64].mxu1 }
 0xf42   :  { %v2469_v33 = vadd.f32 1e-10, %v2468_v60  ;;  %v3793_v42 = vpop.f32.mrb[65].mxu1 }
 0xf44   :  { %2491 = vrot.lane.b32.xlu0 %v2469_v33, %s4265_s20 }
 0xf45   :  { %v2473_v52 = vpop.f32.mrb[66].mxu1 }
 0xf46   :  { %v2474_v62 = vadd.f32 1e-10, %v2473_v52  ;;  %v3796_v49 = vpop.f32.mrb[67].mxu1 }
 0xf48   :  { %2493 = vrot.lane.b32.xlu1 %v2474_v62, %s4265_s20 }
 0xf49   :  { %v2478_v18 = vpop.f32.mrb[68].mxu1 }
 0xf4a   :  { %v2479_v41 = vadd.f32 1e-10, %v2478_v18  ;;  %v3799_v20 = vpop.f32.mrb[69].mxu1 }
 0xf4c   :  { %2495 = vrot.lane.b32.xlu0 %v2479_v41, %s4265_s20 }
 0xfae   :  { %v2488_v23 = vpop.permute.xlu0 %2487 }
 0xfaf   :  { %4181 = vrcp.f32 %v2488_v23 }
 0xfb2   :  { %v2490_v32 = vpop.permute.xlu1 %2489 }
 0xfb3   :  { %4183 = vrcp.f32 %v2490_v32 }
 0xfb6   :  { %v2492_v30 = vpop.permute.xlu0 %2491 }
 0xfb7   :  { %4185 = vrcp.f32 %v2492_v30 }
 0xfb9   :  { %v4182_v1 = vpop.eup %4181 }
 0xfba   :  { %v2494_v55 = vpop.permute.xlu1 %2493  ;;  %v2503_v9 = vmul.f32 %v4182_v1, %v2384_v58 }
 0xfbb   :  { %4187 = vrcp.f32 %v2494_v55 }
 0xfbc   :  { %2543 = vperm.xlu1 %4127, %v2503_v9  }
 0xfbd   :  { %v4184_v61 = vpop.eup %4183 }
 0xfbe   :  { %v2496_v40 = vpop.permute.xlu0 %2495  ;;  %v2505_v0 = vmul.f32 %v4184_v61, %v2385_v44  ;;  %v2671_v44 = vld [vmem:[#allocation2 + $0x598] sm:$0xff] }
 0xfbf   :  { %4189 = vrcp.f32 %v2496_v40  ;;  %v2670_v40 = vld [vmem:[#allocation2 + $0x590] sm:$0xff] }
 0xfc0   :  { %2547 = vperm.xlu0 %4128, %v2505_v0  }
 0xfc1   :  { %v4186_v8 = vpop.eup %4185 }
 0xfc2   :  { %v2507_v4 = vmul.f32 %v4186_v8, %v2386_v14 }
 0xfc4   :  { %2551 = vperm.xlu1 %4127, %v2507_v4  }
 0xfc5   :  { %v4188_v2 = vpop.eup %4187 }
 0xfc6   :  { %v2509_v17 = vmul.f32 %v4188_v2, %v2387_v22  ;;  %v2676_v22 = vld [vmem:[#allocation2 + $0x5c0] sm:$0xff] }
 0xfc8   :  { %2555 = vperm.xlu1 %4127, %v2509_v17  }
 0xfc9   :  { %v4190_v43 = vpop.eup %4189 }
 0xfca   :  { %v2511_v6 = vmul.f32 %v4190_v43, %v2388_v37  ;;  %v2801_v37 = vld [vmem:[#allocation2 + $0x6f0] sm:$0xff]  ;;  %v2784_v43 = vld [vmem:[#allocation2 + $0x5e0] sm:$0xff] }
 0xfcc   :  { %4129 = vset.pattern.permute.xlu1 %v4268_v36  ;;  %2559 = vperm.xlu0 %4128, %v2511_v6  }
 0xfcd   :  { %2514 = vperm.xlu1 %4129, %v2503_v9  }
 0xfd0   :  { %4130 = vset.pattern.permute.xlu0 %v4268_v36  ;;  %v2785_v36 = vld [vmem:[#allocation2 + $0x5f0] sm:$0xff] }
 0xfd1   :  { %2524 = vperm.xlu1 %4129, %v2507_v4   ;;  %2519 = vperm.xlu0 %4130, %v2505_v0   ;;  %v2672_v0 = vld [vmem:[#allocation2 + $0x5a0] sm:$0xff]  ;;  %v2674_v4 = vld [vmem:[#allocation2 + $0x5b0] sm:$0xff] }
 0xfd2   :  { %v4002_v2 = vpack.c.bf16 %v2676_v22, %v2674_v4  ;;  %v2799_v4 = vld [vmem:[#allocation2 + $0x6d0] sm:$0xff] }
 0xfd5   :  { %2529 = vperm.xlu1 %4129, %v2509_v17   ;;  %2534 = vperm.xlu0 %4130, %v2511_v6   ;;  %v2800_v17 = vld [vmem:[#allocation2 + $0x6e0] sm:$0xff] }
 0xfd6   :  { %v4004_v6 = vpack.c.bf16 %v2801_v37, %v2800_v17 }
 0xfd8   :  { %4005 = vmatprep.subr.bf16.mxu1 %v4004_v6 }
0x103b   :  { %v2544_v7 = vpop.permute.xlu1 %2543 }
0x103c   :  { %v2562_v47 = vmul.f32 %v2544_v7, %v4822_v13  ;;  %v2803_v7 = vld [vmem:[#allocation2 + $0x710] sm:$0xff] }
0x103e   :  { %2572 = vrot.lane.b32.xlu0 %v2562_v47, %s4259_s11  ;;  %v4006_v47 = vpack.c.bf16 %v2785_v36, %v2784_v43 }
0x103f   :  { %v2548_v25 = vpop.permute.xlu0 %2547 }
0x1040   :  { %v2563_v26 = vmul.f32 %v2548_v25, %v4825_v45  ;;  %4007 = vmatpush3.bf16.msra.mxu1 %v4006_v47 }
0x1042   :  { %2574 = vrot.lane.b32.xlu1 %v2563_v26, %s4259_s11  ;;  %v2786_v26 = vld [vmem:[#allocation2 + $0x600] sm:$0xff] }
0x1043   :  { %v2552_v63 = vpop.permute.xlu1 %2551 }
0x1044   :  { %v2564_v34 = vmul.f32 %v2552_v63, %v4833_v10  ;;  %v2787_v63 = vld [vmem:[#allocation2 + $0x610] sm:$0xff] }
0x1046   :  { %2576 = vrot.lane.b32.xlu1 %v2564_v34, %s4259_s11  ;;  %v2804_v34 = vld [vmem:[#allocation2 + $0x720] sm:$0xff] }
0x1047   :  { %v2556_v35 = vpop.permute.xlu1 %2555 }
0x1048   :  { %v2565_v5 = vmul.f32 %v2556_v35, %v4831_v38  ;;  %v2805_v35 = vld [vmem:[#allocation2 + $0x730] sm:$0xff] }
0x104a   :  { %2578 = vrot.lane.b32.xlu0 %v2565_v5, %s4259_s11  ;;  %v4010_v5 = vpack.c.bf16 %v2787_v63, %v2786_v26 }
0x104b   :  { %v2560_v51 = vpop.permute.xlu0 %2559 }
0x104c   :  { %v2566_v54 = vmul.f32 %v2560_v51, %v4837_v46  ;;  %v2515_v57 = vpop.permute.xlu1 %2514  ;;  %v4012_v51 = vpack.c.bf16 %v2805_v35, %v2804_v34 }
0x104d   :  { %v2537_v52 = vmul.f32 %v2515_v57, %v4822_v13  ;;  %v2807_v57 = vld [vmem:[#allocation2 + $0x750] sm:$0xff] }
0x104e   :  { %208 = vperm.xlu0 %4130, %v4199_v28   ;;  %2580 = vrot.lane.b32.xlu1 %v2566_v54, %s4259_s11  ;;  %v2788_v54 = vld [vmem:[#allocation2 + $0x620] sm:$0xff]  ;;  %v2789_v28 = vld [vmem:[#allocation2 + $0x630] sm:$0xff] }
0x1050   :  { %v2520_v11 = vpop.permute.xlu0 %2519  ;;  %v2525_v29 = vpop.permute.xlu1 %2524 }
0x1051   :  { %v2538_v62 = vmul.f32 %v2520_v11, %v4825_v45  ;;  %v2539_v32 = vmul.f32 %v2525_v29, %v4833_v10  ;;  %v2673_v45 = vld [vmem:[#allocation2 + $0x5a8] sm:$0xff]  ;;  %v3998_v10 = vpack.c.bf16 %v2672_v0, %v2670_v40  ;;  %v4014_v11 = vpack.c.bf16 %v2789_v28, %v2788_v54  ;;  %v2796_v0 = vld [vmem:[#allocation2 + $0x6a0] sm:$0xff] }
0x1052   :  { %211 = vperm.xlu1 %4129, %v4200_v39   ;;  %4131 = vset.pattern.permute.xlu0 %v4261_v12  ;;  %v3996_v14 = vpack.c.bf16 %v2673_v45, %v2671_v44  ;;  %v2806_v39 = vld [vmem:[#allocation2 + $0x740] sm:$0xff] }
0x1053   :  { %v4016_v29 = vpack.c.bf16 %v2807_v57, %v2806_v39  ;;  %v2812_v45 = vld [vmem:[#allocation2 + $0x7a0] sm:$0xff] }
0x1054   :  { %v2535_v60 = vpop.permute.xlu0 %2534  ;;  %v2530_v33 = vpop.permute.xlu1 %2529  ;;  %v2816_v39 = vld [vmem:[#allocation2 + $0x7e0] ss:$0 sm:$0xff] }
0x1055   :  { %v2541_v55 = vmul.f32 %v2535_v60, %v4837_v46  ;;  %v2677_v46 = vld [vmem:[#allocation2 + $0x5c8] sm:$0xff]  ;;  %v2790_v60 = vld [vmem:[#allocation2 + $0x640] sm:$0xff] }
0x1056   :  { %4132 = vset.pattern.permute.xlu1 %v4261_v12  ;;  %v2540_v12 = vmul.f32 %v2530_v33, %v4831_v38  ;;  %v2675_v38 = vld [vmem:[#allocation2 + $0x5b8] sm:$0xff]  ;;  %v2791_v33 = vld [vmem:[#allocation2 + $0x650] sm:$0xff] }
0x1057   :  { %v4000_v8 = vpack.c.bf16 %v2677_v46, %v2675_v38  ;;  %v2815_v38 = vld [vmem:[#allocation2 + $0x7d0] sm:$0xff] }
0x10b0   :  { %v2573_v42 = vpop.permute.xlu0 %2572 }
0x10b1   :  { %v2587_v18 = vadd.f32 %v2573_v42, %v2537_v52  ;;  %v2808_v42 = vld [vmem:[#allocation2 + $0x760] sm:$0xff]  ;;  %v2809_v52 = vld [vmem:[#allocation2 + $0x770] sm:$0xff] }
0x10b4   :  { %v2575_v49 = vpop.permute.xlu1 %2574 }
0x10b5   :  { %v2588_v41 = vadd.f32 %v2575_v49, %v2538_v62  ;;  %v4018_v62 = vpack.c.bf16 %v2791_v33, %v2790_v60  ;;  %v4020_v49 = vpack.c.bf16 %v2809_v52, %v2808_v42 }
0x10b7   :  { %v3988_v20 = vpack.c.bf16 %v2588_v41, %v2587_v18  ;;  %v2792_v18 = vld [vmem:[#allocation2 + $0x660] sm:$0xff]  ;;  %v2793_v41 = vld [vmem:[#allocation2 + $0x670] sm:$0xff] }
0x10b8   :  { %v2577_v23 = vpop.permute.xlu1 %2576 }
0x10b9   :  { %3989 = vmatprep.subr.bf16.mxu0 %v3988_v20  ;;  %v2589_v58 = vadd.f32 %v2577_v23, %v2539_v32  ;;  %v2811_v23 = vld [vmem:[#allocation2 + $0x790] sm:$0xff]  ;;  %v4022_v32 = vpack.c.bf16 %v2793_v41, %v2792_v18 }
0x10ba   :  { %3991 = vmatpush3.bf16.msra.mxu0 %v3988_v20  ;;  %v2810_v20 = vld [vmem:[#allocation2 + $0x780] sm:$0xff] }
0x10bc   :  { %v2579_v30 = vpop.permute.xlu0 %2578 }
0x10bd   :  { %v2590_v1 = vadd.f32 %v2579_v30, %v2540_v12  ;;  %v4024_v12 = vpack.c.bf16 %v2811_v23, %v2810_v20  ;;  %v2794_v30 = vld [vmem:[#allocation2 + $0x680] sm:$0xff]  ;;  %v4273_v20 = vmov 5  }
0x10bf   :  { %v3992_v9 = vpack.c.bf16 %v2590_v1, %v2589_v58  ;;  %v2795_v58 = vld [vmem:[#allocation2 + $0x690] sm:$0xff] }
0x10c0   :  { %v2581_v13 = vpop.permute.xlu1 %2580  ;;  %v4026_v1 = vpack.c.bf16 %v2795_v58, %v2794_v30 }
0x10c1   :  { %v2591_v61 = vadd.f32 %v2581_v13, %v2541_v55  ;;  %3993 = vmatprep.subr.bf16.mxu0 %v3992_v9 }
0x10c2   :  { %3995 = vmatpush3.bf16.msra.mxu0 %v3992_v9 }
0x10c3   :  { %3808 = vmatprep.subr.msk.mxu0 %vm5134_vm15, %v2591_v61 }
0x10c6   :  { %3809 = vmatpush3.msk.msra.mxu0 %vm5135_vm0, %v2591_v61  ;;  %v2813_v61 = vld [vmem:[#allocation2 + $0x7b0] sm:$0xff]  ;;  %vm3076_vm0 = vcmask 1042432  }
0x10c7   :  { %3811 = vmatmul.mubr.msk.f32.vlgmr.msra.gmra.mrb[48].mxu0 %vm5136_vm10, %v4690_v24  ;;  %3997 = vmatprep.subr.bf16.mxu0 %v3996_v14  ;;  %v2802_v24 = vld [vmem:[#allocation2 + $0x700] sm:$0xff]  ;;  %v4028_v40 = vpack.c.bf16 %v2813_v61, %v2812_v45  ;;  %v2797_v14 = vld [vmem:[#allocation2 + $0x6b0] sm:$0xff] }
0x10c8   :  { %3999 = vmatpush1.bf16.msra.mxu0 %v3998_v10  ;;  %2761 = vmatprep.mubr.f32.mxu0 %v4257_v16  ;;  %v4008_v25 = vpack.c.bf16 %v2803_v7, %v2802_v24  ;;  %v4030_v10 = vpack.c.bf16 %v2797_v14, %v2796_v0 }
0x10c9   :  { %4001 = vmatprep.subr.bf16.mxu0 %v4000_v8  ;;  %v2798_v8 = vld [vmem:[#allocation2 + $0x6c0] sm:$0xff] }
0x10ca   :  { %4009 = vmatprep.subr.bf16.mxu1 %v4008_v25  ;;  %v4034_v22 = vpack.c.bf16 %v2799_v4, %v2798_v8 }
0x10cb   :  { %4011 = vmatpush3.bf16.msra.mxu1 %v4010_v5 }
0x10cc   :  { %4003 = vmatpush1.bf16.msra.mxu0 %v4002_v2  ;;  %4013 = vmatprep.subr.bf16.mxu1 %v4012_v51 }
0x10cd   :  { %4036 = vmatprep.subr.bf16.mxu0 %v4255_v15 }
0x10cf   :  { %4015 = vmatpush3.bf16.msra.mxu1 %v4014_v11 }
0x10d0   :  { %4017 = vmatprep.subr.bf16.mxu1 %v4016_v29 }
0x10d1   :  { %v212_v18 = vpop.permute.xlu1 %211 }
0x10d2   :  { %vm5033_vm15 = vcmp.eq.s32.totalorder %v4354_v27, %v212_v18 }
0x10d3   :  { %4019 = vmatpush3.bf16.msra.mxu1 %v4018_v62  ;;  %v4269_v62 = vmov 32  }
0x10d4   :  { %4021 = vmatprep.subr.bf16.mxu1 %v4020_v49  ;;  %v209_v49 = vpop.permute.xlu0 %208 }
0x10d5   :  { %vm5026_vm12 = vcmp.eq.s32.totalorder %v4354_v27, %v209_v49 }
0x10d7   :  { %4023 = vmatpush3.bf16.msra.mxu1 %v4022_v32 }
0x10d8   :  { %4025 = vmatprep.subr.bf16.mxu1 %v4024_v12 }
0x10db   :  { %4027 = vmatpush3.bf16.msra.mxu1 %v4026_v1 }
0x10dc   :  { %4029 = vmatprep.subr.bf16.mxu1 %v4028_v40 }
0x10df   :  { %4031 = vmatpush3.bf16.msra.mxu1 %v4030_v10 }
0x119a   :  { %v3812_v55 = vpop.f32.mrb[48].mxu0 }
0x119b   :  { %v2661_v9 = vpop.f32.mrb[49].mxu0  ;;  %v2667_v44 = vadd.f32 %v3812_v55, %v4748_v3  ;;  %v2679_v3 = vld [vmem:[#allocation2 + $0x5d0] ss:$8 sm:$0x3] }
0x119c   :  { %v2662_v13 = vadd.f32 %v2661_v9, %v4751_v53  ;;  %v2814_v53 = vld [vmem:[#allocation2 + $0x7c0] sm:$0xff]  ;;  %v2684_v2 = vrot.slane %v2679_v3, %v4535_v50  ;;  %v2688_v17 = vrot.slane %v2679_v3, %v4538_v56 }
0x119d   :  { %v4032_v46 = vpack.c.bf16 %v2815_v38, %v2814_v53 }
0x119e   :  { %3381 = vmatmul.mubr.msk.f32.vlgmr.msra.gmra.mrb[50].mxu0 %vm5137_vm11, %v2662_v13 }
0x119f   :  { %2767 = vmatprep.mubr.f32.mxu0 %v4257_v16  ;;  %4033 = vmatprep.subr.bf16.mxu1 %v4032_v46 }
0x11a0   :  { %4035 = vmatpush3.bf16.msra.mxu1 %v4034_v22 }
0x11a2   :  { %3382 = vmatmul.mubr.msk.f32.gmra.mrb[52].mxu0 %vm5138_vm4, %v2667_v44 }
0x11a3   :  { %3817 = vmatprep.mubr.msk.f32.mxu0 %vm4256_vm2, %v4257_v16 }
0x1271   :  { %v2763_v37 = vpop.f32.mrb[50].mxu0 }
0x1272   :  { %v2764_v43 = vadd.f32 %v2763_v37, %v2684_v2  ;;  %v2765_v6 = vpop.f32.mrb[51].mxu0 }
0x1273   :  { %v2766_v36 = vadd.f32 %v2765_v6, %v2688_v17 }
0x1274   :  { %v2821_v24 = vmul.f32 0.01, %v2764_v43  ;;  %vm2817_vm9 = vcmp.gt.f32.partialorder %v2764_v43, 0.0 }
0x1275   :  { %v2822_v7 = vmul.f32 0.01, %v2766_v36  ;;  %v2769_v47 = vpop.f32.mrb[52].mxu0  ;;  %vm2818_vm8 = vcmp.gt.f32.partialorder %v2766_v36, 0.0 }
0x1276   :  { %v2770_v25 = vadd.f32 %v2769_v47, %v2684_v2  ;;  %v2771_v26 = vpop.f32.mrb[53].mxu0  ;;  %v2825_v35 = vsel %vm2817_vm9, %v2764_v43, %v2821_v24 }
0x1277   :  { %v2772_v63 = vadd.f32 %v2771_v26, %v2688_v17  ;;  %v2826_v34 = vsel %vm2818_vm8, %v2766_v36, %v2822_v7 }
0x1278   :  { %v2823_v5 = vmul.f32 0.01, %v2770_v25  ;;  %2893 = vmatprep.mubr.f32.mxu1 %v2826_v34  ;;  %vm2819_vm3 = vcmp.gt.f32.partialorder %v2770_v25, 0.0 }
0x1279   :  { %v2824_v51 = vmul.f32 0.01, %v2772_v63  ;;  %2894 = vmatmul.mubr.f32.vlgmr.msra.gmra.mrb[70].mxu1 %v2825_v35  ;;  %vm2820_vm1 = vcmp.gt.f32.partialorder %v2772_v63, 0.0 }
0x127a   :  { %v2827_v54 = vsel %vm2819_vm3, %v2770_v25, %v2823_v5 }
0x127b   :  { %v2828_v50 = vsel %vm2820_vm1, %v2772_v63, %v2824_v51 }
0x127c   :  { %2898 = vmatprep.mubr.f32.mxu1 %v2828_v50  ;;  %v4201_v50 = vld [vmem:[#allocation2 + $0x7f0] ss:$0 sm:$0xff] }
0x127d   :  { %2899 = vmatmul.mubr.f32.gmra.mrb[72].mxu1 %v2827_v54 }
0x134c   :  { %v3600_v28 = vpop.f32.mrb[70].mxu1 }
0x134d   :  { %v3601_v57 = vpop.f32.mrb[71].mxu1 }
0x134e   :  { %v3602_v11 = vadd.f32 %v3601_v57, %v3600_v28 }
0x1350   :  { %v5015_v29 = vadd.f32 %v3602_v11, %v2816_v39  ;;  %v3603_v60 = vpop.f32.mrb[72].mxu1 }
0x1351   :  { %v3604_v33 = vpop.f32.mrb[73].mxu1 }
0x1352   :  { %v3605_v42 = vadd.f32 %v3604_v33, %v3603_v60  ;;  %2906 = vperm.xlu0 %4131, %v5015_v29  }
0x1354   :  { %v5018_v52 = vadd.f32 %v3605_v42, %v2816_v39 }
0x1356   :  { %2911 = vperm.xlu1 %4132, %v5018_v52   ;;  %4134 = vset.pattern.permute.xlu0 %v4262_v59 }
0x1357   :  { %2940 = vperm.xlu0 %4134, %v5018_v52  }
0x135a   :  { %4133 = vset.pattern.permute.xlu1 %v4262_v59 }
0x135b   :  { %2936 = vperm.xlu1 %4133, %v5015_v29   ;;  %4136 = vset.pattern.permute.xlu0 %v4269_v62 }
0x135f   :  { %4135 = vset.pattern.permute.xlu1 %v4269_v62 }
0x13d1   :  { %v2907_v41 = vpop.permute.xlu0 %2906 }
0x13d2   :  { %v2914_v23 = vsel %vm5026_vm12, %v2907_v41, -inf }
0x13d3   :  { %v2917_v58 = vsel %vm2916_vm13, %v2914_v23, -inf }
0x13d5   :  { %v2912_v32 = vpop.permute.xlu1 %2911 }
0x13d6   :  { %v2915_v12 = vsel %vm5033_vm15, %v2912_v32, -inf  ;;  %v2941_v30 = vpop.permute.xlu0 %2940 }
0x13d7   :  { %v2919_v1 = vsel %vm2918_vm14, %v2915_v12, -inf  ;;  %v2944_v9 = vsel %vm5033_vm15, %v2941_v30, -inf  ;;  %v4202_v12 = vld [vmem:[%s5112_s2] sm:$0xff]  ;;  %s4275_s2 = smov [#allocation5]  }
0x13d8   :  { %v2920_v55 = vmax.f32 %v2917_v58, %v2919_v1  ;;  %v2946_v61 = vsel %vm2918_vm14, %v2944_v9, -inf  ;;  %v222_v30 = vrot.slane %v4202_v12, %v4538_v56  ;;  %s3280_s30 = sshll.u32 %s4275_s2, 4  ;;  %s3281_s30 = int_to_ptr.vmem [resolvable:$true] %s3280_s30 }
0x13d9   :  { %s4225_s3 = scalar_lea.vmem %s3281_s30, 64  ;;  %p4230_p9 = scmp.lt.s32.totalorder %s3281_s30, %s3281_s30 }
0x13da   :  { %v2921_v13 = vrot.slane %v2920_v55, 4  ;;  %v2937_v44 = vpop.permute.xlu1 %2936  ;;  %p4226_p8 = scmp.ne.s32.totalorder %s3281_s30, %s4225_s3  ;;  %p4231_p10 = scmp.lt.s32.totalorder %s4225_s3, %s4225_s3 }
0x13db   :  { %v2943_v27 = vsel %vm5026_vm12, %v2937_v44, -inf  ;;  %v3304_v44 = vsel %vm5026_vm12, 1.0, %v4257_v16 }
0x13dc   :  { %v2922_v45 = vmax.f32 %v2920_v55, %v2921_v13  ;;  %v2945_v40 = vsel %vm2916_vm13, %v2943_v27, -inf  ;;  %p4232_p11 = por %p4231_p10, %p4230_p9 }
0x13dd   :  { %v2947_v0 = vmax.f32 %v2945_v40, %v2946_v61 }
0x13de   :  { %v2923_v14 = vrot.slane %v2922_v45, 2  ;;  %p4233_p12 = pnand %p4232_p11, %p4226_p8 }
0x13df   :  { %v2948_v10 = vrot.slane %v2947_v0, 4 }
0x13e0   :  { %v2924_v53 = vmax.f32 %v2922_v45, %v2923_v14 }
0x13e1   :  { %v2949_v38 = vmax.f32 %v2947_v0, %v2948_v10 }
0x13e2   :  { %v2925_v46 = vrot.slane %v2924_v53, 1 }
0x13e3   :  { %v2950_v8 = vrot.slane %v2949_v38, 2 }
0x13e4   :  { %v2926_v4 = vmax.f32 %v2924_v53, %v2925_v46 }
0x13e5   :  { %v2951_v22 = vmax.f32 %v2949_v38, %v2950_v8  ;;  %v4274_v8 = vmov 4  }
0x13e6   :  { %v2928_v3 = vsel %vm5033_vm15, %v2926_v4, 0.0  ;;  %v2927_v2 = vsel %vm5026_vm12, %v2926_v4, 0.0 }
0x13e7   :  { %v2932_v17 = vsel %vm2918_vm14, %v2928_v3, 0.0  ;;  %v2929_v37 = vsel %vm2916_vm13, %v2927_v2, 0.0  ;;  %v2952_v43 = vrot.slane %v2951_v22, 1 }
0x13e8   :  { %2933 = vadd.xlane.f32.xlu0 %v2932_v17  ;;  %2930 = vadd.xlane.f32.xlu1 %v2929_v37 }
0x13e9   :  { %v2953_v6 = vmax.f32 %v2951_v22, %v2952_v43 }
0x13eb   :  { %v2955_v36 = vsel %vm5033_vm15, %v2953_v6, 0.0  ;;  %v2954_v24 = vsel %vm5026_vm12, %v2953_v6, 0.0 }
0x13ec   :  { %v2959_v7 = vsel %vm2918_vm14, %v2955_v36, 0.0  ;;  %v2956_v47 = vsel %vm2916_vm13, %v2954_v24, 0.0 }
0x13ed   :  { %2960 = vadd.xlane.f32.xlu0 %v2959_v7  ;;  %2957 = vadd.xlane.f32.xlu1 %v2956_v47 }
0x13fe   :  { %2775 = vperm.xlu1 %4135, %v4338_v19  }
0x1402   :  { %2964 = vrot.lane.b32.xlu1 %v5015_v29, %s4270_s1 }
0x1403   :  { %2779 = vperm.xlu0 %4136, %v4341_v21   ;;  %4143 = vset.pattern.permute.xlu1 %v4273_v20 }
0x1406   :  { %2966 = vrot.lane.b32.xlu1 %v5018_v52, %s4270_s1 }
0x1407   :  { %4142 = vset.pattern.permute.xlu0 %v4273_v20 }
0x1475   :  { %v2931_v25 = vpop.xlane.xlu1 %2930  ;;  %v2934_v26 = vpop.xlane.xlu0 %2933 }
0x147a   :  { %v2958_v63 = vpop.xlane.xlu1 %2957  ;;  %v2961_v35 = vpop.xlane.xlu0 %2960 }
0x147b   :  { %v2962_v34 = vsel %vm1116_vm5, %v2931_v25, %v2958_v63  ;;  %v2963_v5 = vsel %vm1116_vm5, %v2934_v26, %v2961_v35  ;;  %vm223_vm5 = vcmp.eq.s32.totalorder %v4532_v48, %v222_v30  ;;  %v3305_v48 = vsel %vm5033_vm15, 1.0, %v4257_v16 }
0x147c   :  { %2974 = vrot.lane.b32.xlu1 %v2962_v34, %s4271_s26  ;;  %v3306_v13 = vsel %vm223_vm5, 1.0, %v4257_v16 }
0x147e   :  { %v2776_v19 = vpop.permute.xlu1 %2775 }
0x147f   :  { %v2782_v54 = vmul.f32 %v4201_v50, %v2776_v19 }
0x1480   :  { %2976 = vrot.lane.b32.xlu1 %v2963_v5, %s4271_s26 }
0x1482   :  { %v2965_v51 = vpop.permute.xlu1 %2964  ;;  %v2780_v21 = vpop.permute.xlu0 %2779 }
0x1483   :  { %v2970_v39 = vadd.f32 %v2965_v51, %v2782_v54  ;;  %v2783_v57 = vmul.f32 %v4201_v50, %v2780_v21 }
0x1486   :  { %v2967_v28 = vpop.permute.xlu1 %2966 }
0x1487   :  { %v2971_v33 = vadd.f32 %v2967_v28, %v2783_v57 }
0x14ee   :  { %v2975_v11 = vpop.permute.xlu1 %2974 }
0x14ef   :  { %v2980_v60 = vsub.f32 %v2970_v39, %v2975_v11 }
0x14f1   :  { %v2982_v42 = vmul.f32 1.442695, %v2980_v60 }
0x14f2   :  { %v2977_v62 = vpop.permute.xlu1 %2976 }
0x14f3   :  { %v2981_v49 = vsub.f32 %v2971_v33, %v2977_v62  ;;  %4191 = vpow2.f32 %v2982_v42 }
0x14f5   :  { %v2984_v18 = vmul.f32 1.442695, %v2981_v49 }
0x14f7   :  { %4193 = vpow2.f32 %v2984_v18 }
0x14fd   :  { %v4192_v41 = vpop.eup %4191 }
0x14fe   :  { %v3068_v10 = vmul.f32 0.5, %v4192_v41 }
0x1501   :  { %v4194_v23 = vpop.eup %4193 }
0x1502   :  { %v4137_v32 = vpack.i.bf16 %v4194_v23, %v4192_v41 }
0x1504   :  { %4138 = vrot.lane.b32.xlu1 %v4137_v32, %s4272_s27 }
0x1576   :  { %v4139_v58 = vpop.permute.xlu1 %4138 }
0x1577   :  { %v4141_v1 = vunpack.i.h.bf16 %v4139_v58  ;;  %v4140_v55 = vunpack.i.l.bf16 %v4139_v58 }
0x1579   :  { %v4037_v9 = vpack.c.bf16 %v4141_v1, %v4140_v55 }
0x157b   :  { %4039 = vmatpush3.bf16.msk.msra.mxu0 %vm4358_vm6, %v4037_v9 }
0x157e   :  { %3818 = vmatmul.mubr.msk.f32.vlgmr.msra.gmra.mrb[54].mxu0 %vm239_vm7, %v3306_v13 }
0x157f   :  { %3822 = vmatprep.mubr.msk.f32.mxu0 %vm2916_vm13, %v3304_v44 }
0x1651   :  { %v3064_v56 = vpop.f32.mrb[54].mxu0 }
0x1652   :  { %3820 = vmatprep.subr.msk.mxu0 %vm3076_vm0, %v3064_v56  ;;  %v3819_v27 = vpop.f32.mrb[55].mxu0 }
0x1653   :  { %3821 = vmatpush3.msk.msra.mxu0 %vm3076_vm0, %v3064_v56 }
0x1654   :  { %3823 = vmatmul.mubr.msk.f32.vlgmr.msra.gmra.mrb[56].mxu0 %vm2916_vm13, %v3305_v48  ;;  %4040 = vmatprep.subr.bf16.mxu0 %v4255_v15 }
0x1655   :  { %3829 = vmatprep.mubr.msk.f32.mxu0 %vm4256_vm2, %v4257_v16  ;;  %v3069_v16 = vmul.f32 0.5, %v4194_v23  ;;  %vm3272_vm2 = vcmask 256000  }
0x1727   :  { %v3824_v45 = vpop.f32.mrb[56].mxu0 }
0x1728   :  { %v3146_v61 = vpop.f32.mrb[57].mxu0  ;;  %v3152_v0 = vadd.f32 1e-10, %v3824_v45 }
0x1729   :  { %v3147_v40 = vadd.f32 1e-10, %v3146_v61 }
0x172b   :  { %3157 = vrot.lane.b32.xlu1 %v3147_v40, %s4271_s26 }
0x172f   :  { %3159 = vrot.lane.b32.xlu1 %v3152_v0, %s4271_s26 }
0x179d   :  { %v3158_v59 = vpop.permute.xlu1 %3157 }
0x179e   :  { %4195 = vrcp.f32 %v3158_v59 }
0x17a1   :  { %v3160_v14 = vpop.permute.xlu1 %3159 }
0x17a2   :  { %4197 = vrcp.f32 %v3160_v14 }
0x17a8   :  { %v4196_v15 = vpop.eup %4195 }
0x17a9   :  { %v3164_v53 = vmul.f32 %v4196_v15, %v3068_v10 }
0x17ab   :  { %3180 = vperm.xlu0 %4142, %v3164_v53  }
0x17ac   :  { %v4198_v38 = vpop.eup %4197 }
0x17ad   :  { %v3166_v46 = vmul.f32 %v4198_v38, %v3069_v16 }
0x17af   :  { %4145 = vset.pattern.permute.xlu0 %v4274_v8  ;;  %3184 = vperm.xlu1 %4143, %v3166_v46  }
0x17b0   :  { %3174 = vperm.xlu0 %4145, %v3166_v46  }
0x17b3   :  { %4144 = vset.pattern.permute.xlu1 %v4274_v8 }
0x17b4   :  { %3169 = vperm.xlu1 %4144, %v3164_v53   ;;  %4146 = vset.pattern.permute.xlu0 %v4273_v20 }
0x182a   :  { %v3181_v4 = vpop.permute.xlu0 %3180 }
0x182b   :  { %v3187_v22 = vmul.f32 %v3181_v4, %v5015_v29 }
0x182d   :  { %3191 = vrot.lane.b32.xlu1 %v3187_v22, %s4259_s11 }
0x182e   :  { %v3185_v3 = vpop.permute.xlu1 %3184 }
0x182f   :  { %v3188_v2 = vmul.f32 %v3185_v3, %v5018_v52  ;;  %v3175_v37 = vpop.permute.xlu0 %3174 }
0x1830   :  { %v3178_v6 = vmul.f32 %v3175_v37, %v5018_v52 }
0x1831   :  { %3193 = vrot.lane.b32.xlu1 %v3188_v2, %s4259_s11 }
0x1833   :  { %v3170_v17 = vpop.permute.xlu1 %3169 }
0x1834   :  { %v3177_v36 = vmul.f32 %v3170_v17, %v5015_v29 }
0x189f   :  { %v3192_v43 = vpop.permute.xlu1 %3191 }
0x18a0   :  { %v3197_v7 = vadd.f32 %v3192_v43, %v3177_v36 }
0x18a3   :  { %v3194_v24 = vpop.permute.xlu1 %3193 }
0x18a4   :  { %v3198_v47 = vadd.f32 %v3194_v24, %v3178_v6 }
0x18a6   :  { %v4041_v25 = vpack.c.bf16 %v3198_v47, %v3197_v7 }
0x18a8   :  { %4043 = vmatpush3.bf16.msk.msra.mxu0 %vm4358_vm6, %v4041_v25 }
0x18ab   :  { %3830 = vmatmul.mubr.msk.f32.vlgmr.msra.gmra.mrb[58].mxu0 %vm239_vm7, %v3306_v13 }
0x197e   :  { %v3268_v26 = vpop.f32.mrb[58].mxu0 }
0x197f   :  { %v3831_v63 = vpop.f32.mrb[59].mxu0  ;;  %3273 = vst.msk [vmem:[#allocation5] sm:$0x7] %vm3272_vm2, %v3268_v26 }
0x1980   :  { %4236 = shalt.err (!%p4233_p12)
}
0x1981   :  { %s4237_s7 = scalar_lea.hbm %s5114_s4, 64 }
0x1982   :  { %p4238_p13 = scmp.ne.s32.totalorder %s5114_s4, %s4237_s7  ;;  %p4241_p0 = scmp.lt.u32.totalorder %s4237_s7, %s5114_s4 }
0x1984   :  { %p4243_p1 = pnand %p4241_p0, %p4238_p13 }
0x1986   :  { %4246 = shalt.err (!%p4243_p1)
}
0x1987   :  { %3283 = dma.vmem_to_hbm [thread:$0]  %s3281_s30, 64, %s5114_s4, [#allocation4]  }
0x1988   :  { %4249 = dma.done.wait [#allocation4], 64  }
0x1989   :  { %4250 = vsyncadd [#allocation4], 4294967232 }
0x198a   :  { %3287 = vsyncpa [#allocation3], 1 }
0x198b   :  { %3288 = vsyncpa [#allocation4], 1 }

</bundles_post_ra>
